<compile_context>
chip_gen: v7x
topology: tpu7x:2x2x1
jax: 0.10.0
libtpu: 0.0.40
codegen_flags: <defaults>
</compile_context>

<pallas_src>
import jax
import jax.numpy as jnp
from jax.experimental import pallas as pl
from jax.experimental.pallas import tpu as pltpu

EPS = 1e-5   # PyTorch BatchNorm1d default eps
LANE = 128


def _round_up(n, m):
    return ((n + m - 1) // m) * m


def _resblock(x_f32, w_bf16, b, scale, shift):
    # z = layer1(x)  (bf16 MXU inputs, f32 accumulation)
    z = jnp.dot(x_f32.astype(jnp.bfloat16), w_bf16,
                preferred_element_type=jnp.float32) + b
    # relu(bn1(z)) with BN folded into scale/shift (eval mode), all f32
    h = jnp.maximum(z * scale + shift, 0.0)
    # dropout(p=0.5) is identity in eval mode; residual is layer1(x) == z
    return h + z


def nn_kernel(x_ref,
              w1, b1, s1, t1,
              w2, b2, s2, t2,
              w3, b3, s3, t3,
              w4, b4, s4, t4,
              w5, b5, s5, t5,
              sf, tf, w6, b6,
              out_ref):
    x = x_ref[...]
    x = _resblock(x, w1[...], b1[...], s1[...], t1[...])
    x = _resblock(x, w2[...], b2[...], s2[...], t2[...])
    x = _resblock(x, w3[...], b3[...], s3[...], t3[...])
    # top-level dropout: identity in eval mode
    x = _resblock(x, w4[...], b4[...], s4[...], t4[...])
    x = _resblock(x, w5[...], b5[...], s5[...], t5[...])
    x = jnp.maximum(x * sf[...] + tf[...], 0.0)   # relu(bn_final(x)), folded
    # second top-level dropout: identity in eval mode
    out_ref[...] = jnp.dot(x.astype(jnp.bfloat16), w6[...],
                           preferred_element_type=jnp.float32) + b6[...]


def _fold_bn(bn):
    scale = bn["gamma"] * jax.lax.rsqrt(bn["var"] + EPS)
    shift = bn["beta"] - bn["mean"] * scale
    return scale, shift


def neural_network_forward(x, params, *, tm=128):
    batch, in_features = x.shape
    num_classes = params["w6"].shape[1]

    # ---- fold BN into scale/shift, cast weights to bf16 (done once, outside the kernel) ----
    flat = []
    for blk in params["blocks"]:
        scale, shift = _fold_bn(blk["bn"])
        flat += [blk["w"].astype(jnp.bfloat16), blk["b"], scale, shift]
    sf, tf = _fold_bn(params["bn_final"])
    # pad logits dim to a lane-dense multiple of 128 (zero columns, sliced off below)
    n_pad = _round_up(max(num_classes, LANE), LANE)
    w6 = jnp.zeros((params["w6"].shape[0], n_pad), jnp.bfloat16)
    w6 = w6.at[:, :num_classes].set(params["w6"].astype(jnp.bfloat16))
    b6 = jnp.zeros((1, n_pad), jnp.float32).at[:, :num_classes].set(params["b6"])
    flat += [sf, tf, w6, b6]

    # ---- batch tiling: pad batch to a multiple of the batch tile ----
    tm_eff = min(tm, _round_up(batch, 8))
    b_pad = _round_up(batch, tm_eff)
    if b_pad != batch:
        x = jnp.pad(x, ((0, b_pad - batch), (0, 0)))
    grid = (b_pad // tm_eff,)

    def _resident(arr):
        # full-array block, constant index_map -> stays resident in VMEM across grid steps
        return pl.BlockSpec(arr.shape, lambda i: (0,) * arr.ndim)

    in_specs = [pl.BlockSpec((tm_eff, in_features), lambda i: (i, 0))]
    in_specs += [_resident(a) for a in flat]

    out = pl.pallas_call(
        nn_kernel,
        out_shape=jax.ShapeDtypeStruct((b_pad, n_pad), jnp.float32),
        grid=grid,
        in_specs=in_specs,
        out_specs=pl.BlockSpec((tm_eff, n_pad), lambda i: (i, 0)),
        compiler_params=pltpu.CompilerParams(
            dimension_semantics=("parallel",),   # batch tiles are independent (v7x: 2 TCs)
        ),
    )(x, *flat)
    return out[:batch, :num_classes]


# ---------------- pure-JAX reference (f32, unfolded BN) for a sanity check ----------------
def neural_network_reference(x, params):
    def bn_eval(z, bn):
        return (z - bn["mean"]) * jax.lax.rsqrt(bn["var"] + EPS) * bn["gamma"] + bn["beta"]

    h = x
    for blk in params["blocks"]:
        z = h @ blk["w"] + blk["b"]
        h = jnp.maximum(bn_eval(z, blk["bn"]), 0.0) + z
    h = jnp.maximum(bn_eval(h, params["bn_final"]), 0.0)
    return h @ params["w6"] + params["b6"]


def init_params(key, input_size, num_classes):
    dims = [input_size, 512, 256, 128, 64, 32]
    blocks = []
    for i in range(5):
        key, kw, kb, km, kv = jax.random.split(key, 5)
        fan_in, fan_out = dims[i], dims[i + 1]
        w = jax.random.normal(kw, (fan_in, fan_out), jnp.float32) / jnp.sqrt(
            jnp.float32(fan_in))
        b = 0.01 * jax.random.normal(kb, (1, fan_out), jnp.float32)
        bn = dict(
            gamma=jnp.ones((1, fan_out), jnp.float32),
            beta=jnp.zeros((1, fan_out), jnp.float32),
            mean=0.1 * jax.random.normal(km, (1, fan_out), jnp.float32),
            var=1.0 + 0.1 * jnp.abs(jax.random.normal(kv, (1, fan_out), jnp.float32)),
        )
        blocks.append({"w": w, "b": b, "bn": bn})

    key, kmf, kvf, kw6, kb6 = jax.random.split(key, 5)
    bn_final = dict(
        gamma=jnp.ones((1, 32), jnp.float32),
        beta=jnp.zeros((1, 32), jnp.float32),
        mean=0.1 * jax.random.normal(kmf, (1, 32), jnp.float32),
        var=1.0 + 0.1 * jnp.abs(jax.random.normal(kvf, (1, 32), jnp.float32)),
    )
    w6 = jax.random.normal(kw6, (32, num_classes), jnp.float32) / jnp.sqrt(32.0)
    b6 = 0.01 * jax.random.normal(kb6, (1, num_classes), jnp.float32)
    return {"blocks": blocks, "bn_final": bn_final, "w6": w6, "b6": b6}


if __name__ == "__main__":
    # TODO(synk): training-mode parity (dropout masks, BN batch statistics) is out of scope;
    # this kernel implements the eval/inference forward pass.
    batch = 200          # not a multiple of the 128-row tile -> exercises padding + 2-step grid
    input_size = 48      # stands in for X_train.shape[1]
    num_classes = 10     # stands in for len(np.unique(y)); padded to 128 lanes internally

    root = jax.random.PRNGKey(0)
    kx, kp = jax.random.split(root)
    x = jax.random.normal(kx, (batch, input_size), jnp.float32)
    params = init_params(kp, input_size, num_classes)

    out = jax.block_until_ready(neural_network_forward(x, params))
    assert out.shape == (batch, num_classes), out.shape
    assert bool(jnp.all(jnp.isfinite(out)))

    ref = neural_network_reference(x, params)
    err = float(jnp.max(jnp.abs(out - ref)) / (jnp.max(jnp.abs(ref)) + 1e-6))
    assert err < 5e-2, f"normalized max error too large: {err}"
    print("KERNEL_OK")
</pallas_src>

<mosaic_0001>
module attributes {stable_mosaic.version = 11 : i64} {
  func.func @nn_kernel(%arg0: i32, %arg1: memref<128x48xf32, #tpu.memory_space<vmem>>, %arg2: memref<48x512xbf16, #tpu.memory_space<vmem>>, %arg3: memref<1x512xf32, #tpu.memory_space<vmem>>, %arg4: memref<1x512xf32, #tpu.memory_space<vmem>>, %arg5: memref<1x512xf32, #tpu.memory_space<vmem>>, %arg6: memref<512x256xbf16, #tpu.memory_space<vmem>>, %arg7: memref<1x256xf32, #tpu.memory_space<vmem>>, %arg8: memref<1x256xf32, #tpu.memory_space<vmem>>, %arg9: memref<1x256xf32, #tpu.memory_space<vmem>>, %arg10: memref<256x128xbf16, #tpu.memory_space<vmem>>, %arg11: memref<1x128xf32, #tpu.memory_space<vmem>>, %arg12: memref<1x128xf32, #tpu.memory_space<vmem>>, %arg13: memref<1x128xf32, #tpu.memory_space<vmem>>, %arg14: memref<128x64xbf16, #tpu.memory_space<vmem>>, %arg15: memref<1x64xf32, #tpu.memory_space<vmem>>, %arg16: memref<1x64xf32, #tpu.memory_space<vmem>>, %arg17: memref<1x64xf32, #tpu.memory_space<vmem>>, %arg18: memref<64x32xbf16, #tpu.memory_space<vmem>>, %arg19: memref<1x32xf32, #tpu.memory_space<vmem>>, %arg20: memref<1x32xf32, #tpu.memory_space<vmem>>, %arg21: memref<1x32xf32, #tpu.memory_space<vmem>>, %arg22: memref<1x32xf32, #tpu.memory_space<vmem>>, %arg23: memref<1x32xf32, #tpu.memory_space<vmem>>, %arg24: memref<32x128xbf16, #tpu.memory_space<vmem>>, %arg25: memref<1x128xf32, #tpu.memory_space<vmem>>, %arg26: memref<128x128xf32, #tpu.memory_space<vmem>>) attributes {dimension_semantics = [#tpu.dimension_semantics<parallel>], iteration_bounds = array<i64: 2>, scalar_prefetch = 0 : i64, scratch_operands = 0 : i64, tpu.core_type = #tpu.core_type<tc>, window_params = [{transform_indices = @transform_0, window_bounds = array<i64: 128, 48>}, {pipeline_mode = #tpu.pipeline_mode<synchronous>, transform_indices = @transform_1, window_bounds = array<i64: 48, 512>}, {pipeline_mode = #tpu.pipeline_mode<synchronous>, transform_indices = @transform_2, window_bounds = array<i64: 1, 512>}, {pipeline_mode = #tpu.pipeline_mode<synchronous>, transform_indices = @transform_3, window_bounds = array<i64: 1, 512>}, {pipeline_mode = #tpu.pipeline_mode<synchronous>, transform_indices = @transform_4, window_bounds = array<i64: 1, 512>}, {pipeline_mode = #tpu.pipeline_mode<synchronous>, transform_indices = @transform_5, window_bounds = array<i64: 512, 256>}, {pipeline_mode = #tpu.pipeline_mode<synchronous>, transform_indices = @transform_6, window_bounds = array<i64: 1, 256>}, {pipeline_mode = #tpu.pipeline_mode<synchronous>, transform_indices = @transform_7, window_bounds = array<i64: 1, 256>}, {pipeline_mode = #tpu.pipeline_mode<synchronous>, transform_indices = @transform_8, window_bounds = array<i64: 1, 256>}, {pipeline_mode = #tpu.pipeline_mode<synchronous>, transform_indices = @transform_9, window_bounds = array<i64: 256, 128>}, {pipeline_mode = #tpu.pipeline_mode<synchronous>, transform_indices = @transform_10, window_bounds = array<i64: 1, 128>}, {pipeline_mode = #tpu.pipeline_mode<synchronous>, transform_indices = @transform_11, window_bounds = array<i64: 1, 128>}, {pipeline_mode = #tpu.pipeline_mode<synchronous>, transform_indices = @transform_12, window_bounds = array<i64: 1, 128>}, {pipeline_mode = #tpu.pipeline_mode<synchronous>, transform_indices = @transform_13, window_bounds = array<i64: 128, 64>}, {pipeline_mode = #tpu.pipeline_mode<synchronous>, transform_indices = @transform_14, window_bounds = array<i64: 1, 64>}, {pipeline_mode = #tpu.pipeline_mode<synchronous>, transform_indices = @transform_15, window_bounds = array<i64: 1, 64>}, {pipeline_mode = #tpu.pipeline_mode<synchronous>, transform_indices = @transform_16, window_bounds = array<i64: 1, 64>}, {pipeline_mode = #tpu.pipeline_mode<synchronous>, transform_indices = @transform_17, window_bounds = array<i64: 64, 32>}, {pipeline_mode = #tpu.pipeline_mode<synchronous>, transform_indices = @transform_18, window_bounds = array<i64: 1, 32>}, {pipeline_mode = #tpu.pipeline_mode<synchronous>, transform_indices = @transform_19, window_bounds = array<i64: 1, 32>}, {pipeline_mode = #tpu.pipeline_mode<synchronous>, transform_indices = @transform_20, window_bounds = array<i64: 1, 32>}, {pipeline_mode = #tpu.pipeline_mode<synchronous>, transform_indices = @transform_21, window_bounds = array<i64: 1, 32>}, {pipeline_mode = #tpu.pipeline_mode<synchronous>, transform_indices = @transform_22, window_bounds = array<i64: 1, 32>}, {pipeline_mode = #tpu.pipeline_mode<synchronous>, transform_indices = @transform_23, window_bounds = array<i64: 32, 128>}, {pipeline_mode = #tpu.pipeline_mode<synchronous>, transform_indices = @transform_24, window_bounds = array<i64: 1, 128>}, {transform_indices = @transform_25, window_bounds = array<i64: 128, 128>}]} {
    %c0 = arith.constant 0 : index
    %c0_0 = arith.constant 0 : index
    %0 = vector.load %arg1[%c0, %c0_0] : memref<128x48xf32, #tpu.memory_space<vmem>>, vector<128x48xf32>
    %c0_1 = arith.constant 0 : index
    %c0_2 = arith.constant 0 : index
    %1 = vector.load %arg2[%c0_1, %c0_2] : memref<48x512xbf16, #tpu.memory_space<vmem>>, vector<48x512xbf16>
    %c0_3 = arith.constant 0 : index
    %c0_4 = arith.constant 0 : index
    %2 = vector.load %arg3[%c0_3, %c0_4] : memref<1x512xf32, #tpu.memory_space<vmem>>, vector<1x512xf32>
    %c0_5 = arith.constant 0 : index
    %c0_6 = arith.constant 0 : index
    %3 = vector.load %arg4[%c0_5, %c0_6] : memref<1x512xf32, #tpu.memory_space<vmem>>, vector<1x512xf32>
    %c0_7 = arith.constant 0 : index
    %c0_8 = arith.constant 0 : index
    %4 = vector.load %arg5[%c0_7, %c0_8] : memref<1x512xf32, #tpu.memory_space<vmem>>, vector<1x512xf32>
    %5 = arith.truncf %0 : vector<128x48xf32> to vector<128x48xbf16>
    %cst = arith.constant dense<0.000000e+00> : vector<128x512xf32>
    %6 = tpu.matmul %5, %1, %cst {dimension_numbers = #tpu.dot_dimension_numbers<[1], [0], [0], [1], [0, 0, 1, 1], [], []>} : vector<128x48xbf16>, vector<48x512xbf16>, vector<128x512xf32> -> vector<128x512xf32>
    %7 = vector.broadcast %2 : vector<1x512xf32> to vector<128x512xf32>
    %8 = arith.addf %6, %7 : vector<128x512xf32>
    %9 = vector.broadcast %3 : vector<1x512xf32> to vector<128x512xf32>
    %10 = arith.mulf %8, %9 : vector<128x512xf32>
    %11 = vector.broadcast %4 : vector<1x512xf32> to vector<128x512xf32>
    %12 = arith.addf %10, %11 : vector<128x512xf32>
    %cst_9 = arith.constant 0.000000e+00 : f32
    %13 = vector.broadcast %cst_9 : f32 to vector<128x512xf32>
    %14 = arith.maximumf %12, %13 : vector<128x512xf32>
    %15 = arith.addf %14, %8 : vector<128x512xf32>
    %c0_10 = arith.constant 0 : index
    %c0_11 = arith.constant 0 : index
    %16 = vector.load %arg6[%c0_10, %c0_11] : memref<512x256xbf16, #tpu.memory_space<vmem>>, vector<512x256xbf16>
    %c0_12 = arith.constant 0 : index
    %c0_13 = arith.constant 0 : index
    %17 = vector.load %arg7[%c0_12, %c0_13] : memref<1x256xf32, #tpu.memory_space<vmem>>, vector<1x256xf32>
    %c0_14 = arith.constant 0 : index
    %c0_15 = arith.constant 0 : index
    %18 = vector.load %arg8[%c0_14, %c0_15] : memref<1x256xf32, #tpu.memory_space<vmem>>, vector<1x256xf32>
    %c0_16 = arith.constant 0 : index
    %c0_17 = arith.constant 0 : index
    %19 = vector.load %arg9[%c0_16, %c0_17] : memref<1x256xf32, #tpu.memory_space<vmem>>, vector<1x256xf32>
    %20 = arith.truncf %15 : vector<128x512xf32> to vector<128x512xbf16>
    %cst_18 = arith.constant dense<0.000000e+00> : vector<128x256xf32>
    %21 = tpu.matmul %20, %16, %cst_18 {dimension_numbers = #tpu.dot_dimension_numbers<[1], [0], [0], [1], [0, 0, 1, 1], [], []>} : vector<128x512xbf16>, vector<512x256xbf16>, vector<128x256xf32> -> vector<128x256xf32>
    %22 = vector.broadcast %17 : vector<1x256xf32> to vector<128x256xf32>
    %23 = arith.addf %21, %22 : vector<128x256xf32>
    %24 = vector.broadcast %18 : vector<1x256xf32> to vector<128x256xf32>
    %25 = arith.mulf %23, %24 : vector<128x256xf32>
    %26 = vector.broadcast %19 : vector<1x256xf32> to vector<128x256xf32>
    %27 = arith.addf %25, %26 : vector<128x256xf32>
    %cst_19 = arith.constant 0.000000e+00 : f32
    %28 = vector.broadcast %cst_19 : f32 to vector<128x256xf32>
    %29 = arith.maximumf %27, %28 : vector<128x256xf32>
    %30 = arith.addf %29, %23 : vector<128x256xf32>
    %c0_20 = arith.constant 0 : index
    %c0_21 = arith.constant 0 : index
    %31 = vector.load %arg10[%c0_20, %c0_21] : memref<256x128xbf16, #tpu.memory_space<vmem>>, vector<256x128xbf16>
    %c0_22 = arith.constant 0 : index
    %c0_23 = arith.constant 0 : index
    %32 = vector.load %arg11[%c0_22, %c0_23] : memref<1x128xf32, #tpu.memory_space<vmem>>, vector<1x128xf32>
    %c0_24 = arith.constant 0 : index
    %c0_25 = arith.constant 0 : index
    %33 = vector.load %arg12[%c0_24, %c0_25] : memref<1x128xf32, #tpu.memory_space<vmem>>, vector<1x128xf32>
    %c0_26 = arith.constant 0 : index
    %c0_27 = arith.constant 0 : index
    %34 = vector.load %arg13[%c0_26, %c0_27] : memref<1x128xf32, #tpu.memory_space<vmem>>, vector<1x128xf32>
    %35 = arith.truncf %30 : vector<128x256xf32> to vector<128x256xbf16>
    %cst_28 = arith.constant dense<0.000000e+00> : vector<128x128xf32>
    %36 = tpu.matmul %35, %31, %cst_28 {dimension_numbers = #tpu.dot_dimension_numbers<[1], [0], [0], [1], [0, 0, 1, 1], [], []>} : vector<128x256xbf16>, vector<256x128xbf16>, vector<128x128xf32> -> vector<128x128xf32>
    %37 = vector.broadcast %32 : vector<1x128xf32> to vector<128x128xf32>
    %38 = arith.addf %36, %37 : vector<128x128xf32>
    %39 = vector.broadcast %33 : vector<1x128xf32> to vector<128x128xf32>
    %40 = arith.mulf %38, %39 : vector<128x128xf32>
    %41 = vector.broadcast %34 : vector<1x128xf32> to vector<128x128xf32>
    %42 = arith.addf %40, %41 : vector<128x128xf32>
    %cst_29 = arith.constant 0.000000e+00 : f32
    %43 = vector.broadcast %cst_29 : f32 to vector<128x128xf32>
    %44 = arith.maximumf %42, %43 : vector<128x128xf32>
    %45 = arith.addf %44, %38 : vector<128x128xf32>
    %c0_30 = arith.constant 0 : index
    %c0_31 = arith.constant 0 : index
    %46 = vector.load %arg14[%c0_30, %c0_31] : memref<128x64xbf16, #tpu.memory_space<vmem>>, vector<128x64xbf16>
    %c0_32 = arith.constant 0 : index
    %c0_33 = arith.constant 0 : index
    %47 = vector.load %arg15[%c0_32, %c0_33] : memref<1x64xf32, #tpu.memory_space<vmem>>, vector<1x64xf32>
    %c0_34 = arith.constant 0 : index
    %c0_35 = arith.constant 0 : index
    %48 = vector.load %arg16[%c0_34, %c0_35] : memref<1x64xf32, #tpu.memory_space<vmem>>, vector<1x64xf32>
    %c0_36 = arith.constant 0 : index
    %c0_37 = arith.constant 0 : index
    %49 = vector.load %arg17[%c0_36, %c0_37] : memref<1x64xf32, #tpu.memory_space<vmem>>, vector<1x64xf32>
    %50 = arith.truncf %45 : vector<128x128xf32> to vector<128x128xbf16>
    %cst_38 = arith.constant dense<0.000000e+00> : vector<128x64xf32>
    %51 = tpu.matmul %50, %46, %cst_38 {dimension_numbers = #tpu.dot_dimension_numbers<[1], [0], [0], [1], [0, 0, 1, 1], [], []>} : vector<128x128xbf16>, vector<128x64xbf16>, vector<128x64xf32> -> vector<128x64xf32>
    %52 = vector.broadcast %47 : vector<1x64xf32> to vector<128x64xf32>
    %53 = arith.addf %51, %52 : vector<128x64xf32>
    %54 = vector.broadcast %48 : vector<1x64xf32> to vector<128x64xf32>
    %55 = arith.mulf %53, %54 : vector<128x64xf32>
    %56 = vector.broadcast %49 : vector<1x64xf32> to vector<128x64xf32>
    %57 = arith.addf %55, %56 : vector<128x64xf32>
    %cst_39 = arith.constant 0.000000e+00 : f32
    %58 = vector.broadcast %cst_39 : f32 to vector<128x64xf32>
    %59 = arith.maximumf %57, %58 : vector<128x64xf32>
    %60 = arith.addf %59, %53 : vector<128x64xf32>
    %c0_40 = arith.constant 0 : index
    %c0_41 = arith.constant 0 : index
    %61 = vector.load %arg18[%c0_40, %c0_41] : memref<64x32xbf16, #tpu.memory_space<vmem>>, vector<64x32xbf16>
    %c0_42 = arith.constant 0 : index
    %c0_43 = arith.constant 0 : index
    %62 = vector.load %arg19[%c0_42, %c0_43] : memref<1x32xf32, #tpu.memory_space<vmem>>, vector<1x32xf32>
    %c0_44 = arith.constant 0 : index
    %c0_45 = arith.constant 0 : index
    %63 = vector.load %arg20[%c0_44, %c0_45] : memref<1x32xf32, #tpu.memory_space<vmem>>, vector<1x32xf32>
    %c0_46 = arith.constant 0 : index
    %c0_47 = arith.constant 0 : index
    %64 = vector.load %arg21[%c0_46, %c0_47] : memref<1x32xf32, #tpu.memory_space<vmem>>, vector<1x32xf32>
    %65 = arith.truncf %60 : vector<128x64xf32> to vector<128x64xbf16>
    %cst_48 = arith.constant dense<0.000000e+00> : vector<128x32xf32>
    %66 = tpu.matmul %65, %61, %cst_48 {dimension_numbers = #tpu.dot_dimension_numbers<[1], [0], [0], [1], [0, 0, 1, 1], [], []>} : vector<128x64xbf16>, vector<64x32xbf16>, vector<128x32xf32> -> vector<128x32xf32>
    %67 = vector.broadcast %62 : vector<1x32xf32> to vector<128x32xf32>
    %68 = arith.addf %66, %67 : vector<128x32xf32>
    %69 = vector.broadcast %63 : vector<1x32xf32> to vector<128x32xf32>
    %70 = arith.mulf %68, %69 : vector<128x32xf32>
    %71 = vector.broadcast %64 : vector<1x32xf32> to vector<128x32xf32>
    %72 = arith.addf %70, %71 : vector<128x32xf32>
    %cst_49 = arith.constant 0.000000e+00 : f32
    %73 = vector.broadcast %cst_49 : f32 to vector<128x32xf32>
    %74 = arith.maximumf %72, %73 : vector<128x32xf32>
    %75 = arith.addf %74, %68 : vector<128x32xf32>
    %c0_50 = arith.constant 0 : index
    %c0_51 = arith.constant 0 : index
    %76 = vector.load %arg22[%c0_50, %c0_51] : memref<1x32xf32, #tpu.memory_space<vmem>>, vector<1x32xf32>
    %77 = vector.broadcast %76 : vector<1x32xf32> to vector<128x32xf32>
    %78 = arith.mulf %75, %77 : vector<128x32xf32>
    %c0_52 = arith.constant 0 : index
    %c0_53 = arith.constant 0 : index
    %79 = vector.load %arg23[%c0_52, %c0_53] : memref<1x32xf32, #tpu.memory_space<vmem>>, vector<1x32xf32>
    %80 = vector.broadcast %79 : vector<1x32xf32> to vector<128x32xf32>
    %81 = arith.addf %78, %80 : vector<128x32xf32>
    %cst_54 = arith.constant 0.000000e+00 : f32
    %82 = vector.broadcast %cst_54 : f32 to vector<128x32xf32>
    %83 = arith.maximumf %81, %82 : vector<128x32xf32>
    %84 = arith.truncf %83 : vector<128x32xf32> to vector<128x32xbf16>
    %c0_55 = arith.constant 0 : index
    %c0_56 = arith.constant 0 : index
    %85 = vector.load %arg24[%c0_55, %c0_56] : memref<32x128xbf16, #tpu.memory_space<vmem>>, vector<32x128xbf16>
    %cst_57 = arith.constant dense<0.000000e+00> : vector<128x128xf32>
    %86 = tpu.matmul %84, %85, %cst_57 {dimension_numbers = #tpu.dot_dimension_numbers<[1], [0], [0], [1], [0, 0, 1, 1], [], []>} : vector<128x32xbf16>, vector<32x128xbf16>, vector<128x128xf32> -> vector<128x128xf32>
    %c0_58 = arith.constant 0 : index
    %c0_59 = arith.constant 0 : index
    %87 = vector.load %arg25[%c0_58, %c0_59] : memref<1x128xf32, #tpu.memory_space<vmem>>, vector<1x128xf32>
    %88 = vector.broadcast %87 : vector<1x128xf32> to vector<128x128xf32>
    %89 = arith.addf %86, %88 : vector<128x128xf32>
    %c0_60 = arith.constant 0 : index
    %c0_61 = arith.constant 0 : index
    %90 = vector.load %arg26[%c0_60, %c0_61] : memref<128x128xf32, #tpu.memory_space<vmem>>, vector<128x128xf32>
    tpu.vector_store %arg26[%c0_60, %c0_61], %89 {strides = array<i32>} : memref<128x128xf32, #tpu.memory_space<vmem>>, vector<128x128xf32>,
    return
  }
  func.func @transform_0(%arg0: i32) -> (i32, i32) {
    %c0_i32 = arith.constant 0 : i32
    %c0_i32_0 = arith.constant 0 : i32
    return %arg0, %c0_i32 : i32, i32
  }
  func.func @transform_1(%arg0: i32) -> (i32, i32) {
    %c0_i32 = arith.constant 0 : i32
    %c0_i32_0 = arith.constant 0 : i32
    %c0_i32_1 = arith.constant 0 : i32
    return %c0_i32, %c0_i32_0 : i32, i32
  }
  func.func @transform_2(%arg0: i32) -> (i32, i32) {
    %c0_i32 = arith.constant 0 : i32
    %c0_i32_0 = arith.constant 0 : i32
    %c0_i32_1 = arith.constant 0 : i32
    return %c0_i32, %c0_i32_0 : i32, i32
  }
  func.func @transform_3(%arg0: i32) -> (i32, i32) {
    %c0_i32 = arith.constant 0 : i32
    %c0_i32_0 = arith.constant 0 : i32
    %c0_i32_1 = arith.constant 0 : i32
    return %c0_i32, %c0_i32_0 : i32, i32
  }
  func.func @transform_4(%arg0: i32) -> (i32, i32) {
    %c0_i32 = arith.constant 0 : i32
    %c0_i32_0 = arith.constant 0 : i32
    %c0_i32_1 = arith.constant 0 : i32
    return %c0_i32, %c0_i32_0 : i32, i32
  }
  func.func @transform_5(%arg0: i32) -> (i32, i32) {
    %c0_i32 = arith.constant 0 : i32
    %c0_i32_0 = arith.constant 0 : i32
    %c0_i32_1 = arith.constant 0 : i32
    return %c0_i32, %c0_i32_0 : i32, i32
  }
  func.func @transform_6(%arg0: i32) -> (i32, i32) {
    %c0_i32 = arith.constant 0 : i32
    %c0_i32_0 = arith.constant 0 : i32
    %c0_i32_1 = arith.constant 0 : i32
    return %c0_i32, %c0_i32_0 : i32, i32
  }
  func.func @transform_7(%arg0: i32) -> (i32, i32) {
    %c0_i32 = arith.constant 0 : i32
    %c0_i32_0 = arith.constant 0 : i32
    %c0_i32_1 = arith.constant 0 : i32
    return %c0_i32, %c0_i32_0 : i32, i32
  }
  func.func @transform_8(%arg0: i32) -> (i32, i32) {
    %c0_i32 = arith.constant 0 : i32
    %c0_i32_0 = arith.constant 0 : i32
    %c0_i32_1 = arith.constant 0 : i32
    return %c0_i32, %c0_i32_0 : i32, i32
  }
  func.func @transform_9(%arg0: i32) -> (i32, i32) {
    %c0_i32 = arith.constant 0 : i32
    %c0_i32_0 = arith.constant 0 : i32
    %c0_i32_1 = arith.constant 0 : i32
    return %c0_i32, %c0_i32_0 : i32, i32
  }
  func.func @transform_10(%arg0: i32) -> (i32, i32) {
    %c0_i32 = arith.constant 0 : i32
    %c0_i32_0 = arith.constant 0 : i32
    %c0_i32_1 = arith.constant 0 : i32
    return %c0_i32, %c0_i32_0 : i32, i32
  }
  func.func @transform_11(%arg0: i32) -> (i32, i32) {
    %c0_i32 = arith.constant 0 : i32
    %c0_i32_0 = arith.constant 0 : i32
    %c0_i32_1 = arith.constant 0 : i32
    return %c0_i32, %c0_i32_0 : i32, i32
  }
  func.func @transform_12(%arg0: i32) -> (i32, i32) {
    %c0_i32 = arith.constant 0 : i32
    %c0_i32_0 = arith.constant 0 : i32
    %c0_i32_1 = arith.constant 0 : i32
    return %c0_i32, %c0_i32_0 : i32, i32
  }
  func.func @transform_13(%arg0: i32) -> (i32, i32) {
    %c0_i32 = arith.constant 0 : i32
    %c0_i32_0 = arith.constant 0 : i32
    %c0_i32_1 = arith.constant 0 : i32
    return %c0_i32, %c0_i32_0 : i32, i32
  }
  func.func @transform_14(%arg0: i32) -> (i32, i32) {
    %c0_i32 = arith.constant 0 : i32
    %c0_i32_0 = arith.constant 0 : i32
    %c0_i32_1 = arith.constant 0 : i32
    return %c0_i32, %c0_i32_0 : i32, i32
  }
  func.func @transform_15(%arg0: i32) -> (i32, i32) {
    %c0_i32 = arith.constant 0 : i32
    %c0_i32_0 = arith.constant 0 : i32
    %c0_i32_1 = arith.constant 0 : i32
    return %c0_i32, %c0_i32_0 : i32, i32
  }
  func.func @transform_16(%arg0: i32) -> (i32, i32) {
    %c0_i32 = arith.constant 0 : i32
    %c0_i32_0 = arith.constant 0 : i32
    %c0_i32_1 = arith.constant 0 : i32
    return %c0_i32, %c0_i32_0 : i32, i32
  }
  func.func @transform_17(%arg0: i32) -> (i32, i32) {
    %c0_i32 = arith.constant 0 : i32
    %c0_i32_0 = arith.constant 0 : i32
    %c0_i32_1 = arith.constant 0 : i32
    return %c0_i32, %c0_i32_0 : i32, i32
  }
  func.func @transform_18(%arg0: i32) -> (i32, i32) {
    %c0_i32 = arith.constant 0 : i32
    %c0_i32_0 = arith.constant 0 : i32
    %c0_i32_1 = arith.constant 0 : i32
    return %c0_i32, %c0_i32_0 : i32, i32
  }
  func.func @transform_19(%arg0: i32) -> (i32, i32) {
    %c0_i32 = arith.constant 0 : i32
    %c0_i32_0 = arith.constant 0 : i32
    %c0_i32_1 = arith.constant 0 : i32
    return %c0_i32, %c0_i32_0 : i32, i32
  }
  func.func @transform_20(%arg0: i32) -> (i32, i32) {
    %c0_i32 = arith.constant 0 : i32
    %c0_i32_0 = arith.constant 0 : i32
    %c0_i32_1 = arith.constant 0 : i32
    return %c0_i32, %c0_i32_0 : i32, i32
  }
  func.func @transform_21(%arg0: i32) -> (i32, i32) {
    %c0_i32 = arith.constant 0 : i32
    %c0_i32_0 = arith.constant 0 : i32
    %c0_i32_1 = arith.constant 0 : i32
    return %c0_i32, %c0_i32_0 : i32, i32
  }
  func.func @transform_22(%arg0: i32) -> (i32, i32) {
    %c0_i32 = arith.constant 0 : i32
    %c0_i32_0 = arith.constant 0 : i32
    %c0_i32_1 = arith.constant 0 : i32
    return %c0_i32, %c0_i32_0 : i32, i32
  }
  func.func @transform_23(%arg0: i32) -> (i32, i32) {
    %c0_i32 = arith.constant 0 : i32
    %c0_i32_0 = arith.constant 0 : i32
    %c0_i32_1 = arith.constant 0 : i32
    return %c0_i32, %c0_i32_0 : i32, i32
  }
  func.func @transform_24(%arg0: i32) -> (i32, i32) {
    %c0_i32 = arith.constant 0 : i32
    %c0_i32_0 = arith.constant 0 : i32
    %c0_i32_1 = arith.constant 0 : i32
    return %c0_i32, %c0_i32_0 : i32, i32
  }
  func.func @transform_25(%arg0: i32) -> (i32, i32) {
    %c0_i32 = arith.constant 0 : i32
    %c0_i32_0 = arith.constant 0 : i32
    return %arg0, %c0_i32 : i32, i32
  }
}

</mosaic_0001>

<bundles_post_ra>
// kernel: tpu_custom_call.1
= control target key start
LH: loop header
LB: loop body
LE: loop exit
PB: predicated region body
PF: predicated region fallthrough
CT: control target
= control target key end

     0   :  { %s6469_s0 = inlined_call_operand.vmem [shape: f32[256,48], index: 0, kind: input, shape index: {}]   ;;  %s6470_s1 = inlined_call_operand.hbm [shape: bf16[48,512], index: 1, kind: input, shape index: {}]   ;;  %s6471_s2 = inlined_call_operand.hbm [shape: f32[1,512], index: 2, kind: input, shape index: {}]   ;;  %s6472_s3 = inlined_call_operand.hbm [shape: f32[1,512], index: 3, kind: input, shape index: {}]   ;;  %s6473_s4 = inlined_call_operand.hbm [shape: f32[1,512], index: 4, kind: input, shape index: {}]   ;;  %s6474_s5 = inlined_call_operand.vmem [shape: bf16[512,256], index: 5, kind: input, shape index: {}]   ;;  %s6475_s6 = inlined_call_operand.hbm [shape: f32[1,256], index: 6, kind: input, shape index: {}]   ;;  %s6476_s7 = inlined_call_operand.hbm [shape: f32[1,256], index: 7, kind: input, shape index: {}]   ;;  %s6477_s8 = inlined_call_operand.hbm [shape: f32[1,256], index: 8, kind: input, shape index: {}]   ;;  %s6478_s9 = inlined_call_operand.hbm [shape: bf16[256,128], index: 9, kind: input, shape index: {}]   ;;  %s6479_s10 = inlined_call_operand.vmem [shape: f32[1,128], index: 10, kind: input, shape index: {}]   ;;  %s6480_s11 = inlined_call_operand.hbm [shape: f32[1,128], index: 11, kind: input, shape index: {}]   ;;  %s6481_s12 = inlined_call_operand.hbm [shape: f32[1,128], index: 12, kind: input, shape index: {}]   ;;  %s6482_s13 = inlined_call_operand.vmem [shape: bf16[128,64], index: 13, kind: input, shape index: {}]   ;;  %s6483_s14 = inlined_call_operand.vmem [shape: f32[1,64], index: 14, kind: input, shape index: {}]   ;;  %s6484_s15 = inlined_call_operand.vmem [shape: f32[1,64], index: 15, kind: input, shape index: {}]   ;;  %s6485_s16 = inlined_call_operand.vmem [shape: f32[1,64], index: 16, kind: input, shape index: {}]   ;;  %s6486_s17 = inlined_call_operand.vmem [shape: bf16[64,32], index: 17, kind: input, shape index: {}]   ;;  %s6487_s18 = inlined_call_operand.hbm [shape: f32[1,32], index: 18, kind: input, shape index: {}]   ;;  %s6488_s19 = inlined_call_operand.hbm [shape: f32[1,32], index: 19, kind: input, shape index: {}]   ;;  %s6489_s20 = inlined_call_operand.vmem [shape: f32[1,32], index: 20, kind: input, shape index: {}]   ;;  %s6490_s21 = inlined_call_operand.vmem [shape: f32[1,32], index: 21, kind: input, shape index: {}]   ;;  %s6491_s22 = inlined_call_operand.vmem [shape: f32[1,32], index: 22, kind: input, shape index: {}]   ;;  %s6492_s23 = inlined_call_operand.vmem [shape: bf16[32,128], index: 23, kind: input, shape index: {}]   ;;  %s6493_s24 = inlined_call_operand.vmem [shape: f32[1,128], index: 24, kind: input, shape index: {}]   ;;  %s6494_s25 = inlined_call_operand.hbm [shape: f32[256,128], index: 25, kind: output, shape index: {}]  }
   0x1   :  { %6524 = sst [smem:[#allocation40_spill]] %s6469_s0 }
   0x2   :  { %6525 = sst [smem:[#allocation41_spill]] %s6470_s1 }
   0x3   :  { %6526 = sst [smem:[#allocation42_spill]] %s6471_s2 }
   0x4   :  { %6527 = sst [smem:[#allocation43_spill]] %s6472_s3 }
   0x5   :  { %6528 = sst [smem:[#allocation44_spill]] %s6473_s4 }
   0x6   :  { %6529 = sst [smem:[#allocation45_spill]] %s6474_s5 }
   0x7   :  { %6530 = sst [smem:[#allocation46_spill]] %s6475_s6 }
   0x8   :  { %6531 = sst [smem:[#allocation47_spill]] %s6476_s7 }
   0x9   :  { %6532 = sst [smem:[#allocation48_spill]] %s6477_s8 }
   0xa   :  { %6533 = sst [smem:[#allocation49_spill]] %s6478_s9 }
   0xb   :  { %6534 = sst [smem:[#allocation50_spill]] %s6481_s12 }
   0xc   :  { %6535 = sst [smem:[#allocation51_spill]] %s6489_s20 }
   0xd   :  { %6536 = sst [smem:[#allocation52_spill]] %s6490_s21 }
   0xe   :  { %6537 = sst [smem:[#allocation53_spill]] %s6491_s22 }
   0xf   :  { %6538 = sst [smem:[#allocation54_spill]] %s6493_s24 }
  0x10   :  { %6539 = sst [smem:[#allocation55_spill]] %s6494_s25 }
  0x11   :  { %30 = vsyncpa [#allocation3], 0 }
  0x12   :  { %31 = vsyncpa [#allocation6], 0 }
  0x13   :  { %32 = vsyncpa [#allocation9], 0 }
  0x14   :  { %33 = vsyncpa [#allocation12], 0 }
  0x15   :  { %34 = vsyncpa [#allocation15], 0 }
  0x16   :  { %35 = vsyncpa [#allocation18], 0 }
  0x17   :  { %36 = vsyncpa [#allocation21], 0 }
  0x18   :  { %37 = vsyncpa [#allocation4], 0 }
  0x19   :  { %39 = vsyncpa [#allocation4 + $0x1], 0  ;;  %s4970_s29 = smov 0   ;;  %s4972_s2 = smov 0  }
  0x1a   :  { %s4974_s6 = smov 0   ;;  %s4976_s30 = smov 0  }
  0x1b LB: > { %6540 = sst [smem:[#allocation31_spill]] %s4806_s29  ;;  %s4991_s7 = sadd.s32 4294967295, %s4818_s30   ;;  %s4818_s30 = sphi %s4976_s30, %s6599_s30   ;;  %s4814_s6 = sphi %s4974_s6, %s6602_s6   ;;  %s4810_s2 = sphi %s4972_s2, %s6601_s2   ;;  %s4806_s29 = sphi %s4970_s29, %s6600_s29  }
  0x1c   : > { %6541 = sst [smem:[#allocation32_spill]] %s4810_s2  ;;  %s3648_s3 = sadd.s32 4294967294, %s4818_s30  }
  0x1d   : > { %6542 = sst [smem:[#allocation33_spill]] %s4814_s6  ;;  %s4995_s26 = sadd.s32 1, %s4818_s30  }
  0x1e   : > { %6543 = sst [smem:[#allocation34_spill]] %s4818_s30  ;;  %s582_s1 = sadd.s32 1, %s4814_s6 }
  0x1f   : > { %6544 = sst [smem:[#allocation35_spill]] %s4995_s26  ;;  %s579_s8 = ssub.s32 %s4818_s30, %s4995_s26 }
  0x20   : > { %p592_p0 = scmp.ne.s32.totalorder %s4814_s6, %s4810_s2  ;;  %p580_p1 = scmp.eq.s32.totalorder %s579_s8, 0 }
  0x21   : > { %p593_p2 = scmp.eq.s32.totalorder %s4991_s7, 1  ;;  %p598_p3 = scmp.ne.s32.totalorder %s4810_s2, %s4806_s29 }
  0x22   : > { %p599_p4 = scmp.eq.s32.totalorder %s3648_s3, 1  ;;  %p3649_p7 = scmp.ge.s32.totalorder %s4818_s30, 1 }
  0x23   : > { %s5006_s27 = scalar_select %p580_p1, %s4814_s6, %s582_s1  }
  0x24   : > { %p5008_p5 = por %p593_p2, %p592_p0  ;;  %p5012_p6 = por %p599_p4, %p598_p3 }
  0x25   : > { %6545 = sst [smem:[#allocation36_spill]] %s5006_s27  ;;  %p606_p8 = scmp.lt.s32.totalorder %s4818_s30, 3 }
  0x26   : > { %s6546_s4 = scalar_select %p5008_p5, 1, 0 }
  0x27   : > { %s6548_s28 = scalar_select %p5012_p6, 1, 0 }
  0x28   : > { %6547 = sst [smem:[#allocation37_spill]] %s6546_s4  ;;  %p6513_p9 = scmp.eq.s32.totalorder %s4991_s7, 0 }
  0x29   : > { %6549 = sst [smem:[#allocation38_spill]] %s6548_s28  ;;  %p5019_p10 = pnand %p3649_p7, %p606_p8 }
  0x2a   : > { %s4820_s5 = smov [#allocation5]   ;;  %s4821_s3 = smov [#allocation8]  }
  0x2b   : > { %s6550_s9 = scalar_select %p5019_p10, 1, 0 }
  0x2c   : > { %s632_s0 = sshll.u32 %s4820_s5, 4  ;;  %p4131_p11 = pneg %p5019_p10  ;;  %s633_s0 = int_to_ptr.vmem [resolvable:$true] %s632_s0 }
  0x2d   : > { %s654_s1 = sshll.u32 %s4821_s3, 4  ;;  %s4822_s27 = smov [#allocation11]   ;;  %s5031_s1 = int_to_ptr.vmem [resolvable:$true] %s654_s1 }
  0x2e   : > { %p5027_p12 = pnand %p6513_p9, %p4131_p11  ;;  %s679_s6 = sshll.u32 %s4822_s27, 4  ;;  %s5033_s6 = int_to_ptr.vmem [resolvable:$true] %s679_s6 }
  0x2f   : > { %s6552_s5 = sld [smem:[#allocation42_spill]] }
  0x30   : > { %p5043_p0 = pneg %p5027_p12 }
  0x35   : > { %s4392_s29 = scalar_lea.hbm %s6552_s5, 64 }
  0x36   : > { %p4393_p13 = scmp.ne.s32.totalorder %s6552_s5, %s4392_s29  ;;  %p4399_p3 = scmp.lt.u32.totalorder %s4392_s29, %s6552_s5 }
  0x38   : > { %p4395_p1 = pnand %p5043_p0, %p4393_p13 }
  0x3a   : > { %p4396_p2 = pneg %p4395_p1 }
  0x3c   : > { %p4401_p4 = pnand %p4399_p3, %p4396_p2 }
  0x3e   : > { %4404 = shalt.err (!%p4401_p4)
}
  0x3f   : > { %s4405_s26 = scalar_lea.vmem %s633_s0, 64  ;;  %p4413_p9 = scmp.lt.s32.totalorder %s633_s0, %s633_s0 }
  0x40   : > { %p4406_p7 = scmp.ne.s32.totalorder %s633_s0, %s4405_s26  ;;  %p4414_p6 = scmp.lt.s32.totalorder %s4405_s26, %s4405_s26 }
  0x42   : > { %p4408_p8 = pnand %p4406_p7, %p5043_p0  ;;  %p4415_p5 = por %p4414_p6, %p4413_p9 }
  0x44   : > { %p4409_p11 = pneg %p4408_p8 }
  0x46   : > { %p4416_p10 = pnand %p4415_p5, %p4409_p11 }
  0x48   : > { %4419 = shalt.err (!%p4416_p10)
}
  0x49   : > { %4137 = dma.hbm_to_vmem [thread:$0]  (!%p5027_p12), %s6552_s5, 64, %s633_s0, [#allocation6]  }
  0x4a   : > { %s6554_s28 = sld [smem:[#allocation44_spill]] }
  0x50   : > { %s4420_s27 = scalar_lea.hbm %s6554_s28, 64 }
  0x51   : > { %p4421_p13 = scmp.ne.s32.totalorder %s6554_s28, %s4420_s27  ;;  %p4427_p5 = scmp.lt.u32.totalorder %s4420_s27, %s6554_s28 }
  0x53   : > { %p4423_p1 = pnand %p4421_p13, %p5043_p0 }
  0x55   : > { %p4424_p6 = pneg %p4423_p1 }
  0x57   : > { %p4429_p9 = pnand %p4427_p5, %p4424_p6 }
  0x59   : > { %4432 = shalt.err (!%p4429_p9)
}
  0x5a   : > { %s4433_s0 = scalar_lea.vmem %s5031_s1, 64  ;;  %p4441_p4 = scmp.lt.s32.totalorder %s5031_s1, %s5031_s1 }
  0x5b   : > { %p4434_p10 = scmp.ne.s32.totalorder %s5031_s1, %s4433_s0  ;;  %p4442_p7 = scmp.lt.s32.totalorder %s4433_s0, %s4433_s0 }
  0x5d   : > { %p4436_p2 = pnand %p4434_p10, %p5043_p0  ;;  %p4443_p8 = por %p4442_p7, %p4441_p4 }
  0x5f   : > { %p4437_p3 = pneg %p4436_p2 }
  0x61   : > { %p4444_p11 = pnand %p4443_p8, %p4437_p3 }
  0x63   : > { %4447 = shalt.err (!%p4444_p11)
}
  0x64   : > { %4143 = dma.hbm_to_vmem [thread:$0]  (!%p5027_p12), %s6554_s28, 64, %s5031_s1, [#allocation9]  }
  0x65   : > { %s6555_s30 = sld [smem:[#allocation47_spill]] }
  0x6b   : > { %s6556_s4 = smov %s6555_s30  ;;  %s4448_s29 = scalar_lea.hbm %s6555_s30, 32 }
  0x6c   : > { %p4449_p13 = scmp.ne.s32.totalorder %s6556_s4, %s4448_s29  ;;  %p4455_p5 = scmp.lt.u32.totalorder %s4448_s29, %s6556_s4 }
  0x6e   : > { %p4451_p1 = pnand %p4449_p13, %p5043_p0 }
  0x70   : > { %p4452_p6 = pneg %p4451_p1 }
  0x72   : > { %p4457_p9 = pnand %p4455_p5, %p4452_p6 }
  0x74   : > { %4460 = shalt.err (!%p4457_p9)
}
  0x75   : > { %s4461_s1 = scalar_lea.vmem %s5033_s6, 32  ;;  %p4469_p4 = scmp.lt.s32.totalorder %s5033_s6, %s5033_s6 }
  0x76   : > { %p4462_p10 = scmp.ne.s32.totalorder %s5033_s6, %s4461_s1  ;;  %p4470_p7 = scmp.lt.s32.totalorder %s4461_s1, %s4461_s1 }
  0x78   : > { %p4464_p2 = pnand %p4462_p10, %p5043_p0  ;;  %p4471_p8 = por %p4470_p7, %p4469_p4 }
  0x7a   : > { %p4465_p3 = pneg %p4464_p2 }
  0x7c   : > { %p4472_p11 = pnand %p4471_p8, %p4465_p3 }
  0x7e   : > { %4475 = shalt.err (!%p4472_p11)
}
  0x7f   : > { %4149 = dma.hbm_to_vmem [thread:$0]  (!%p5027_p12), %s6556_s4, 32, %s5033_s6, [#allocation12]  }
  0x80   : > { %s4823_s24 = smov [#allocation14]   ;;  %s6557_s29 = sld [smem:[#allocation49_spill]] }
  0x81   : > { %s700_s2 = sshll.u32 %s4823_s24, 4  ;;  %s701_s2 = int_to_ptr.vmem [resolvable:$true] %s700_s2 }
  0x86   : > { %s6558_s27 = smov %s6557_s29  ;;  %s4476_s26 = scalar_lea.hbm %s6557_s29, 2048 }
  0x87   : > { %p4477_p13 = scmp.ne.s32.totalorder %s6558_s27, %s4476_s26  ;;  %p4483_p5 = scmp.lt.u32.totalorder %s4476_s26, %s6558_s27 }
  0x89   : > { %p4479_p1 = pnand %p4477_p13, %p5043_p0 }
  0x8b   : > { %p4480_p6 = pneg %p4479_p1 }
  0x8d   : > { %p4485_p9 = pnand %p4483_p5, %p4480_p6 }
  0x8f   : > { %4488 = shalt.err (!%p4485_p9)
}
  0x90   : > { %s4489_s6 = scalar_lea.vmem %s701_s2, 2048  ;;  %p4497_p4 = scmp.lt.s32.totalorder %s701_s2, %s701_s2 }
  0x91   : > { %p4490_p10 = scmp.ne.s32.totalorder %s701_s2, %s4489_s6  ;;  %p4498_p7 = scmp.lt.s32.totalorder %s4489_s6, %s4489_s6 }
  0x93   : > { %p4492_p2 = pnand %p4490_p10, %p5043_p0  ;;  %p4499_p8 = por %p4498_p7, %p4497_p4 }
  0x95   : > { %p4493_p3 = pneg %p4492_p2 }
  0x97   : > { %p4500_p11 = pnand %p4499_p8, %p4493_p3 }
  0x99   : > { %4503 = shalt.err (!%p4500_p11)
}
  0x9a   : > { %s4824_s5 = smov 64   ;;  %s4825_s22 = smov 4  }
  0x9b   : > { %4155 = dma.hbm_to_vmem [thread:$0]  (!%p5027_p12), %s6558_s27, 2048, %s701_s2, [#allocation15], %s4824_s5, %s4824_s5, %s4825_s22  }
  0x9c   : > { %s4826_s24 = smov [#allocation17]   ;;  %s4827_s30 = smov [#allocation2]  }
  0x9d   : > { %s728_s25 = sshll.u32 %s4826_s24, 4  ;;  %s618_s29 = sshll.u32 %s4827_s30, 4  ;;  %s729_s25 = int_to_ptr.vmem [resolvable:$true] %s728_s25  ;;  %s5123_s29 = int_to_ptr.vmem [resolvable:$true] %s618_s29 }
  0x9e   : > { %s6559_s12 = sld [smem:[#allocation50_spill]] }
  0xa4   : > { %s4504_s1 = scalar_lea.hbm %s6559_s12, 16 }
  0xa5   : > { %p4505_p13 = scmp.ne.s32.totalorder %s6559_s12, %s4504_s1  ;;  %p4511_p5 = scmp.lt.u32.totalorder %s4504_s1, %s6559_s12 }
  0xa7   : > { %p4507_p1 = pnand %p4505_p13, %p5043_p0 }
  0xa9   : > { %p4508_p6 = pneg %p4507_p1 }
  0xab   : > { %p4513_p9 = pnand %p4511_p5, %p4508_p6 }
  0xad   : > { %4516 = shalt.err (!%p4513_p9)
}
  0xae   : > { %s4517_s5 = scalar_lea.vmem %s729_s25, 16  ;;  %s4524_s22 = scalar_lea.vmem %s729_s25, 32 }
  0xaf   : > { %p4518_p10 = scmp.ne.s32.totalorder %s729_s25, %s4517_s5  ;;  %p4525_p4 = scmp.lt.s32.totalorder %s729_s25, %s729_s25 }
  0xb0   : > { %p4526_p7 = scmp.lt.s32.totalorder %s4524_s22, %s4517_s5 }
  0xb1   : > { %p4520_p2 = pnand %p4518_p10, %p5043_p0 }
  0xb2   : > { %p4527_p8 = por %p4526_p7, %p4525_p4 }
  0xb3   : > { %p4521_p3 = pneg %p4520_p2 }
  0xb5   : > { %p4528_p11 = pnand %p4527_p8, %p4521_p3 }
  0xb7   : > { %4531 = shalt.err (!%p4528_p11)
}
  0xb8   : > { %4161 = dma.hbm_to_vmem [thread:$0]  (!%p5027_p12), %s6559_s12, 16, %s729_s25, [#allocation18]  }
  0xb9   : > { %s6560_s26 = sld [smem:[#allocation41_spill]] }
  0xbf   : > { %s4532_s0 = scalar_lea.hbm %s6560_s26, 1536 }
  0xc0   : > { %p4533_p13 = scmp.ne.s32.totalorder %s6560_s26, %s4532_s0  ;;  %p4539_p5 = scmp.lt.u32.totalorder %s4532_s0, %s6560_s26 }
  0xc2   : > { %p4535_p1 = pnand %p4533_p13, %p5043_p0 }
  0xc4   : > { %p4536_p6 = pneg %p4535_p1 }
  0xc6   : > { %p4541_p9 = pnand %p4539_p5, %p4536_p6 }
  0xc8   : > { %4544 = shalt.err (!%p4541_p9)
}
  0xc9   : > { %s4545_s25 = scalar_lea.vmem %s5123_s29, 1536  ;;  %p4553_p4 = scmp.lt.s32.totalorder %s5123_s29, %s5123_s29 }
  0xca   : > { %p4546_p10 = scmp.ne.s32.totalorder %s5123_s29, %s4545_s25  ;;  %p4554_p7 = scmp.lt.s32.totalorder %s4545_s25, %s4545_s25 }
  0xcc   : > { %p4548_p2 = pnand %p4546_p10, %p5043_p0  ;;  %p4555_p8 = por %p4554_p7, %p4553_p4 }
  0xce   : > { %p4549_p3 = pneg %p4548_p2 }
  0xd0   : > { %p4556_p11 = pnand %p4555_p8, %p4549_p3 }
  0xd2   : > { %4559 = shalt.err (!%p4556_p11)
}
  0xd3   : > { %s4828_s5 = smov 256   ;;  %s4829_s22 = smov 16  }
  0xd4   : > { %4134 = dma.hbm_to_vmem [thread:$0]  (!%p5027_p12), %s6560_s26, 1536, %s5123_s29, [#allocation3], %s4828_s5, %s4828_s5, %s4829_s22  }
  0xd5   : > { %s4830_s24 = smov [#allocation7]   ;;  %s4831_s0 = smov [#allocation10]  }
  0xd6   : > { %s643_s30 = sshll.u32 %s4830_s24, 4  ;;  %s668_s1 = sshll.u32 %s4831_s0, 4  ;;  %s644_s30 = int_to_ptr.vmem [resolvable:$true] %s643_s30  ;;  %s5166_s1 = int_to_ptr.vmem [resolvable:$true] %s668_s1 }
  0xd7   : > { %s6561_s2 = sld [smem:[#allocation43_spill]] }
  0xdd   : > { %s6562_s25 = smov %s6561_s2  ;;  %s4560_s12 = scalar_lea.hbm %s6561_s2, 64 }
  0xde   : > { %p4561_p13 = scmp.ne.s32.totalorder %s6562_s25, %s4560_s12  ;;  %p4567_p5 = scmp.lt.u32.totalorder %s4560_s12, %s6562_s25 }
  0xe0   : > { %p4563_p1 = pnand %p4561_p13, %p5043_p0 }
  0xe2   : > { %p4564_p6 = pneg %p4563_p1 }
  0xe4   : > { %p4569_p9 = pnand %p4567_p5, %p4564_p6 }
  0xe6   : > { %4572 = shalt.err (!%p4569_p9)
}
  0xe7   : > { %s4573_s5 = scalar_lea.vmem %s644_s30, 64  ;;  %p4581_p4 = scmp.lt.s32.totalorder %s644_s30, %s644_s30 }
  0xe8   : > { %p4574_p10 = scmp.ne.s32.totalorder %s644_s30, %s4573_s5  ;;  %p4582_p7 = scmp.lt.s32.totalorder %s4573_s5, %s4573_s5 }
  0xea   : > { %p4576_p2 = pnand %p4574_p10, %p5043_p0  ;;  %p4583_p8 = por %p4582_p7, %p4581_p4 }
  0xec   : > { %p4577_p3 = pneg %p4576_p2 }
  0xee   : > { %p4584_p11 = pnand %p4583_p8, %p4577_p3 }
  0xf0   : > { %4587 = shalt.err (!%p4584_p11)
}
  0xf1   : > { %4140 = dma.hbm_to_vmem [thread:$0]  (!%p5027_p12), %s6562_s25, 64, %s644_s30, [#allocation6]  }
  0xf2   : > { %s6563_s28 = sld [smem:[#allocation46_spill]] }
  0xf8   : > { %s4588_s24 = scalar_lea.hbm %s6563_s28, 32 }
  0xf9   : > { %p4589_p13 = scmp.ne.s32.totalorder %s6563_s28, %s4588_s24  ;;  %p4595_p5 = scmp.lt.u32.totalorder %s4588_s24, %s6563_s28 }
  0xfb   : > { %p4591_p1 = pnand %p4589_p13, %p5043_p0 }
  0xfd   : > { %p4592_p6 = pneg %p4591_p1 }
  0xff   : > { %p4597_p9 = pnand %p4595_p5, %p4592_p6 }
 0x101   : > { %4600 = shalt.err (!%p4597_p9)
}
 0x102   : > { %s4601_s30 = scalar_lea.vmem %s5166_s1, 32  ;;  %p4609_p4 = scmp.lt.s32.totalorder %s5166_s1, %s5166_s1 }
 0x103   : > { %p4602_p10 = scmp.ne.s32.totalorder %s5166_s1, %s4601_s30  ;;  %p4610_p7 = scmp.lt.s32.totalorder %s4601_s30, %s4601_s30 }
 0x105   : > { %p4604_p2 = pnand %p4602_p10, %p5043_p0  ;;  %p4611_p8 = por %p4610_p7, %p4609_p4 }
 0x107   : > { %p4605_p3 = pneg %p4604_p2 }
 0x109   : > { %p4612_p11 = pnand %p4611_p8, %p4605_p3 }
 0x10b   : > { %4615 = shalt.err (!%p4612_p11)
}
 0x10c   : > { %4146 = dma.hbm_to_vmem [thread:$0]  (!%p5027_p12), %s6563_s28, 32, %s5166_s1, [#allocation9]  }
 0x10d   : > { %s4832_s5 = smov [#allocation13]   ;;  %s4833_s27 = smov [#allocation16]  }
 0x10e   : > { %s690_s20 = sshll.u32 %s4832_s5, 4  ;;  %s717_s12 = sshll.u32 %s4833_s27, 4  ;;  %s691_s20 = int_to_ptr.vmem [resolvable:$true] %s690_s20  ;;  %s5209_s12 = int_to_ptr.vmem [resolvable:$true] %s717_s12 }
 0x10f   : > { %s6564_s0 = sld [smem:[#allocation48_spill]] }
 0x115   : > { %s4616_s6 = scalar_lea.hbm %s6564_s0, 32 }
 0x116   : > { %p4617_p13 = scmp.ne.s32.totalorder %s6564_s0, %s4616_s6  ;;  %p4623_p5 = scmp.lt.u32.totalorder %s4616_s6, %s6564_s0 }
 0x118   : > { %p4619_p1 = pnand %p4617_p13, %p5043_p0 }
 0x11a   : > { %p4620_p6 = pneg %p4619_p1 }
 0x11c   : > { %p4625_p9 = pnand %p4623_p5, %p4620_p6 }
 0x11e   : > { %4628 = shalt.err (!%p4625_p9)
}
 0x11f   : > { %s4629_s4 = scalar_lea.vmem %s691_s20, 32  ;;  %p4637_p4 = scmp.lt.s32.totalorder %s691_s20, %s691_s20 }
 0x120   : > { %p4630_p10 = scmp.ne.s32.totalorder %s691_s20, %s4629_s4  ;;  %p4638_p7 = scmp.lt.s32.totalorder %s4629_s4, %s4629_s4 }
 0x122   : > { %p4632_p2 = pnand %p4630_p10, %p5043_p0  ;;  %p4639_p8 = por %p4638_p7, %p4637_p4 }
 0x124   : > { %p4633_p3 = pneg %p4632_p2 }
 0x126   : > { %p4640_p11 = pnand %p4639_p8, %p4633_p3 }
 0x128   : > { %4643 = shalt.err (!%p4640_p11)
}
 0x129   : > { %4152 = dma.hbm_to_vmem [thread:$0]  (!%p5027_p12), %s6564_s0, 32, %s691_s20, [#allocation12]  }
 0x12a   : > { %s4644_s24 = scalar_lea.hbm %s6480_s11, 16 }
 0x12b   : > { %p4645_p13 = scmp.ne.s32.totalorder %s6480_s11, %s4644_s24  ;;  %p4651_p5 = scmp.lt.u32.totalorder %s4644_s24, %s6480_s11 }
 0x12d   : > { %p4647_p1 = pnand %p4645_p13, %p5043_p0 }
 0x12f   : > { %p4648_p6 = pneg %p4647_p1 }
 0x131   : > { %p4653_p9 = pnand %p4651_p5, %p4648_p6 }
 0x133   : > { %4656 = shalt.err (!%p4653_p9)
}
 0x134   : > { %s4657_s20 = scalar_lea.vmem %s5209_s12, 16  ;;  %s4664_s1 = scalar_lea.vmem %s5209_s12, 32 }
 0x135   : > { %p4658_p10 = scmp.ne.s32.totalorder %s5209_s12, %s4657_s20  ;;  %p4665_p4 = scmp.lt.s32.totalorder %s5209_s12, %s5209_s12 }
 0x136   : > { %p4666_p7 = scmp.lt.s32.totalorder %s4664_s1, %s4657_s20 }
 0x137   : > { %p4660_p2 = pnand %p4658_p10, %p5043_p0 }
 0x138   : > { %p4667_p8 = por %p4666_p7, %p4665_p4 }
 0x139   : > { %p4661_p3 = pneg %p4660_p2 }
 0x13b   : > { %p4668_p11 = pnand %p4667_p8, %p4661_p3 }
 0x13d   : > { %4671 = shalt.err (!%p4668_p11)
}
 0x13e   : > { %4158 = dma.hbm_to_vmem [thread:$0]  (!%p5027_p12), %s6480_s11, 16, %s5209_s12, [#allocation15]  }
 0x13f   : > { %s4834_s5 = smov [#allocation19]   ;;  %s4835_s22 = smov [#allocation20]  }
 0x140   : > { %s754_s27 = sshll.u32 %s4834_s5, 4  ;;  %s765_s24 = sshll.u32 %s4835_s22, 4  ;;  %s755_s27 = int_to_ptr.vmem [resolvable:$true] %s754_s27  ;;  %s5253_s24 = int_to_ptr.vmem [resolvable:$true] %s765_s24 }
 0x141   : > { %s4672_s2 = scalar_lea.hbm %s6487_s18, 16 }
 0x142   : > { %p4673_p13 = scmp.ne.s32.totalorder %s6487_s18, %s4672_s2  ;;  %p4679_p5 = scmp.lt.u32.totalorder %s4672_s2, %s6487_s18 }
 0x144   : > { %p4675_p1 = pnand %p4673_p13, %p5043_p0 }
 0x146   : > { %p4676_p6 = pneg %p4675_p1 }
 0x148   : > { %p4681_p9 = pnand %p4679_p5, %p4676_p6 }
 0x14a   : > { %4684 = shalt.err (!%p4681_p9)
}
 0x14b   : > { %s4685_s4 = scalar_lea.vmem %s755_s27, 16  ;;  %s4692_s29 = scalar_lea.vmem %s755_s27, 32 }
 0x14c   : > { %p4686_p10 = scmp.ne.s32.totalorder %s755_s27, %s4685_s4  ;;  %p4693_p4 = scmp.lt.s32.totalorder %s755_s27, %s755_s27 }
 0x14d   : > { %p4694_p7 = scmp.lt.s32.totalorder %s4692_s29, %s4685_s4 }
 0x14e   : > { %p4688_p2 = pnand %p4686_p10, %p5043_p0 }
 0x14f   : > { %p4695_p8 = por %p4694_p7, %p4693_p4 }
 0x150   : > { %p4689_p3 = pneg %p4688_p2 }
 0x152   : > { %p4696_p11 = pnand %p4695_p8, %p4689_p3 }
 0x154   : > { %4699 = shalt.err (!%p4696_p11)
}
 0x155   : > { %4164 = dma.hbm_to_vmem [thread:$0]  (!%p5027_p12), %s6487_s18, 16, %s755_s27, [#allocation18]  }
 0x156   : > { %s4700_s2 = scalar_lea.hbm %s6488_s19, 16 }
 0x157   : > { %p4701_p13 = scmp.ne.s32.totalorder %s6488_s19, %s4700_s2  ;;  %p4707_p5 = scmp.lt.u32.totalorder %s4700_s2, %s6488_s19 }
 0x159   : > { %p4703_p1 = pnand %p4701_p13, %p5043_p0 }
 0x15b   : > { %p4704_p6 = pneg %p4703_p1 }
 0x15d   : > { %p4709_p9 = pnand %p4707_p5, %p4704_p6 }
 0x15f   : > { %4712 = shalt.err (!%p4709_p9)
}
 0x160   : > { %s4713_s27 = scalar_lea.vmem %s5253_s24, 16  ;;  %s4720_s4 = scalar_lea.vmem %s5253_s24, 32 }
 0x161   : > { %p4714_p10 = scmp.ne.s32.totalorder %s5253_s24, %s4713_s27  ;;  %p4721_p4 = scmp.lt.s32.totalorder %s5253_s24, %s5253_s24 }
 0x162   : > { %p4722_p7 = scmp.lt.s32.totalorder %s4720_s4, %s4713_s27 }
 0x163   : > { %p4716_p2 = pnand %p4714_p10, %p5043_p0 }
 0x164   : > { %p4723_p8 = por %p4722_p7, %p4721_p4 }
 0x165   : > { %p4717_p3 = pneg %p4716_p2 }
 0x167   : > { %p4724_p11 = pnand %p4723_p8, %p4717_p3 }
 0x169   : > { %4727 = shalt.err (!%p4724_p11)
}
 0x16a   : > { %4167 = dma.hbm_to_vmem [thread:$0]  (!%p5027_p12), %s6488_s19, 16, %s5253_s24, [#allocation21]  }
 0x16b   : > { %p6565_p13 = scmp.ne.s32.totalorder %s6550_s9, 0 }
 0x16d   : > { %802 = sbr.rel (%p6565_p13) target bundleno = 1908 (0x774), region = 120 }
 0x174   : > { %p6566_p0 = scmp.eq.s32.totalorder %s4991_s7, 0 }
 0x176   : > { %4773 = dma.done.wait (%p6566_p0), [#allocation3], 1536   ;;  %p6567_p1 = pmov %p6566_p0 }
 0x177   : > { %p6568_p6 = pmov %p6566_p0 }
 0x178   : > { %4775 = vsyncadd (%p6567_p1), [#allocation3], 4294965760 }
 0x179   : > { %4777 = dma.done.wait (%p6568_p6), [#allocation6], 128   ;;  %p6569_p5 = pmov %p6566_p0 }
 0x17a   : > { %p6570_p9 = pmov %p6566_p0 }
 0x17b   : > { %4779 = vsyncadd (%p6569_p5), [#allocation6], 4294967168 }
 0x17c   : > { %4781 = dma.done.wait (%p6570_p9), [#allocation9], 96   ;;  %p6571_p12 = pmov %p6566_p0 }
 0x17d   : > { %p6572_p10 = pmov %p6566_p0 }
 0x17e   : > { %4783 = vsyncadd (%p6571_p12), [#allocation9], 4294967200 }
 0x17f   : > { %4785 = dma.done.wait (%p6572_p10), [#allocation12], 64   ;;  %p6573_p2 = pmov %p6566_p0 }
 0x180   : > { %p6574_p3 = pmov %p6566_p0 }
 0x181   : > { %4787 = vsyncadd (%p6573_p2), [#allocation12], 4294967232 }
 0x182   : > { %4789 = dma.done.wait (%p6574_p3), [#allocation15], 2064   ;;  %p6575_p4 = pmov %p6566_p0 }
 0x183   : > { %p6576_p7 = pmov %p6566_p0 }
 0x184   : > { %4791 = vsyncadd (%p6575_p4), [#allocation15], 4294965232 }
 0x185   : > { %4793 = dma.done.wait (%p6576_p7), [#allocation18], 32   ;;  %p6577_p8 = pmov %p6566_p0 }
 0x186   : > { %p6578_p11 = pmov %p6566_p0 }
 0x187   : > { %4795 = vsyncadd (%p6577_p8), [#allocation18], 4294967264 }
 0x188   : > { %4797 = dma.done.wait (%p6578_p11), [#allocation21], 16   ;;  %p6579_p13 = pmov %p6566_p0 }
 0x189   : > { %s3677_s9 = sshll.u32 %s4991_s7, 4  ;;  %v4836_v0 = vmov 0   ;;  %v4248_v1 = vld [vmem:[#allocation2 + $0x4] ss:$16 sps:$4 sm:$0xff]   ;;  %v4250_v2 = vld [vmem:[#allocation2] ss:$16 sps:$4 sm:$0xff]  }
 0x18a   : > { %4799 = vsyncadd (%p6579_p13), [#allocation21], 4294967280  ;;  %1099 = vmatprep.mubr.bf16.mxu0 %v4836_v0  ;;  %p915_p0 = scmp.lt.s32.totalorder %s3677_s9, 31  ;;  %1212 = vmatprep.mubr.bf16.mxu1 %v4836_v0  ;;  %v4251_v3 = vld [vmem:[#allocation2 + $0x24] ss:$16 sps:$4 sm:$0xff]   ;;  %s6580_s22 = sld [smem:[#allocation40_spill]] }
 0x18b   : > { %1067 = vmatprep.subr.bf16.mxu0 %v4248_v1  ;;  %v4253_v4 = vld [vmem:[#allocation2 + $0x20] ss:$16 sps:$4 sm:$0xff]   ;;  %v4254_v5 = vld [vmem:[#allocation2 + $0x44] ss:$16 sps:$4 sm:$0xff]   ;;  %v4257_v9 = vld [vmem:[#allocation2 + $0xc] ss:$16 sps:$4 sm:$0xff]  }
 0x18c   : > { %s6604_s9 = smov (!%p915_p0, %s3677_s9), 31  ;;  %1068 = vmatpush1.bf16.msra.mxu0 %v4250_v2  ;;  %v4256_v6 = vld [vmem:[#allocation2 + $0x40] ss:$16 sps:$4 sm:$0xff]   ;;  %v4259_v10 = vld [vmem:[#allocation2 + $0x8] ss:$16 sps:$4 sm:$0xff]   ;;  %1180 = vmatprep.subr.bf16.mxu1 %v4257_v9  ;;  %vm1042_vm0 = vcmask 392192  }
 0x18d   : > { %s3678_s8 = sshll.u32 %s6604_s9, 3  ;;  %1069 = vmatprep.subr.bf16.mxu0 %v4251_v3  ;;  %v4260_v12 = vld [vmem:[#allocation2 + $0x2c] ss:$16 sps:$4 sm:$0xff]   ;;  %1181 = vmatpush1.bf16.msra.mxu1 %v4259_v10  ;;  %v4262_v13 = vld [vmem:[#allocation2 + $0x28] ss:$16 sps:$4 sm:$0xff]   ;;  %s6581_s30 = sld [smem:[#allocation45_spill]] }
 0x18e   : > { %1182 = vmatprep.subr.bf16.mxu1 %v4260_v12  ;;  %v4263_v14 = vld [vmem:[#allocation2 + $0x4c] ss:$16 sps:$4 sm:$0xff]   ;;  %v4265_v19 = vld [vmem:[#allocation2 + $0x48] ss:$16 sps:$4 sm:$0xff]   ;;  %v950_v9 = vld [vmem:[#allocation5] sm:$0xf] }
 0x18f   : > { %vm3026_vm1 = vcmask 523264   ;;  %s6587_s27 = sld [smem:[#allocation51_spill]]  ;;  %s6588_s5 = sld [smem:[#allocation52_spill]]  ;;  %vm3317_vm2 = vcmask 261120  }
 0x190   : > { %s5333_s6 = scalar_lea.vmem %s6580_s22, %s3678_s8  ;;  %1070 = vmatpush1.bf16.msra.mxu0 %v4253_v4  ;;  %s6590_s3 = sld [smem:[#allocation32_spill]] }
 0x191   : > { %v922_v7 = vld [vmem:[%s5333_s6] sm:$0xff]  ;;  %v923_v8 = vld [vmem:[%s5333_s6 + $0x8] sm:$0xff]  ;;  %1071 = vmatprep.subr.bf16.mxu0 %v4254_v5  ;;  %v924_v15 = vld [vmem:[%s5333_s6 + $0x10] sm:$0xff]  ;;  %1183 = vmatpush1.bf16.msra.mxu1 %v4262_v13  ;;  %s3834_s12 = sshll.u32 %s4991_s7, 11  ;;  %s6592_s4 = sld [smem:[#allocation37_spill]] }
 0x192   : > { %v953_v11 = vpack.c.bf16 %v923_v8, %v922_v7  ;;  %v925_v16 = vld [vmem:[%s5333_s6 + $0x18] sm:$0xff]  ;;  %1184 = vmatprep.subr.bf16.mxu1 %v4263_v14  ;;  %v926_v26 = vld [vmem:[%s5333_s6 + $0x20] sm:$0xff]  ;;  %v927_v27 = vld [vmem:[%s5333_s6 + $0x28] sm:$0xff]  ;;  %s6593_s9 = sld [smem:[#allocation55_spill]] }
 0x193   : > { %s6582_s20 = smov %s6581_s30  ;;  %v4266_v17 = vld [vmem:[%s6581_s30] ss:$8 sps:$4 sm:$0xff]   ;;  %v954_v22 = vpack.c.bf16 %v925_v16, %v924_v15  ;;  %v955_v29 = vpack.c.bf16 %v927_v27, %v926_v26  ;;  %v928_v31 = vld [vmem:[%s5333_s6 + $0x30] sm:$0xff]  ;;  %v929_v32 = vld [vmem:[%s5333_s6 + $0x38] sm:$0xff]  ;;  %s6591_s30 = sld [smem:[#allocation54_spill]] }
 0x194   : > { %1072 = vmatpush1.bf16.msra.mxu0 %v4256_v6  ;;  %v4268_v18 = vld [vmem:[%s6582_s20 + $0x4] ss:$8 sps:$4 sm:$0xff]   ;;  %v4271_v20 = vld [vmem:[%s6582_s20 + $0x14] ss:$8 sps:$4 sm:$0xff]   ;;  %v4269_v21 = vld [vmem:[%s6582_s20 + $0x10] ss:$8 sps:$4 sm:$0xff]   ;;  %v956_v36 = vpack.c.bf16 %v929_v32, %v928_v31  ;;  %v962_v6 = vlaneseq }
 0x195   : > { %2021 = vmatprep.subr.bf16.mxu0 %v4268_v18  ;;  %1185 = vmatpush1.bf16.msra.mxu1 %v4265_v19  ;;  %v4274_v23 = vld [vmem:[%s6582_s20 + $0x24] ss:$8 sps:$4 sm:$0xff]   ;;  %v4272_v24 = vld [vmem:[%s6582_s20 + $0x20] ss:$8 sps:$4 sm:$0xff]   ;;  %v4277_v25 = vld [vmem:[%s6582_s20 + $0x34] ss:$8 sps:$4 sm:$0xff]  }
 0x196   : > { %v4275_v28 = vld [vmem:[%s6582_s20 + $0x30] ss:$8 sps:$4 sm:$0xff]   ;;  %v4280_v30 = vld [vmem:[%s6582_s20 + $0x44] ss:$8 sps:$4 sm:$0xff]   ;;  %v4278_v33 = vld [vmem:[%s6582_s20 + $0x40] ss:$8 sps:$4 sm:$0xff]  }
 0x197   : > { %3691 = vmatmul.mubr.msk.bf16.vlgmr.msra.gmra.mrb[0].mxu0 %vm1042_vm0, %v953_v11  ;;  %v4283_v34 = vld [vmem:[%s6582_s20 + $0x54] ss:$8 sps:$4 sm:$0xff]   ;;  %v4281_v35 = vld [vmem:[%s6582_s20 + $0x50] ss:$8 sps:$4 sm:$0xff]   ;;  %v4286_v37 = vld [vmem:[%s6582_s20 + $0x64] ss:$8 sps:$4 sm:$0xff]  }
 0x198   : > { %1109 = vmatprep.mubr.bf16.mxu0 %v4836_v0  ;;  %2022 = vmatpush1.bf16.msra.mxu0 %v4266_v17  ;;  %v4284_v38 = vld [vmem:[%s6582_s20 + $0x60] ss:$8 sps:$4 sm:$0xff]   ;;  %v4289_v39 = vld [vmem:[%s6582_s20 + $0x74] ss:$8 sps:$4 sm:$0xff]   ;;  %v4287_v42 = vld [vmem:[%s6582_s20 + $0x70] ss:$8 sps:$4 sm:$0xff]   ;;  %s6419_s8 = scalar_lea.hbm %s6593_s9, %s3834_s12 }
 0x199   : > { %2023 = vmatprep.subr.bf16.mxu0 %v4271_v20  ;;  %3699 = vmatmul.mubr.msk.bf16.vlgmr.msra.gmra.mrb[0].mxu1 %vm1042_vm0, %v953_v11  ;;  %v930_v40 = vld [vmem:[%s5333_s6 + $0x40] sm:$0xff]  ;;  %v931_v41 = vld [vmem:[%s5333_s6 + $0x48] sm:$0xff]  ;;  %v4295_v46 = vld [vmem:[%s6582_s20 + $0x94] ss:$8 sps:$4 sm:$0xff]   ;;  %v963_v7 = vshrl.u32 %v962_v6, 7  ;;  %s911_s24 = sand.u32 1, %s6590_s3  }
 0x19a   : > { %1222 = vmatprep.mubr.bf16.mxu1 %v4836_v0  ;;  %v957_v43 = vpack.c.bf16 %v931_v41, %v930_v40  ;;  %v4292_v44 = vld [vmem:[%s6582_s20 + $0x84] ss:$8 sps:$4 sm:$0xff]   ;;  %v4290_v45 = vld [vmem:[%s6582_s20 + $0x80] ss:$8 sps:$4 sm:$0xff]   ;;  %v932_v47 = vld [vmem:[%s5333_s6 + $0x50] sm:$0xff]  ;;  %s3676_s22 = sshll.u32 %s911_s24, 7 }
 0x19b   : > { %v933_v48 = vld [vmem:[%s5333_s6 + $0x58] sm:$0xff]  ;;  %v4298_v51 = vld [vmem:[%s6582_s20 + $0xa4] ss:$8 sps:$4 sm:$0xff]   ;;  %v4296_v52 = vld [vmem:[%s6582_s20 + $0xa0] ss:$8 sps:$4 sm:$0xff]   ;;  %v5480_v8 = vsub.s32 0, %v963_v7 }
 0x19c   : > { %2024 = vmatpush1.bf16.msra.mxu0 %v4269_v21  ;;  %v4293_v49 = vld [vmem:[%s6582_s20 + $0x90] ss:$8 sps:$4 sm:$0xff]   ;;  %v958_v50 = vpack.c.bf16 %v933_v48, %v932_v47  ;;  %v4301_v53 = vld [vmem:[%s6582_s20 + $0xb4] ss:$8 sps:$4 sm:$0xff]   ;;  %v934_v54 = vld [vmem:[%s5333_s6 + $0x60] sm:$0xff]  ;;  %v5482_v10 = vsub.s32 1, %v963_v7 }
 0x19d   : > { %2025 = vmatprep.subr.bf16.mxu0 %v4274_v23  ;;  %v935_v55 = vld [vmem:[%s5333_s6 + $0x68] sm:$0xff]  ;;  %v4299_v56 = vld [vmem:[%s6582_s20 + $0xb0] ss:$8 sps:$4 sm:$0xff]   ;;  %v4307_v63 = vld [vmem:[%s6582_s20 + $0xd4] ss:$8 sps:$4 sm:$0xff]   ;;  %v5485_v12 = vrot.slane %v950_v9, %v5480_v8  ;;  %v972_v21 = vsub.s32 2, %v963_v7 }
 0x19e   : > { %v959_v57 = vpack.c.bf16 %v935_v55, %v934_v54  ;;  %v936_v58 = vld [vmem:[%s5333_s6 + $0x70] sm:$0xff]  ;;  %v937_v59 = vld [vmem:[%s5333_s6 + $0x78] sm:$0xff]  ;;  %v4304_v61 = vld [vmem:[%s6582_s20 + $0xc4] ss:$8 sps:$4 sm:$0xff]   ;;  %6583 = vst [vmem:[#allocation39_spill] sm:$0xff] %v5482_v10  ;;  %v5488_v14 = vrot.slane %v950_v9, %v5482_v10  ;;  %s6589_s6 = sld [smem:[#allocation53_spill]] }
 0x19f   : > { %3692 = vmatmul.mubr.msk.bf16.gmra.mrb[4].mxu0 %vm1042_vm0, %v954_v22  ;;  %v960_v60 = vpack.c.bf16 %v937_v59, %v936_v58  ;;  %v4302_v62 = vld [vmem:[%s6582_s20 + $0xc0] ss:$8 sps:$4 sm:$0xff]   ;;  %v4310_v1 = vld [vmem:[%s6582_s20 + $0xe4] ss:$8 sps:$4 sm:$0xff]   ;;  %v4313_v3 = vld [vmem:[%s6582_s20 + $0xf4] ss:$8 sps:$4 sm:$0xff]  }
 0x1a0   : > { %1119 = vmatprep.mubr.bf16.mxu0 %v4836_v0  ;;  %2026 = vmatpush1.bf16.msra.mxu0 %v4272_v24  ;;  %v4308_v2 = vld [vmem:[%s6582_s20 + $0xe0] ss:$8 sps:$4 sm:$0xff]   ;;  %v4311_v4 = vld [vmem:[%s6582_s20 + $0xf0] ss:$8 sps:$4 sm:$0xff]   ;;  %v4316_v5 = vld [vmem:[%s6582_s20 + $0x104] ss:$8 sps:$4 sm:$0xff]  }
 0x1a1   : > { %2027 = vmatprep.subr.bf16.mxu0 %v4277_v25  ;;  %3700 = vmatmul.mubr.msk.bf16.gmra.mrb[4].mxu1 %vm1042_vm0, %v954_v22  ;;  %v951_v11 = vld [vmem:[#allocation7] sm:$0xf]  ;;  %v952_v13 = vld [vmem:[#allocation8] sm:$0xf]  ;;  %v976_v25 = vsub.s32 3, %v963_v7  ;;  %v4363_v54 = vld [vmem:[#allocation14] sm:$0xff]  }
 0x1a2   : > { %1232 = vmatprep.mubr.bf16.mxu1 %v4836_v0  ;;  %v5491_v15 = vrot.slane %v951_v11, %v5480_v8  ;;  %v5494_v17 = vrot.slane %v951_v11, %v5482_v10  ;;  %v5498_v19 = vrot.slane %v952_v13, %v5480_v8  ;;  %v5502_v23 = vrot.slane %v952_v13, %v5482_v10  ;;  %v4364_v55 = vld [vmem:[#allocation14 + $0x48] sm:$0xff]   ;;  %s6399_s1 = scalar_lea.vmem [#allocation22], %s3676_s22  ;;  %s6428_s7 = scalar_lea.sflag [#allocation4], %s911_s24 }
 0x1a3   : > { %v5519_v40 = vrot.slane %v951_v11, %v976_v25  ;;  %p6594_p6 = scmp.ne.s32.totalorder %s6592_s4, 0  ;;  %s4837_s22 = smov [#allocation22]  }
 0x1a4   : > { %2028 = vmatpush1.bf16.msra.mxu0 %v4275_v28  ;;  %s4732_s21 = sshll.u32 %s4837_s22, 4  ;;  %s4733_s21 = int_to_ptr.vmem [resolvable:$false] %s4732_s21 }
 0x1a5   : > { %2029 = vmatprep.subr.bf16.mxu0 %v4280_v30  ;;  %s4734_s2 = scalar_lea.vmem %s4733_s21, 4096 }
 0x1a7   : > { %3693 = vmatmul.mubr.msk.bf16.gmra.mrb[8].mxu0 %vm1042_vm0, %v955_v29 }
 0x1a8   : > { %1129 = vmatprep.mubr.bf16.mxu0 %v4836_v0  ;;  %2030 = vmatpush1.bf16.msra.mxu0 %v4278_v33  ;;  %v5510_v33 = vrot.slane %v950_v9, %v972_v21 }
 0x1a9   : > { %2031 = vmatprep.subr.bf16.mxu0 %v4283_v34  ;;  %3701 = vmatmul.mubr.msk.bf16.gmra.mrb[8].mxu1 %vm1042_vm0, %v955_v29 }
 0x1aa   : > { %1242 = vmatprep.mubr.bf16.mxu1 %v4836_v0 }
 0x1ac   : > { %2032 = vmatpush1.bf16.msra.mxu0 %v4281_v35 }
 0x1ad   : > { %2033 = vmatprep.subr.bf16.mxu0 %v4286_v37 }
 0x1af   : > { %3694 = vmatmul.mubr.msk.bf16.gmra.mrb[12].mxu0 %vm1042_vm0, %v956_v36 }
 0x1b0   : > { %1139 = vmatprep.mubr.bf16.mxu0 %v4836_v0  ;;  %2034 = vmatpush1.bf16.msra.mxu0 %v4284_v38 }
 0x1b1   : > { %2035 = vmatprep.subr.bf16.mxu0 %v4289_v39  ;;  %3702 = vmatmul.mubr.msk.bf16.gmra.mrb[12].mxu1 %vm1042_vm0, %v956_v36  ;;  %v5514_v36 = vrot.slane %v950_v9, %v976_v25  ;;  %v5517_v39 = vrot.slane %v951_v11, %v972_v21  ;;  %v4365_v9 = vld [vmem:[#allocation14 + $0x8] sm:$0xff]  }
 0x1b2   : > { %1252 = vmatprep.mubr.bf16.mxu1 %v4836_v0 }
 0x1b4   : > { %2036 = vmatpush1.bf16.msra.mxu0 %v4287_v42 }
 0x1b5   : > { %2037 = vmatprep.subr.bf16.mxu0 %v4292_v44 }
 0x1b7   : > { %3695 = vmatmul.mubr.msk.bf16.gmra.mrb[16].mxu0 %vm1042_vm0, %v957_v43 }
 0x1b8   : > { %1149 = vmatprep.mubr.bf16.mxu0 %v4836_v0  ;;  %2038 = vmatpush1.bf16.msra.mxu0 %v4290_v45  ;;  %v5522_v45 = vrot.slane %v952_v13, %v972_v21 }
 0x1b9   : > { %2039 = vmatprep.subr.bf16.mxu0 %v4295_v46  ;;  %3703 = vmatmul.mubr.msk.bf16.gmra.mrb[16].mxu1 %vm1042_vm0, %v957_v43  ;;  %v5524_v46 = vrot.slane %v952_v13, %v976_v25  ;;  %v4314_v25 = vld [vmem:[%s6582_s20 + $0x100] ss:$8 sps:$4 sm:$0xff]  }
 0x1ba   : > { %1262 = vmatprep.mubr.bf16.mxu1 %v4836_v0 }
 0x1bc   : > { %2040 = vmatpush1.bf16.msra.mxu0 %v4293_v49 }
 0x1bd   : > { %2041 = vmatprep.subr.bf16.mxu0 %v4298_v51 }
 0x1bf   : > { %3696 = vmatmul.mubr.msk.bf16.gmra.mrb[20].mxu0 %vm1042_vm0, %v958_v50 }
 0x1c0   : > { %1159 = vmatprep.mubr.bf16.mxu0 %v4836_v0  ;;  %2042 = vmatpush1.bf16.msra.mxu0 %v4296_v52 }
 0x1c1   : > { %2043 = vmatprep.subr.bf16.mxu0 %v4301_v53  ;;  %3704 = vmatmul.mubr.msk.bf16.gmra.mrb[20].mxu1 %vm1042_vm0, %v958_v50  ;;  %v4362_v53 = vld [vmem:[#allocation14 + $0x40] sm:$0xff]  }
 0x1c2   : > { %1272 = vmatprep.mubr.bf16.mxu1 %v4836_v0  ;;  %3835 = vmatprep.subr.bf16.mxu1 %v4362_v53  ;;  %v4368_v53 = vld [vmem:[#allocation14 + $0x58] sm:$0xff]  }
 0x1c3   : > { %3836 = vmatpush3.bf16.msra.mxu1 %v4363_v54 }
 0x1c4   : > { %2044 = vmatpush1.bf16.msra.mxu0 %v4299_v56  ;;  %3837 = vmatprep.subr.bf16.mxu1 %v4364_v55 }
 0x1c5   : > { %2045 = vmatprep.subr.bf16.mxu0 %v4304_v61 }
 0x1c7   : > { %3697 = vmatmul.mubr.msk.bf16.gmra.mrb[24].mxu0 %vm1042_vm0, %v959_v57  ;;  %3838 = vmatpush3.bf16.msra.mxu1 %v4365_v9 }
 0x1c8   : > { %1169 = vmatprep.mubr.bf16.mxu0 %v4836_v0  ;;  %2046 = vmatpush1.bf16.msra.mxu0 %v4302_v62 }
 0x1c9   : > { %3705 = vmatmul.mubr.msk.bf16.gmra.mrb[24].mxu1 %vm1042_vm0, %v959_v57  ;;  %2047 = vmatprep.subr.bf16.mxu0 %v4307_v63 }
 0x1ca   : > { %1282 = vmatprep.mubr.bf16.mxu1 %v4836_v0  ;;  %v4305_v0 = vld [vmem:[%s6582_s20 + $0xd0] ss:$8 sps:$4 sm:$0xff]  }
 0x1cc   : > { %2048 = vmatpush1.bf16.msra.mxu0 %v4305_v0 }
 0x1cd   : > { %2049 = vmatprep.subr.bf16.mxu0 %v4310_v1 }
 0x1cf   : > { %3698 = vmatmul.mubr.msk.bf16.gmra.mrb[28].mxu0 %vm1042_vm0, %v960_v60 }
 0x1d0   : > { %2050 = vmatpush1.bf16.msra.mxu0 %v4308_v2 }
 0x1d1   : > { %3706 = vmatmul.mubr.msk.bf16.gmra.mrb[28].mxu1 %vm1042_vm0, %v960_v60  ;;  %2051 = vmatprep.subr.bf16.mxu0 %v4313_v3 }
 0x1d4   : > { %2052 = vmatpush1.bf16.msra.mxu0 %v4311_v4 }
 0x1d5   : > { %2134 = vmatprep.subr.bf16.mxu0 %v4316_v5 }
 0x26a   : > { %v1101_v16 = vpop.f32.mrb[0].mxu0 }
 0x26b   : > { %v1102_v18 = vadd.f32 %v1101_v16, %v5485_v12  ;;  %v1103_v20 = vpop.f32.mrb[1].mxu0 }
 0x26c   : > { %v1104_v22 = vadd.f32 %v1103_v20, %v5488_v14  ;;  %v1105_v24 = vpop.f32.mrb[2].mxu0  ;;  %v1214_v44 = vpop.f32.mrb[0].mxu1  ;;  %v4366_v20 = vld [vmem:[#allocation14 + $0x50] sm:$0xff]  }
 0x26d   : > { %v1314_v26 = vmul.f32 %v5491_v15, %v1102_v18  ;;  %v1106_v27 = vadd.f32 %v1105_v24, %v5485_v12  ;;  %v1107_v28 = vpop.f32.mrb[3].mxu0  ;;  %v1215_v51 = vadd.f32 %v1214_v44, %v5510_v33  ;;  %v1216_v52 = vpop.f32.mrb[1].mxu1  ;;  %3839 = vmatprep.subr.bf16.mxu1 %v4366_v20 }
 0x26e   : > { %v1315_v29 = vmul.f32 %v5494_v17, %v1104_v22  ;;  %v1108_v30 = vadd.f32 %v1107_v28, %v5488_v14  ;;  %v1217_v60 = vadd.f32 %v1216_v52, %v5514_v36  ;;  %v1218_v61 = vpop.f32.mrb[2].mxu1 }
 0x26f   : > { %v1399_v31 = vadd.f32 %v5498_v19, %v1314_v26  ;;  %v1318_v32 = vmul.f32 %v5491_v15, %v1106_v27  ;;  %v1316_v2 = vmul.f32 %v5517_v39, %v1215_v51  ;;  %v1220_v3 = vpop.f32.mrb[3].mxu1 }
 0x270   : > { %v1400_v34 = vadd.f32 %v5502_v23, %v1315_v29  ;;  %v1319_v35 = vmul.f32 %v5494_v17, %v1108_v30  ;;  %v1317_v7 = vmul.f32 %v5519_v40, %v1217_v60  ;;  %v4319_v29 = vld [vmem:[%s6582_s20 + $0x114] ss:$8 sps:$4 sm:$0xff]  }
 0x271   : > { %v1463_v37 = vmax.f32 %v1399_v31, 0.0  ;;  %v1403_v38 = vadd.f32 %v5498_v19, %v1318_v32  ;;  %v5550_v31 = vadd.f32 %v1218_v61, %v5510_v33 }
 0x272   : > { %v1464_v41 = vmax.f32 %v1400_v34, 0.0  ;;  %v1404_v42 = vadd.f32 %v5502_v23, %v1319_v35  ;;  %v1111_v43 = vpop.f32.mrb[4].mxu0  ;;  %v1402_v26 = vadd.f32 %v5524_v46, %v1317_v7  ;;  %v4369_v7 = vld [vmem:[#allocation14 + $0x18] sm:$0xff]  }
 0x273   : > { %v1527_v47 = vadd.f32 %v1463_v37, %v1102_v18  ;;  %v1467_v48 = vmax.f32 %v1403_v38, 0.0  ;;  %v1112_v49 = vadd.f32 %v1111_v43, %v5485_v12  ;;  %v1113_v50 = vpop.f32.mrb[5].mxu0  ;;  %v1401_v18 = vadd.f32 %v5522_v45, %v1316_v2 }
 0x274   : > { %v1528_v56 = vadd.f32 %v1464_v41, %v1104_v22  ;;  %v1468_v57 = vmax.f32 %v1404_v42, 0.0  ;;  %v1114_v58 = vadd.f32 %v1113_v50, %v5488_v14  ;;  %v1115_v59 = vpop.f32.mrb[6].mxu0  ;;  %v1466_v37 = vmax.f32 %v1402_v26, 0.0  ;;  %v1224_v41 = vpop.f32.mrb[4].mxu1  ;;  %v4367_v42 = vld [vmem:[#allocation14 + $0x10] sm:$0xff]  }
 0x275   : > { %v1531_v62 = vadd.f32 %v1467_v48, %v1106_v27  ;;  %v1322_v63 = vmul.f32 %v5491_v15, %v1112_v49  ;;  %v1116_v0 = vadd.f32 %v1115_v59, %v5485_v12  ;;  %v1117_v1 = vpop.f32.mrb[7].mxu0  ;;  %v5554_v38 = vadd.f32 %v1220_v3, %v5514_v36  ;;  %v1226_v52 = vpop.f32.mrb[5].mxu1  ;;  %3840 = vmatpush3.bf16.msra.mxu1 %v4367_v42 }
 0x276   : > { %v1532_v4 = vadd.f32 %v1468_v57, %v1108_v30  ;;  %v1323_v5 = vmul.f32 %v5494_v17, %v1114_v58  ;;  %v1118_v6 = vadd.f32 %v1117_v1, %v5488_v14  ;;  %v1465_v30 = vmax.f32 %v1401_v18, 0.0  ;;  %v5565_v61 = vpop.f32.mrb[6].mxu1  ;;  %3841 = vmatprep.subr.bf16.mxu1 %v4368_v53  ;;  %v4370_v18 = vld [vmem:[#allocation14 + $0x60] sm:$0xff]  }
 0x277   : > { %v1658_v11 = vpack.c.bf16 %v1531_v62, %v1527_v47  ;;  %v1407_v13 = vadd.f32 %v5498_v19, %v1322_v63  ;;  %v1326_v16 = vmul.f32 %v5491_v15, %v1116_v0  ;;  %v5563_v59 = vadd.f32 %v1466_v37, %v1217_v60  ;;  %v5574_v3 = vpop.f32.mrb[7].mxu1 }
 0x278   : > { %v1408_v21 = vadd.f32 %v5502_v23, %v1323_v5  ;;  %v1327_v22 = vmul.f32 %v5494_v17, %v1118_v6  ;;  %v1659_v24 = vpack.c.bf16 %v1532_v4, %v1528_v56  ;;  %v5557_v50 = vadd.f32 %v1465_v30, %v1215_v51 }
 0x279   : > { %v1471_v27 = vmax.f32 %v1407_v13, 0.0  ;;  %v1411_v28 = vadd.f32 %v5498_v19, %v1326_v16  ;;  %v1320_v2 = vmul.f32 %v5517_v39, %v5550_v31  ;;  %v1321_v5 = vmul.f32 %v5519_v40, %v5554_v38  ;;  %3842 = vmatpush3.bf16.msra.mxu1 %v4369_v7 }
 0x27a   : > { %v1472_v32 = vmax.f32 %v1408_v21, 0.0  ;;  %v1412_v34 = vadd.f32 %v5502_v23, %v1327_v22  ;;  %v1121_v35 = vpop.f32.mrb[8].mxu0  ;;  %2053 = vmatprep.mubr.bf16.mxu0 %v1659_v24  ;;  %v4320_v22 = vld [vmem:[%s6582_s20 + $0x120] ss:$8 sps:$4 sm:$0xff]   ;;  %v5598_v37 = vadd.f32 %v1226_v52, %v5514_v36  ;;  %3843 = vmatprep.subr.bf16.mxu1 %v4370_v18 }
 0x27b   : > { %v1535_v43 = vadd.f32 %v1471_v27, %v1112_v49  ;;  %v1475_v44 = vmax.f32 %v1411_v28, 0.0  ;;  %v1122_v47 = vadd.f32 %v1121_v35, %v5485_v12  ;;  %v1123_v48 = vpop.f32.mrb[9].mxu0  ;;  %2054 = vmatmul.mubr.bf16.vlgmr.msra.gmra.mrb[32].mxu0 %v1658_v11  ;;  %v4317_v49 = vld [vmem:[%s6582_s20 + $0x110] ss:$8 sps:$4 sm:$0xff]   ;;  %v1405_v16 = vadd.f32 %v5522_v45, %v1320_v2  ;;  %v4325_v27 = vld [vmem:[%s6582_s20 + $0x134] ss:$8 sps:$4 sm:$0xff]  }
 0x27c   : > { %v1536_v54 = vadd.f32 %v1472_v32, %v1114_v58  ;;  %v1476_v55 = vmax.f32 %v1412_v34, 0.0  ;;  %v1124_v56 = vadd.f32 %v1123_v48, %v5488_v14  ;;  %2135 = vmatpush1.bf16.msra.mxu0 %v4314_v25  ;;  %v1125_v57 = vpop.f32.mrb[10].mxu0  ;;  %v4322_v58 = vld [vmem:[%s6582_s20 + $0x124] ss:$8 sps:$4 sm:$0xff]   ;;  %v1406_v24 = vadd.f32 %v5524_v46, %v1321_v5  ;;  %v5600_v42 = vpop.f32.mrb[8].mxu1 }
 0x27d   : > { %v1539_v62 = vadd.f32 %v1475_v44, %v1116_v0  ;;  %v1330_v51 = vmul.f32 %v5491_v15, %v1122_v47  ;;  %v1126_v63 = vadd.f32 %v1125_v57, %v5485_v12  ;;  %v1127_v1 = vpop.f32.mrb[11].mxu0  ;;  %2136 = vmatprep.subr.bf16.mxu0 %v4319_v29  ;;  %v1469_v28 = vmax.f32 %v1405_v16, 0.0  ;;  %v4372_v57 = vld [vmem:[#allocation14 + $0x68] sm:$0xff]  }
 0x27e   : > { %v1540_v60 = vadd.f32 %v1476_v55, %v1118_v6  ;;  %v1331_v4 = vmul.f32 %v5494_v17, %v1124_v56  ;;  %v1128_v0 = vadd.f32 %v1127_v1, %v5488_v14  ;;  %v5594_v29 = vadd.f32 %v1224_v41, %v5510_v33  ;;  %v5606_v55 = vpop.f32.mrb[9].mxu1 }
 0x27f   : > { %v1415_v9 = vadd.f32 %v5498_v19, %v1330_v51  ;;  %v1334_v11 = vmul.f32 %v5491_v15, %v1126_v63  ;;  %v1662_v13 = vpack.c.bf16 %v1539_v62, %v1535_v43  ;;  %v1470_v35 = vmax.f32 %v1406_v24, 0.0  ;;  %v4371_v43 = vld [vmem:[#allocation14 + $0x20] sm:$0xff]   ;;  %v4326_v24 = vld [vmem:[%s6582_s20 + $0x140] ss:$8 sps:$4 sm:$0xff]  }
 0x280   : > { %v1416_v6 = vadd.f32 %v5502_v23, %v1331_v4  ;;  %v1335_v20 = vmul.f32 %v5494_v17, %v1128_v0  ;;  %2137 = vmatpush1.bf16.msra.mxu0 %v4317_v49  ;;  %v1663_v21 = vpack.c.bf16 %v1540_v60, %v1536_v54  ;;  %v5604_v41 = vadd.f32 %v1469_v28, %v5550_v31  ;;  %v4328_v4 = vld [vmem:[%s6582_s20 + $0x144] ss:$8 sps:$4 sm:$0xff]   ;;  %v4331_v28 = vld [vmem:[%s6582_s20 + $0x154] ss:$8 sps:$4 sm:$0xff]  }
 0x281   : > { %v1479_v25 = vmax.f32 %v1415_v9, 0.0  ;;  %v1419_v26 = vadd.f32 %v5498_v19, %v1334_v11  ;;  %2138 = vmatprep.subr.bf16.mxu0 %v4322_v58  ;;  %v5613_v1 = vadd.f32 %v1470_v35, %v5554_v38  ;;  %v5615_v58 = vpop.f32.mrb[10].mxu1  ;;  %v1324_v11 = vmul.f32 %v5517_v39, %v5594_v29  ;;  %3844 = vmatpush3.bf16.msra.mxu1 %v4371_v43 }
 0x282   : > { %v1480_v30 = vmax.f32 %v1416_v6, 0.0  ;;  %v1420_v32 = vadd.f32 %v5502_v23, %v1335_v20  ;;  %v1131_v34 = vpop.f32.mrb[12].mxu0  ;;  %2063 = vmatprep.mubr.bf16.mxu0 %v1663_v21  ;;  %v5624_v7 = vpop.f32.mrb[11].mxu1  ;;  %v1325_v20 = vmul.f32 %v5519_v40, %v5598_v37  ;;  %3845 = vmatprep.subr.bf16.mxu1 %v4372_v57 }
 0x283   : > { %v1543_v44 = vadd.f32 %v1479_v25, %v1122_v47  ;;  %v1483_v48 = vmax.f32 %v1419_v26, 0.0  ;;  %v1132_v53 = vadd.f32 %v1131_v34, %v5485_v12  ;;  %v1133_v54 = vpop.f32.mrb[13].mxu0  ;;  %2064 = vmatmul.mubr.bf16.gmra.mrb[36].mxu0 %v1662_v13  ;;  %v4323_v47 = vld [vmem:[%s6582_s20 + $0x130] ss:$8 sps:$4 sm:$0xff]   ;;  %v1409_v25 = vadd.f32 %v5522_v45, %v1324_v11 }
 0x284   : > { %v1544_v49 = vadd.f32 %v1480_v30, %v1124_v56  ;;  %v1484_v52 = vmax.f32 %v1420_v32, 0.0  ;;  %v1134_v62 = vadd.f32 %v1133_v54, %v5488_v14  ;;  %2139 = vmatpush1.bf16.msra.mxu0 %v4320_v22  ;;  %v1135_v51 = vpop.f32.mrb[14].mxu0  ;;  %v4373_v13 = vld [vmem:[#allocation14 + $0x28] sm:$0xff]   ;;  %v1410_v30 = vadd.f32 %v5524_v46, %v1325_v20  ;;  %v5654_v54 = vpop.f32.mrb[12].mxu1 }
 0x285   : > { %v1547_v31 = vadd.f32 %v1483_v48, %v1126_v63  ;;  %v1338_v2 = vmul.f32 %v5491_v15, %v1132_v53  ;;  %v1136_v60 = vadd.f32 %v1135_v51, %v5485_v12  ;;  %v1137_v56 = vpop.f32.mrb[15].mxu0  ;;  %2140 = vmatprep.subr.bf16.mxu0 %v4325_v27  ;;  %v5647_v32 = vadd.f32 %v5565_v61, %v5510_v33 }
 0x286   : > { %v1548_v38 = vadd.f32 %v1484_v52, %v1128_v0  ;;  %v1339_v9 = vmul.f32 %v5494_v17, %v1134_v62  ;;  %v1138_v63 = vadd.f32 %v1137_v56, %v5488_v14  ;;  %v5652_v48 = vadd.f32 %v5574_v3, %v5514_v36  ;;  %3846 = vmatpush3.bf16.msra.mxu1 %v4373_v13  ;;  %v4329_v3 = vld [vmem:[%s6582_s20 + $0x150] ss:$8 sps:$4 sm:$0xff]  }
 0x287   : > { %v1423_v16 = vadd.f32 %v5498_v19, %v1338_v2  ;;  %v1342_v18 = vmul.f32 %v5491_v15, %v1136_v60  ;;  %v1666_v6 = vpack.c.bf16 %v1547_v31, %v1543_v44  ;;  %v1473_v44 = vmax.f32 %v1409_v25, 0.0 }
 0x288   : > { %v1424_v0 = vadd.f32 %v5502_v23, %v1339_v9  ;;  %v1343_v21 = vmul.f32 %v5494_v17, %v1138_v63  ;;  %2141 = vmatpush1.bf16.msra.mxu0 %v4323_v47  ;;  %v1667_v22 = vpack.c.bf16 %v1548_v38, %v1544_v49  ;;  %v1474_v61 = vmax.f32 %v1410_v30, 0.0  ;;  %v5657_v47 = vpop.f32.mrb[13].mxu1 }
 0x289   : > { %v1487_v26 = vmax.f32 %v1423_v16, 0.0  ;;  %v1427_v27 = vadd.f32 %v5498_v19, %v1342_v18  ;;  %2142 = vmatprep.subr.bf16.mxu0 %v4328_v4  ;;  %v5666_v38 = vpop.f32.mrb[14].mxu1  ;;  %v4334_v16 = vld [vmem:[%s6582_s20 + $0x164] ss:$8 sps:$4 sm:$0xff]   ;;  %v1329_v25 = vmul.f32 %v5519_v40, %v5652_v48 }
 0x28a   : > { %v1488_v34 = vmax.f32 %v1424_v0, 0.0  ;;  %v1428_v35 = vadd.f32 %v5502_v23, %v1343_v21  ;;  %v1141_v43 = vpop.f32.mrb[16].mxu0  ;;  %2073 = vmatprep.mubr.bf16.mxu0 %v1667_v22  ;;  %v5674_v18 = vadd.f32 %v1474_v61, %v5598_v37  ;;  %v1328_v0 = vmul.f32 %v5517_v39, %v5647_v32 }
 0x28b   : > { %v1551_v57 = vadd.f32 %v1487_v26, %v1132_v53  ;;  %v1491_v49 = vmax.f32 %v1427_v27, 0.0  ;;  %v1142_v52 = vadd.f32 %v1141_v43, %v5485_v12  ;;  %v1143_v51 = vpop.f32.mrb[17].mxu0  ;;  %2074 = vmatmul.mubr.bf16.gmra.mrb[40].mxu0 %v1666_v6  ;;  %v5664_v53 = vadd.f32 %v1473_v44, %v5594_v29  ;;  %v5676_v6 = vpop.f32.mrb[15].mxu1  ;;  %v4332_v27 = vld [vmem:[%s6582_s20 + $0x160] ss:$8 sps:$4 sm:$0xff]  }
 0x28c   : > { %v1552_v31 = vadd.f32 %v1488_v34, %v1134_v62  ;;  %v1492_v2 = vmax.f32 %v1428_v35, 0.0  ;;  %v1144_v56 = vadd.f32 %v1143_v51, %v5488_v14  ;;  %2143 = vmatpush1.bf16.msra.mxu0 %v4326_v24  ;;  %v1145_v4 = vpop.f32.mrb[18].mxu0  ;;  %v4337_v35 = vld [vmem:[%s6582_s20 + $0x174] ss:$8 sps:$4 sm:$0xff]   ;;  %v1414_v43 = vadd.f32 %v5524_v46, %v1329_v25 }
 0x28d   : > { %v1555_v9 = vadd.f32 %v1491_v49, %v1136_v60  ;;  %v1346_v11 = vmul.f32 %v5491_v15, %v1142_v52  ;;  %v1146_v13 = vadd.f32 %v1145_v4, %v5485_v12  ;;  %v1147_v62 = vpop.f32.mrb[19].mxu0  ;;  %2144 = vmatprep.subr.bf16.mxu0 %v4331_v28  ;;  %v1413_v28 = vadd.f32 %v5522_v45, %v1328_v0 }
 0x28e   : > { %v1556_v29 = vadd.f32 %v1492_v2, %v1138_v63  ;;  %v1347_v20 = vmul.f32 %v5494_v17, %v1144_v56  ;;  %v1148_v60 = vadd.f32 %v1147_v62, %v5488_v14  ;;  %v5699_v44 = vadd.f32 %v5600_v42, %v5510_v33  ;;  %v5706_v2 = vpop.f32.mrb[16].mxu1 }
 0x28f   : > { %v1431_v21 = vadd.f32 %v5498_v19, %v1346_v11  ;;  %v1350_v22 = vmul.f32 %v5491_v15, %v1146_v13  ;;  %v1670_v24 = vpack.c.bf16 %v1555_v9, %v1551_v57  ;;  %v1477_v61 = vmax.f32 %v1413_v28, 0.0  ;;  %v5709_v62 = vpop.f32.mrb[17].mxu1 }
 0x290   : > { %v1432_v37 = vadd.f32 %v5502_v23, %v1347_v20  ;;  %v1351_v26 = vmul.f32 %v5494_v17, %v1148_v60  ;;  %2145 = vmatpush1.bf16.msra.mxu0 %v4329_v3  ;;  %v1671_v63 = vpack.c.bf16 %v1556_v29, %v1552_v31  ;;  %v5704_v31 = vadd.f32 %v5606_v55, %v5514_v36  ;;  %v4335_v55 = vld [vmem:[%s6582_s20 + $0x170] ss:$8 sps:$4 sm:$0xff]  }
 0x291   : > { %v1495_v30 = vmax.f32 %v1431_v21, 0.0  ;;  %v1435_v34 = vadd.f32 %v5498_v19, %v1350_v22  ;;  %2146 = vmatprep.subr.bf16.mxu0 %v4334_v16  ;;  %v1478_v42 = vmax.f32 %v1414_v43, 0.0  ;;  %v5718_v21 = vpop.f32.mrb[18].mxu1  ;;  %v1332_v28 = vmul.f32 %v5517_v39, %v5699_v44 }
 0x292   : > { %v1496_v57 = vmax.f32 %v1432_v37, 0.0  ;;  %v1436_v49 = vadd.f32 %v5502_v23, %v1351_v26  ;;  %v1151_v51 = vpop.f32.mrb[20].mxu0  ;;  %2083 = vmatprep.mubr.bf16.mxu0 %v1671_v63  ;;  %v4340_v37 = vld [vmem:[%s6582_s20 + $0x184] ss:$8 sps:$4 sm:$0xff]   ;;  %v5728_v63 = vpop.f32.mrb[19].mxu1  ;;  %v1333_v43 = vmul.f32 %v5519_v40, %v5704_v31 }
 0x293   : > { %v1559_v4 = vadd.f32 %v1495_v30, %v1142_v52  ;;  %v1499_v3 = vmax.f32 %v1435_v34, 0.0  ;;  %v1152_v9 = vadd.f32 %v1151_v51, %v5485_v12  ;;  %v1153_v11 = vpop.f32.mrb[21].mxu0  ;;  %2084 = vmatmul.mubr.bf16.gmra.mrb[44].mxu0 %v1670_v24  ;;  %v5716_v52 = vadd.f32 %v1477_v61, %v5647_v32 }
 0x294   : > { %v1560_v16 = vadd.f32 %v1496_v57, %v1144_v56  ;;  %v1500_v29 = vmax.f32 %v1436_v49, 0.0  ;;  %v1154_v20 = vadd.f32 %v1153_v11, %v5488_v14  ;;  %2147 = vmatpush1.bf16.msra.mxu0 %v4332_v27  ;;  %v1155_v0 = vpop.f32.mrb[22].mxu0  ;;  %v5726_v26 = vadd.f32 %v1478_v42, %v5652_v48  ;;  %v4338_v49 = vld [vmem:[%s6582_s20 + $0x180] ss:$8 sps:$4 sm:$0xff]  }
 0x295   : > { %v1563_v22 = vadd.f32 %v1499_v3, %v1146_v13  ;;  %v1354_v24 = vmul.f32 %v5491_v15, %v1152_v9  ;;  %v1156_v25 = vadd.f32 %v1155_v0, %v5485_v12  ;;  %v1157_v56 = vpop.f32.mrb[23].mxu0  ;;  %2148 = vmatprep.subr.bf16.mxu0 %v4337_v35  ;;  %v1417_v51 = vadd.f32 %v5522_v45, %v1332_v28 }
 0x296   : > { %v1564_v32 = vadd.f32 %v1500_v29, %v1148_v60  ;;  %v1355_v27 = vmul.f32 %v5494_v17, %v1154_v20  ;;  %v1158_v13 = vadd.f32 %v1157_v56, %v5488_v14  ;;  %v1418_v11 = vadd.f32 %v5524_v46, %v1333_v43 }
 0x297   : > { %v1439_v30 = vadd.f32 %v5498_v19, %v1354_v24  ;;  %v1358_v34 = vmul.f32 %v5491_v15, %v1156_v25  ;;  %v1674_v35 = vpack.c.bf16 %v1563_v22, %v1559_v4  ;;  %v4343_v4 = vld [vmem:[%s6582_s20 + $0x194] ss:$8 sps:$4 sm:$0xff]   ;;  %v5751_v42 = vadd.f32 %v5615_v58, %v5510_v33  ;;  %v5758_v24 = vpop.f32.mrb[20].mxu1 }
 0x298   : > { %v1440_v48 = vadd.f32 %v5502_v23, %v1355_v27  ;;  %v1359_v57 = vmul.f32 %v5494_v17, %v1158_v13  ;;  %2149 = vmatpush1.bf16.msra.mxu0 %v4335_v55  ;;  %v1675_v60 = vpack.c.bf16 %v1564_v32, %v1560_v16  ;;  %v1481_v55 = vmax.f32 %v1417_v51, 0.0  ;;  %v5761_v28 = vpop.f32.mrb[21].mxu1 }
 0x299   : > { %v1503_v61 = vmax.f32 %v1439_v30, 0.0  ;;  %v1443_v3 = vadd.f32 %v5498_v19, %v1358_v34  ;;  %2150 = vmatprep.subr.bf16.mxu0 %v4340_v37  ;;  %v5756_v22 = vadd.f32 %v5624_v7, %v5514_v36  ;;  %v1482_v58 = vmax.f32 %v1418_v11, 0.0  ;;  %v4341_v7 = vld [vmem:[%s6582_s20 + $0x190] ss:$8 sps:$4 sm:$0xff]  }
 0x29a   : > { %v1504_v16 = vmax.f32 %v1440_v48, 0.0  ;;  %v1444_v29 = vadd.f32 %v5502_v23, %v1359_v57  ;;  %v1161_v0 = vpop.f32.mrb[24].mxu0  ;;  %2093 = vmatprep.mubr.bf16.mxu0 %v1675_v60  ;;  %v5770_v57 = vpop.f32.mrb[22].mxu1 }
 0x29b   : > { %v1567_v56 = vadd.f32 %v1503_v61, %v1152_v9  ;;  %v1507_v37 = vmax.f32 %v1443_v3, 0.0  ;;  %v1162_v32 = vadd.f32 %v1161_v0, %v5485_v12  ;;  %v1163_v27 = vpop.f32.mrb[25].mxu0  ;;  %2094 = vmatmul.mubr.bf16.gmra.mrb[48].mxu0 %v1674_v35  ;;  %v5768_v9 = vadd.f32 %v1481_v55, %v5699_v44  ;;  %v5780_v3 = vpop.f32.mrb[23].mxu1 }
 0x29c   : > { %v1568_v30 = vadd.f32 %v1504_v16, %v1154_v20  ;;  %v1508_v34 = vmax.f32 %v1444_v29, 0.0  ;;  %v1164_v43 = vadd.f32 %v1163_v27, %v5488_v14  ;;  %2151 = vmatpush1.bf16.msra.mxu0 %v4338_v49  ;;  %v1165_v48 = vpop.f32.mrb[26].mxu0  ;;  %v4346_v49 = vld [vmem:[%s6582_s20 + $0x1a4] ss:$8 sps:$4 sm:$0xff]   ;;  %v5778_v61 = vadd.f32 %v1482_v58, %v5704_v31  ;;  %v4344_v27 = vld [vmem:[%s6582_s20 + $0x1a0] ss:$8 sps:$4 sm:$0xff]  }
 0x29d   : > { %v1571_v60 = vadd.f32 %v1507_v37, %v1156_v25  ;;  %v1362_v35 = vmul.f32 %v5491_v15, %v1162_v32  ;;  %v1166_v51 = vadd.f32 %v1165_v48, %v5485_v12  ;;  %v1167_v20 = vpop.f32.mrb[27].mxu0  ;;  %2152 = vmatprep.subr.bf16.mxu0 %v4343_v4  ;;  %v1336_v16 = vmul.f32 %v5517_v39, %v5751_v42 }
 0x29e   : > { %v1572_v44 = vadd.f32 %v1508_v34, %v1158_v13  ;;  %v1363_v11 = vmul.f32 %v5494_v17, %v1164_v43  ;;  %v1168_v25 = vadd.f32 %v1167_v20, %v5488_v14  ;;  %v1337_v55 = vmul.f32 %v5519_v40, %v5756_v22 }
 0x29f   : > { %v1447_v29 = vadd.f32 %v5498_v19, %v1362_v35  ;;  %v1366_v4 = vmul.f32 %v5491_v15, %v1166_v51  ;;  %v1678_v0 = vpack.c.bf16 %v1571_v60, %v1567_v56  ;;  %v1421_v58 = vadd.f32 %v5522_v45, %v1336_v16  ;;  %v4349_v56 = vld [vmem:[%s6582_s20 + $0x1b4] ss:$8 sps:$4 sm:$0xff]   ;;  %v5806_v16 = vpop.f32.mrb[24].mxu1 }
 0x2a0   : > { %v1448_v31 = vadd.f32 %v5502_v23, %v1363_v11  ;;  %v1367_v37 = vmul.f32 %v5494_v17, %v1168_v25  ;;  %2153 = vmatpush1.bf16.msra.mxu0 %v4341_v7  ;;  %v1679_v13 = vpack.c.bf16 %v1572_v44, %v1568_v30  ;;  %v1422_v60 = vadd.f32 %v5524_v46, %v1337_v55  ;;  %v5809_v10 = vpop.f32.mrb[25].mxu1 }
 0x2a1   : > { %v1511_v34 = vmax.f32 %v1447_v29, 0.0  ;;  %v1451_v48 = vadd.f32 %v5498_v19, %v1366_v4  ;;  %2154 = vmatprep.subr.bf16.mxu0 %v4346_v49  ;;  %v1485_v44 = vmax.f32 %v1421_v58, 0.0  ;;  %v1245_v11 = vadd.f32 %v5654_v54, %v5510_v33  ;;  %v4347_v54 = vld [vmem:[%s6582_s20 + $0x1b0] ss:$8 sps:$4 sm:$0xff]   ;;  %v5818_v58 = vpop.f32.mrb[26].mxu1 }
 0x2a2   : > { %v1512_v30 = vmax.f32 %v1448_v31, 0.0  ;;  %v1452_v35 = vadd.f32 %v5502_v23, %v1367_v37  ;;  %v1171_v20 = vpop.f32.mrb[28].mxu0  ;;  %2103 = vmatprep.mubr.bf16.mxu0 %v1679_v13  ;;  %v1486_v55 = vmax.f32 %v1422_v60, 0.0  ;;  %v5828_v60 = vpop.f32.mrb[27].mxu1 }
 0x2a3   : > { %v1575_v49 = vadd.f32 %v1511_v34, %v1162_v32  ;;  %v1515_v29 = vmax.f32 %v1451_v48, 0.0  ;;  %v1172_v4 = vadd.f32 %v1171_v20, %v5485_v12  ;;  %v1173_v5 = vpop.f32.mrb[29].mxu0  ;;  %2104 = vmatmul.mubr.bf16.gmra.mrb[52].mxu0 %v1678_v0  ;;  %v5816_v32 = vadd.f32 %v1485_v44, %v5751_v42 }
 0x2a4   : > { %v1576_v31 = vadd.f32 %v1512_v30, %v1164_v43  ;;  %v1516_v7 = vmax.f32 %v1452_v35, 0.0  ;;  %v1174_v37 = vadd.f32 %v1173_v5, %v5488_v14  ;;  %2155 = vmatpush1.bf16.msra.mxu0 %v4344_v27  ;;  %v1175_v13 = vpop.f32.mrb[30].mxu0  ;;  %v4352_v5 = vld [vmem:[%s6582_s20 + $0x1c4] ss:$8 sps:$4 sm:$0xff]   ;;  %v5826_v27 = vadd.f32 %v1486_v55, %v5756_v22 }
 0x2a5   : > { %v1579_v34 = vadd.f32 %v1515_v29, %v1166_v51  ;;  %v1370_v0 = vmul.f32 %v5491_v15, %v1172_v4  ;;  %v1176_v48 = vadd.f32 %v1175_v13, %v5485_v12  ;;  %v1177_v43 = vpop.f32.mrb[31].mxu0  ;;  %2156 = vmatprep.subr.bf16.mxu0 %v4349_v56  ;;  %v1340_v35 = vmul.f32 %v5517_v39, %v1245_v11 }
 0x2a6   : > { %v1580_v42 = vadd.f32 %v1516_v7, %v1168_v25  ;;  %v1371_v30 = vmul.f32 %v5494_v17, %v1174_v37  ;;  %v1178_v51 = vadd.f32 %v1177_v43, %v5488_v14  ;;  %v1247_v44 = vadd.f32 %v5657_v47, %v5514_v36  ;;  %v4350_v14 = vld [vmem:[%s6582_s20 + $0x1c0] ss:$8 sps:$4 sm:$0xff]  }
 0x2a7   : > { %v1455_v12 = vadd.f32 %v5498_v19, %v1370_v0  ;;  %v1374_v56 = vmul.f32 %v5491_v15, %v1176_v48  ;;  %v1682_v20 = vpack.c.bf16 %v1579_v34, %v1575_v49  ;;  %v1425_v7 = vadd.f32 %v5522_v45, %v1340_v35  ;;  %v4355_v15 = vld [vmem:[%s6582_s20 + $0x1d4] ss:$8 sps:$4 sm:$0xff]   ;;  %v5853_v0 = vpop.f32.mrb[28].mxu1 }
 0x2a8   : > { %v1456_v22 = vadd.f32 %v5502_v23, %v1371_v30  ;;  %v1375_v29 = vmul.f32 %v5494_v17, %v1178_v51  ;;  %2157 = vmatpush1.bf16.msra.mxu0 %v4347_v54  ;;  %v1683_v25 = vpack.c.bf16 %v1580_v42, %v1576_v31  ;;  %v1341_v47 = vmul.f32 %v5519_v40, %v1247_v44  ;;  %v5857_v30 = vpop.f32.mrb[29].mxu1 }
 0x2a9   : > { %v1519_v55 = vmax.f32 %v1455_v12, 0.0  ;;  %v1459_v13 = vadd.f32 %v5498_v19, %v1374_v56  ;;  %2158 = vmatprep.subr.bf16.mxu0 %v4352_v5  ;;  %v1249_v17 = vadd.f32 %v5666_v38, %v5510_v33  ;;  %v1489_v54 = vmax.f32 %v1425_v7, 0.0 }
 0x2aa   : > { %v1520_v49 = vmax.f32 %v1456_v22, 0.0  ;;  %v1460_v31 = vadd.f32 %v5502_v23, %v1375_v29  ;;  %2113 = vmatprep.mubr.bf16.mxu0 %v1683_v25  ;;  %v1251_v34 = vadd.f32 %v5676_v6, %v5514_v36  ;;  %v1426_v5 = vadd.f32 %v5524_v46, %v1341_v47  ;;  %v4353_v23 = vld [vmem:[%s6582_s20 + $0x1d0] ss:$8 sps:$4 sm:$0xff]  }
 0x2ab   : > { %v1583_v19 = vadd.f32 %v1519_v55, %v1172_v4  ;;  %v1523_v43 = vmax.f32 %v1459_v13, 0.0  ;;  %2114 = vmatmul.mubr.bf16.gmra.mrb[56].mxu0 %v1682_v20  ;;  %v1344_v42 = vmul.f32 %v5517_v39, %v1249_v17  ;;  %v5862_v12 = vadd.f32 %v1489_v54, %v1245_v11  ;;  %v5865_v4 = vpop.f32.mrb[30].mxu1  ;;  %v4358_v20 = vld [vmem:[%s6582_s20 + $0x1e4] ss:$8 sps:$4 sm:$0xff]  }
 0x2ac   : > { %v1584_v38 = vadd.f32 %v1520_v49, %v1174_v37  ;;  %v1524_v35 = vmax.f32 %v1460_v31, 0.0  ;;  %2159 = vmatpush1.bf16.msra.mxu0 %v4350_v14  ;;  %v1345_v6 = vmul.f32 %v5519_v40, %v1251_v34  ;;  %v1490_v22 = vmax.f32 %v1426_v5, 0.0  ;;  %v5873_v25 = vpop.f32.mrb[31].mxu1 }
 0x2ad   : > { %v1587_v56 = vadd.f32 %v1523_v43, %v1176_v48  ;;  %2160 = vmatprep.subr.bf16.mxu0 %v4355_v15  ;;  %v1429_v37 = vadd.f32 %v5522_v45, %v1344_v42  ;;  %v1665_v29 = vpack.c.bf16 %v5726_v26, %v5674_v18  ;;  %v1255_v7 = vadd.f32 %v5706_v2, %v5510_v33 }
 0x2ae   : > { %v1588_v11 = vadd.f32 %v1524_v35, %v1178_v51  ;;  %v1430_v14 = vadd.f32 %v5524_v46, %v1345_v6  ;;  %v1257_v48 = vadd.f32 %v5709_v62, %v5514_v36  ;;  %v5880_v13 = vadd.f32 %v1490_v22, %v1247_v44  ;;  %v4356_v51 = vld [vmem:[%s6582_s20 + $0x1e0] ss:$8 sps:$4 sm:$0xff]   ;;  %v4361_v62 = vld [vmem:[%s6582_s20 + $0x1f4] ss:$8 sps:$4 sm:$0xff]  }
 0x2af   : > { %v1686_v55 = vpack.c.bf16 %v1587_v56, %v1583_v19  ;;  %v1493_v15 = vmax.f32 %v1429_v37, 0.0  ;;  %v1259_v47 = vadd.f32 %v5718_v21, %v5510_v33  ;;  %v1348_v54 = vmul.f32 %v5517_v39, %v1255_v7  ;;  %v4359_v56 = vld [vmem:[%s6582_s20 + $0x1f0] ss:$8 sps:$4 sm:$0xff]  }
 0x2b0   : > { %2161 = vmatpush1.bf16.msra.mxu0 %v4353_v23  ;;  %v1687_v49 = vpack.c.bf16 %v1588_v11, %v1584_v38  ;;  %v1494_v31 = vmax.f32 %v1430_v14, 0.0  ;;  %v1349_v2 = vmul.f32 %v5519_v40, %v1257_v48  ;;  %v1664_v19 = vpack.c.bf16 %v5716_v52, %v5664_v53 }
 0x2b1   : > { %2162 = vmatprep.subr.bf16.mxu0 %v4358_v20  ;;  %v5892_v44 = vadd.f32 %v1493_v15, %v1249_v17  ;;  %v1352_v21 = vmul.f32 %v5517_v39, %v1259_v47  ;;  %v1261_v43 = vadd.f32 %v5728_v63, %v5514_v36  ;;  %v1433_v42 = vadd.f32 %v5522_v45, %v1348_v54 }
 0x2b2   : > { %2123 = vmatprep.mubr.bf16.mxu0 %v1687_v49  ;;  %v5899_v5 = vadd.f32 %v1494_v31, %v1251_v34  ;;  %v1434_v38 = vadd.f32 %v5524_v46, %v1349_v2  ;;  %v1669_v35 = vpack.c.bf16 %v5826_v27, %v5778_v61  ;;  %v1265_v6 = vadd.f32 %v5758_v24, %v5510_v33  ;;  %v4375_v61 = vld [vmem:[#allocation14 + $0x30] sm:$0xff]  }
 0x2b3   : > { %2124 = vmatmul.mubr.bf16.gmra.mrb[60].mxu0 %v1686_v55  ;;  %v1437_v17 = vadd.f32 %v5522_v45, %v1352_v21  ;;  %v1353_v23 = vmul.f32 %v5519_v40, %v1261_v43  ;;  %v1267_v63 = vadd.f32 %v5761_v28, %v5514_v36  ;;  %v6584_v34 = vpack.c.bf16 %v5613_v1, %v5563_v59  ;;  %v6001_v27 = vld [vmem:[%s6482_s13] sm:$0xff]  }
 0x2b4   : > { %2163 = vmatpush1.bf16.msra.mxu0 %v4356_v51  ;;  %v1497_v20 = vmax.f32 %v1433_v42, 0.0  ;;  %v1498_v22 = vmax.f32 %v1434_v38, 0.0  ;;  %v1269_v37 = vadd.f32 %v5770_v57, %v5510_v33  ;;  %v1668_v24 = vpack.c.bf16 %v5816_v32, %v5768_v9  ;;  %v4376_v9 = vld [vmem:[#allocation14 + $0x78] sm:$0xff]  }
 0x2b5   : > { %2166 = vmatprep.mubr.bf16.mxu0 %v6584_v34  ;;  %2164 = vmatprep.subr.bf16.mxu0 %v4361_v62  ;;  %v1501_v11 = vmax.f32 %v1437_v17, 0.0  ;;  %v1438_v28 = vadd.f32 %v5524_v46, %v1353_v23  ;;  %v1356_v14 = vmul.f32 %v5517_v39, %v1265_v6  ;;  %v1357_v59 = vmul.f32 %v5519_v40, %v1267_v63  ;;  %v4377_v32 = vld [vmem:[#allocation14 + $0x38] sm:$0xff]  }
 0x2b6   : > { %v5924_v1 = vadd.f32 %v1497_v20, %v1255_v7  ;;  %v5926_v55 = vadd.f32 %v1498_v22, %v1257_v48  ;;  %v1360_v15 = vmul.f32 %v5517_v39, %v1269_v37  ;;  %v1271_v57 = vadd.f32 %v5780_v3, %v5514_v36 }
 0x2b7   : > { %v5931_v49 = vadd.f32 %v1501_v11, %v1259_v47  ;;  %v1502_v51 = vmax.f32 %v1438_v28, 0.0  ;;  %v1441_v31 = vadd.f32 %v5522_v45, %v1356_v14  ;;  %v1442_v54 = vadd.f32 %v5524_v46, %v1357_v59 }
 0x2b8   : > { %2165 = vmatpush1.bf16.msra.mxu0 %v4359_v56  ;;  %v1445_v2 = vadd.f32 %v5522_v45, %v1360_v15  ;;  %v1361_v7 = vmul.f32 %v5519_v40, %v1271_v57  ;;  %v1673_v48 = vpack.c.bf16 %v5899_v5, %v5880_v13  ;;  %v1275_v62 = vadd.f32 %v5806_v16, %v5510_v33  ;;  %v1655_v13 = vld [vmem:[#allocation10] sm:$0x3]  ;;  %v1656_v5 = vld [vmem:[#allocation11] sm:$0x3] }
 0x2b9   : > { %v5941_v21 = vadd.f32 %v1502_v51, %v1261_v43  ;;  %v1505_v3 = vmax.f32 %v1441_v31, 0.0  ;;  %v1506_v47 = vmax.f32 %v1442_v54, 0.0  ;;  %v1277_v42 = vadd.f32 %v5809_v10, %v5514_v36 }
 0x2ba   : > { %v1509_v38 = vmax.f32 %v1445_v2, 0.0  ;;  %v1446_v17 = vadd.f32 %v5524_v46, %v1361_v7  ;;  %v1364_v23 = vmul.f32 %v5517_v39, %v1275_v62  ;;  %v1279_v34 = vadd.f32 %v5818_v58, %v5510_v33 }
 0x2bb   : > { %v6585_v56 = vpack.c.bf16 %v5604_v41, %v5557_v50  ;;  %v1569_v16 = vadd.f32 %v1505_v3, %v1265_v6  ;;  %v1570_v43 = vadd.f32 %v1506_v47, %v1267_v63  ;;  %v1365_v20 = vmul.f32 %v5519_v40, %v1277_v42 }
 0x2bc   : > { %v1672_v22 = vpack.c.bf16 %v5892_v44, %v5862_v12  ;;  %v1573_v10 = vadd.f32 %v1509_v38, %v1269_v37  ;;  %v1510_v11 = vmax.f32 %v1446_v17, 0.0  ;;  %v1449_v28 = vadd.f32 %v5522_v45, %v1364_v23 }
 0x2bd   : > { %2167 = vmatmul.mubr.bf16.vlgmr.msra.gmra.mrb[32].mxu0 %v6585_v56  ;;  %v1368_v58 = vmul.f32 %v5517_v39, %v1279_v34  ;;  %v1450_v50 = vadd.f32 %v5524_v46, %v1365_v20  ;;  %v1281_v41 = vadd.f32 %v5828_v60, %v5514_v36  ;;  %v1677_v6 = vpack.c.bf16 %v5941_v21, %v5926_v55 }
 0x2be   : > { %2176 = vmatprep.mubr.bf16.mxu0 %v1665_v29  ;;  %v1285_v12 = vadd.f32 %v5853_v0, %v5510_v33  ;;  %v1574_v44 = vadd.f32 %v1510_v11, %v1271_v57  ;;  %v1513_v18 = vmax.f32 %v1449_v28, 0.0  ;;  %v1287_v29 = vadd.f32 %v5857_v30, %v5514_v36 }
 0x2bf   : > { %v1453_v26 = vadd.f32 %v5522_v45, %v1368_v58  ;;  %v1514_v63 = vmax.f32 %v1450_v50, 0.0  ;;  %v1369_v37 = vmul.f32 %v5519_v40, %v1281_v41  ;;  %v1289_v60 = vadd.f32 %v5865_v4, %v5510_v33 }
 0x2c0   : > { %v1372_v14 = vmul.f32 %v5517_v39, %v1285_v12  ;;  %v1577_v59 = vadd.f32 %v1513_v18, %v1275_v62  ;;  %v1373_v15 = vmul.f32 %v5519_v40, %v1287_v29  ;;  %v1676_v0 = vpack.c.bf16 %v5931_v49, %v5924_v1 }
 0x2c1   : > { %v1517_v55 = vmax.f32 %v1453_v26, 0.0  ;;  %v1578_v57 = vadd.f32 %v1514_v63, %v1277_v42  ;;  %v1454_v51 = vadd.f32 %v5524_v46, %v1369_v37  ;;  %v1376_v31 = vmul.f32 %v5517_v39, %v1289_v60 }
 0x2c2   : > { %v1457_v30 = vadd.f32 %v5522_v45, %v1372_v14  ;;  %v1458_v2 = vadd.f32 %v5524_v46, %v1373_v15  ;;  %v1291_v33 = vadd.f32 %v5873_v25, %v5514_v36  ;;  %v1681_v4 = vpack.c.bf16 %v1574_v44, %v1570_v43 }
 0x2c3   : > { %v1581_v54 = vadd.f32 %v1517_v55, %v1279_v34  ;;  %v1518_v7 = vmax.f32 %v1454_v51, 0.0  ;;  %v1461_v49 = vadd.f32 %v5522_v45, %v1376_v31  ;;  %v1680_v62 = vpack.c.bf16 %v1573_v10, %v1569_v16 }
 0x2c4   : > { %v1521_v1 = vmax.f32 %v1457_v30, 0.0  ;;  %v1522_v39 = vmax.f32 %v1458_v2, 0.0  ;;  %v1377_v21 = vmul.f32 %v5519_v40, %v1291_v33  ;;  %v6011_v34 = vrot.slane %v1656_v5, %v5480_v8 }
 0x2c5   : > { %2177 = vmatmul.mubr.bf16.gmra.mrb[36].mxu0 %v1664_v19  ;;  %v1684_v3 = vpack.c.bf16 %v1581_v54, %v1577_v59  ;;  %v1582_v47 = vadd.f32 %v1518_v7, %v1281_v41  ;;  %v1525_v25 = vmax.f32 %v1461_v49, 0.0 }
 0x2c6   : > { %2186 = vmatprep.mubr.bf16.mxu0 %v1669_v35  ;;  %v1585_v36 = vadd.f32 %v1521_v1, %v1285_v12  ;;  %v1462_v42 = vadd.f32 %v5524_v46, %v1377_v21  ;;  %v1586_v19 = vadd.f32 %v1522_v39, %v1287_v29  ;;  %v4374_v46 = vld [vmem:[#allocation14 + $0x70] sm:$0xff]   ;;  %v6005_v35 = vrot.slane %v1655_v13, %v5480_v8 }
 0x2c7   : > { %v1589_v53 = vadd.f32 %v1525_v25, %v1289_v60  ;;  %v1685_v52 = vpack.c.bf16 %v1582_v47, %v1578_v57  ;;  %3847 = vmatprep.subr.bf16.mxu1 %v4374_v46 }
 0x2c8   : > { %v1526_v38 = vmax.f32 %v1462_v42, 0.0  ;;  %3848 = vmatpush3.bf16.msra.mxu1 %v4375_v61 }
 0x2c9   : > { %v1688_v17 = vpack.c.bf16 %v1589_v53, %v1585_v36  ;;  %3849 = vmatprep.subr.bf16.mxu1 %v4376_v9  ;;  %v4379_v53 = vld [vmem:[%s6482_s13 + $0x8] sm:$0xff]  }
 0x2ca   : > { %v1590_v45 = vadd.f32 %v1526_v38, %v1291_v33 }
 0x2cc   : > { %v1689_v40 = vpack.c.bf16 %v1590_v45, %v1586_v19  ;;  %3850 = vmatpush3.bf16.msra.mxu1 %v4377_v32 }
 0x2cd   : > { %2187 = vmatmul.mubr.bf16.gmra.mrb[40].mxu0 %v1668_v24  ;;  %3937 = vmatprep.subr.bf16.mxu1 %v6001_v27  ;;  %v1657_v24 = vld [vmem:[#allocation13] sm:$0x3] }
 0x2ce   : > { %2196 = vmatprep.mubr.bf16.mxu0 %v1673_v48  ;;  %v6586_v48 = vld [vmem:[#allocation39_spill] sm:$0xff]  ;;  %v6018_v20 = vrot.slane %v1657_v24, %v5480_v8 }
 0x2cf   : > { %v6008_v23 = vrot.slane %v1655_v13, %v6586_v48  ;;  %v6014_v16 = vrot.slane %v1656_v5, %v6586_v48  ;;  %v6022_v11 = vrot.slane %v1657_v24, %v6586_v48 }
 0x2d5   : > { %2197 = vmatmul.mubr.bf16.gmra.mrb[44].mxu0 %v1672_v22 }
 0x2d6   : > { %2206 = vmatprep.mubr.bf16.mxu0 %v1677_v6 }
 0x2dd   : > { %2207 = vmatmul.mubr.bf16.gmra.mrb[48].mxu0 %v1676_v0 }
 0x2de   : > { %2216 = vmatprep.mubr.bf16.mxu0 %v1681_v4 }
 0x2e5   : > { %2217 = vmatmul.mubr.bf16.gmra.mrb[52].mxu0 %v1680_v62 }
 0x2e6   : > { %2226 = vmatprep.mubr.bf16.mxu0 %v1685_v52 }
 0x2ed   : > { %2227 = vmatmul.mubr.bf16.gmra.mrb[56].mxu0 %v1684_v3 }
 0x2ee   : > { %2236 = vmatprep.mubr.bf16.mxu0 %v1689_v40 }
 0x2f5   : > { %2237 = vmatmul.mubr.bf16.gmra.mrb[60].mxu0 %v1688_v17 }
 0x390   : > { %v2168_v56 = vpop.f32.mrb[32].mxu0 }
 0x391   : > { %v4017_v43 = vadd.f32 %v2168_v56, %v6005_v35  ;;  %v2170_v22 = vpop.f32.mrb[33].mxu0 }
 0x392   : > { %v4018_v10 = vadd.f32 %v2170_v22, %v6008_v23  ;;  %v2172_v28 = vpop.f32.mrb[34].mxu0 }
 0x393   : > { %v2258_v58 = vmul.f32 %v4017_v43, %v6011_v34  ;;  %v4019_v50 = vadd.f32 %v2172_v28, %v6005_v35  ;;  %v2174_v41 = vpop.f32.mrb[35].mxu0 }
 0x394   : > { %v2259_v6 = vmul.f32 %v4018_v10, %v6014_v16  ;;  %v4020_v12 = vadd.f32 %v2174_v41, %v6008_v23 }
 0x395   : > { %v2301_v44 = vadd.f32 %v6018_v20, %v2258_v58  ;;  %v2260_v8 = vmul.f32 %v4019_v50, %v6011_v34 }
 0x396   : > { %v2302_v18 = vadd.f32 %v6022_v11, %v2259_v6  ;;  %v2261_v26 = vmul.f32 %v4020_v12, %v6014_v16 }
 0x397   : > { %v2333_v29 = vmax.f32 %v2301_v44, 0.0  ;;  %v2303_v63 = vadd.f32 %v6018_v20, %v2260_v8 }
 0x398   : > { %v2334_v37 = vmax.f32 %v2302_v18, 0.0  ;;  %v2304_v14 = vadd.f32 %v6022_v11, %v2261_v26  ;;  %v2178_v60 = vpop.f32.mrb[36].mxu0 }
 0x399   : > { %v2335_v59 = vmax.f32 %v2303_v63, 0.0  ;;  %v4021_v55 = vadd.f32 %v2178_v60, %v6005_v35  ;;  %v2180_v15 = vpop.f32.mrb[37].mxu0  ;;  %v2365_v30 = vadd.f32 %v4017_v43, %v2333_v29 }
 0x39a   : > { %v2336_v0 = vmax.f32 %v2304_v14, 0.0  ;;  %v4022_v57 = vadd.f32 %v2180_v15, %v6008_v23  ;;  %v2182_v51 = vpop.f32.mrb[38].mxu0  ;;  %v2366_v4 = vadd.f32 %v4018_v10, %v2334_v37 }
 0x39b   : > { %v2367_v31 = vadd.f32 %v4019_v50, %v2335_v59  ;;  %v2262_v54 = vmul.f32 %v4021_v55, %v6011_v34  ;;  %v4023_v2 = vadd.f32 %v2182_v51, %v6005_v35  ;;  %v2184_v33 = vpop.f32.mrb[39].mxu0 }
 0x39c   : > { %v2368_v7 = vadd.f32 %v4020_v12, %v2336_v0  ;;  %v2263_v1 = vmul.f32 %v4022_v57, %v6014_v16  ;;  %v4024_v49 = vadd.f32 %v2184_v33, %v6008_v23 }
 0x39d   : > { %v2432_v62 = vpack.c.bf16 %v2367_v31, %v2365_v30  ;;  %v2305_v39 = vadd.f32 %v6018_v20, %v2262_v54  ;;  %v2264_v21 = vmul.f32 %v4023_v2, %v6011_v34 }
 0x39e   : > { %v2306_v3 = vadd.f32 %v6022_v11, %v2263_v1  ;;  %v2265_v47 = vmul.f32 %v4024_v49, %v6014_v16  ;;  %v2433_v36 = vpack.c.bf16 %v2368_v7, %v2366_v4 }
 0x39f   : > { %v2337_v25 = vmax.f32 %v2305_v39, 0.0  ;;  %v2307_v42 = vadd.f32 %v6018_v20, %v2264_v21 }
 0x3a0   : > { %v2338_v52 = vmax.f32 %v2306_v3, 0.0  ;;  %v2308_v19 = vadd.f32 %v6022_v11, %v2265_v47  ;;  %v2188_v38 = vpop.f32.mrb[40].mxu0  ;;  %2582 = vmatprep.mubr.bf16.mxu1 %v2433_v36 }
 0x3a1   : > { %v2339_v17 = vmax.f32 %v2307_v42, 0.0  ;;  %v4025_v45 = vadd.f32 %v2188_v38, %v6005_v35  ;;  %v2190_v40 = vpop.f32.mrb[41].mxu0  ;;  %2583 = vmatmul.mubr.bf16.vlgmr.msra.gmra.mrb[32].mxu1 %v2432_v62  ;;  %v2369_v32 = vadd.f32 %v4021_v55, %v2337_v25 }
 0x3a2   : > { %v2340_v46 = vmax.f32 %v2308_v19, 0.0  ;;  %v4026_v61 = vadd.f32 %v2190_v40, %v6008_v23  ;;  %v2192_v9 = vpop.f32.mrb[42].mxu0  ;;  %3938 = vmatpush3.bf16.msra.mxu1 %v6001_v27  ;;  %v2370_v56 = vadd.f32 %v4022_v57, %v2338_v52 }
 0x3a3   : > { %v2371_v13 = vadd.f32 %v4023_v2, %v2339_v17  ;;  %v2266_v5 = vmul.f32 %v4025_v45, %v6011_v34  ;;  %v4027_v24 = vadd.f32 %v2192_v9, %v6005_v35  ;;  %v2194_v48 = vpop.f32.mrb[43].mxu0  ;;  %3939 = vmatprep.subr.bf16.mxu1 %v4379_v53 }
 0x3a4   : > { %v2372_v43 = vadd.f32 %v4024_v49, %v2340_v46  ;;  %v2267_v22 = vmul.f32 %v4026_v61, %v6014_v16  ;;  %v4028_v10 = vadd.f32 %v2194_v48, %v6008_v23 }
 0x3a5   : > { %v2309_v28 = vadd.f32 %v6018_v20, %v2266_v5  ;;  %v2268_v58 = vmul.f32 %v4027_v24, %v6011_v34  ;;  %v2434_v50 = vpack.c.bf16 %v2371_v13, %v2369_v32 }
 0x3a6   : > { %v2310_v27 = vadd.f32 %v6022_v11, %v2267_v22  ;;  %v2269_v41 = vmul.f32 %v4028_v10, %v6014_v16  ;;  %v2435_v6 = vpack.c.bf16 %v2372_v43, %v2370_v56  ;;  %3940 = vmatpush3.bf16.msra.mxu1 %v4379_v53 }
 0x3a7   : > { %v2341_v12 = vmax.f32 %v2309_v28, 0.0  ;;  %v2311_v44 = vadd.f32 %v6018_v20, %v2268_v58 }
 0x3a8   : > { %v2342_v8 = vmax.f32 %v2310_v27, 0.0  ;;  %v2312_v18 = vadd.f32 %v6022_v11, %v2269_v41  ;;  %v2198_v26 = vpop.f32.mrb[44].mxu0  ;;  %2590 = vmatprep.mubr.bf16.mxu1 %v2435_v6 }
 0x3a9   : > { %v2343_v29 = vmax.f32 %v2311_v44, 0.0  ;;  %v4029_v63 = vadd.f32 %v2198_v26, %v6005_v35  ;;  %v2200_v37 = vpop.f32.mrb[45].mxu0  ;;  %2591 = vmatmul.mubr.bf16.gmra.mrb[36].mxu1 %v2434_v50  ;;  %v2373_v55 = vadd.f32 %v4025_v45, %v2341_v12 }
 0x3aa   : > { %v2344_v14 = vmax.f32 %v2312_v18, 0.0  ;;  %v4030_v60 = vadd.f32 %v2200_v37, %v6008_v23  ;;  %v2202_v59 = vpop.f32.mrb[46].mxu0  ;;  %v2374_v30 = vadd.f32 %v4026_v61, %v2342_v8 }
 0x3ab   : > { %v2375_v15 = vadd.f32 %v4027_v24, %v2343_v29  ;;  %v2270_v0 = vmul.f32 %v4029_v63, %v6011_v34  ;;  %v4031_v57 = vadd.f32 %v2202_v59, %v6005_v35  ;;  %v2204_v51 = vpop.f32.mrb[47].mxu0 }
 0x3ac   : > { %v2376_v31 = vadd.f32 %v4028_v10, %v2344_v14  ;;  %v2271_v54 = vmul.f32 %v4030_v60, %v6014_v16  ;;  %v4032_v2 = vadd.f32 %v2204_v51, %v6008_v23 }
 0x3ad   : > { %v2313_v33 = vadd.f32 %v6018_v20, %v2270_v0  ;;  %v2272_v4 = vmul.f32 %v4031_v57, %v6011_v34  ;;  %v2436_v7 = vpack.c.bf16 %v2375_v15, %v2373_v55 }
 0x3ae   : > { %v2314_v1 = vadd.f32 %v6022_v11, %v2271_v54  ;;  %v2273_v49 = vmul.f32 %v4032_v2, %v6014_v16  ;;  %v2437_v62 = vpack.c.bf16 %v2376_v31, %v2374_v30 }
 0x3af   : > { %v2345_v39 = vmax.f32 %v2313_v33, 0.0  ;;  %v2315_v21 = vadd.f32 %v6018_v20, %v2272_v4 }
 0x3b0   : > { %v2346_v3 = vmax.f32 %v2314_v1, 0.0  ;;  %v2316_v47 = vadd.f32 %v6022_v11, %v2273_v49  ;;  %v2208_v36 = vpop.f32.mrb[48].mxu0  ;;  %2598 = vmatprep.mubr.bf16.mxu1 %v2437_v62 }
 0x3b1   : > { %v2347_v25 = vmax.f32 %v2315_v21, 0.0  ;;  %v4033_v42 = vadd.f32 %v2208_v36, %v6005_v35  ;;  %v2210_v53 = vpop.f32.mrb[49].mxu0  ;;  %2599 = vmatmul.mubr.bf16.gmra.mrb[40].mxu1 %v2436_v7  ;;  %v2377_v17 = vadd.f32 %v4029_v63, %v2345_v39 }
 0x3b2   : > { %v2348_v52 = vmax.f32 %v2316_v47, 0.0  ;;  %v4034_v19 = vadd.f32 %v2210_v53, %v6008_v23  ;;  %v2212_v38 = vpop.f32.mrb[50].mxu0  ;;  %v2378_v9 = vadd.f32 %v4030_v60, %v2346_v3 }
 0x3b3   : > { %v2379_v45 = vadd.f32 %v4031_v57, %v2347_v25  ;;  %v2274_v40 = vmul.f32 %v4033_v42, %v6011_v34  ;;  %v4035_v46 = vadd.f32 %v2212_v38, %v6005_v35  ;;  %v2214_v61 = vpop.f32.mrb[51].mxu0 }
 0x3b4   : > { %v2380_v32 = vadd.f32 %v4032_v2, %v2348_v52  ;;  %v2275_v13 = vmul.f32 %v4034_v19, %v6014_v16  ;;  %v4036_v5 = vadd.f32 %v2214_v61, %v6008_v23 }
 0x3b5   : > { %v2317_v24 = vadd.f32 %v6018_v20, %v2274_v40  ;;  %v2276_v48 = vmul.f32 %v4035_v46, %v6011_v34  ;;  %v2438_v56 = vpack.c.bf16 %v2379_v45, %v2377_v17 }
 0x3b6   : > { %v2318_v43 = vadd.f32 %v6022_v11, %v2275_v13  ;;  %v2277_v22 = vmul.f32 %v4036_v5, %v6014_v16  ;;  %v2439_v10 = vpack.c.bf16 %v2380_v32, %v2378_v9 }
 0x3b7   : > { %v2349_v28 = vmax.f32 %v2317_v24, 0.0  ;;  %v2319_v58 = vadd.f32 %v6018_v20, %v2276_v48 }
 0x3b8   : > { %v2350_v50 = vmax.f32 %v2318_v43, 0.0  ;;  %v2320_v27 = vadd.f32 %v6022_v11, %v2277_v22  ;;  %v2218_v41 = vpop.f32.mrb[52].mxu0  ;;  %2606 = vmatprep.mubr.bf16.mxu1 %v2439_v10 }
 0x3b9   : > { %v2351_v6 = vmax.f32 %v2319_v58, 0.0  ;;  %v4037_v12 = vadd.f32 %v2218_v41, %v6005_v35  ;;  %v2220_v44 = vpop.f32.mrb[53].mxu0  ;;  %2607 = vmatmul.mubr.bf16.gmra.mrb[44].mxu1 %v2438_v56  ;;  %v2381_v29 = vadd.f32 %v4033_v42, %v2349_v28 }
 0x3ba   : > { %v2352_v8 = vmax.f32 %v2320_v27, 0.0  ;;  %v4038_v18 = vadd.f32 %v2220_v44, %v6008_v23  ;;  %v2222_v26 = vpop.f32.mrb[54].mxu0  ;;  %v2382_v59 = vadd.f32 %v4034_v19, %v2350_v50 }
 0x3bb   : > { %v2383_v63 = vadd.f32 %v4035_v46, %v2351_v6  ;;  %v2278_v37 = vmul.f32 %v4037_v12, %v6011_v34  ;;  %v4039_v14 = vadd.f32 %v2222_v26, %v6005_v35  ;;  %v2224_v60 = vpop.f32.mrb[55].mxu0 }
 0x3bc   : > { %v2384_v55 = vadd.f32 %v4036_v5, %v2352_v8  ;;  %v2279_v15 = vmul.f32 %v4038_v18, %v6014_v16  ;;  %v4040_v0 = vadd.f32 %v2224_v60, %v6008_v23 }
 0x3bd   : > { %v2321_v57 = vadd.f32 %v6018_v20, %v2278_v37  ;;  %v2280_v51 = vmul.f32 %v4039_v14, %v6011_v34  ;;  %v2440_v30 = vpack.c.bf16 %v2383_v63, %v2381_v29 }
 0x3be   : > { %v2322_v31 = vadd.f32 %v6022_v11, %v2279_v15  ;;  %v2281_v54 = vmul.f32 %v4040_v0, %v6014_v16  ;;  %v2441_v2 = vpack.c.bf16 %v2384_v55, %v2382_v59 }
 0x3bf   : > { %v2353_v33 = vmax.f32 %v2321_v57, 0.0  ;;  %v2323_v4 = vadd.f32 %v6018_v20, %v2280_v51 }
 0x3c0   : > { %v2354_v7 = vmax.f32 %v2322_v31, 0.0  ;;  %v2324_v1 = vadd.f32 %v6022_v11, %v2281_v54  ;;  %v2228_v49 = vpop.f32.mrb[56].mxu0  ;;  %2614 = vmatprep.mubr.bf16.mxu1 %v2441_v2 }
 0x3c1   : > { %v2355_v62 = vmax.f32 %v2323_v4, 0.0  ;;  %v4041_v39 = vadd.f32 %v2228_v49, %v6005_v35  ;;  %v2230_v21 = vpop.f32.mrb[57].mxu0  ;;  %2615 = vmatmul.mubr.bf16.gmra.mrb[48].mxu1 %v2440_v30  ;;  %v2385_v25 = vadd.f32 %v4037_v12, %v2353_v33  ;;  %v4384_v49 = vld [vmem:[%s6482_s13 + $0x30] sm:$0xff]  }
 0x3c2   : > { %v2356_v3 = vmax.f32 %v2324_v1, 0.0  ;;  %v4042_v47 = vadd.f32 %v2230_v21, %v6008_v23  ;;  %v2232_v36 = vpop.f32.mrb[58].mxu0  ;;  %v2386_v38 = vadd.f32 %v4038_v18, %v2354_v7  ;;  %v4383_v1 = vld [vmem:[%s6482_s13 + $0x28] sm:$0xff]   ;;  %v6143_v21 = vld [vmem:[%s6479_s10] ss:$0 sm:$0xff] }
 0x3c3   : > { %v2387_v42 = vadd.f32 %v4039_v14, %v2355_v62  ;;  %v2282_v53 = vmul.f32 %v4041_v39, %v6011_v34  ;;  %v4043_v52 = vadd.f32 %v2232_v36, %v6005_v35  ;;  %v2234_v19 = vpop.f32.mrb[59].mxu0  ;;  %v4385_v62 = vld [vmem:[%s6482_s13 + $0x38] sm:$0xff]  }
 0x3c4   : > { %v2388_v17 = vadd.f32 %v4040_v0, %v2356_v3  ;;  %v2283_v45 = vmul.f32 %v4042_v47, %v6014_v16  ;;  %v4044_v40 = vadd.f32 %v2234_v19, %v6008_v23  ;;  %v6148_v19 = vld [vmem:[#allocation17] ss:$0 sm:$0xff] }
 0x3c5   : > { %v2325_v46 = vadd.f32 %v6018_v20, %v2282_v53  ;;  %v2284_v61 = vmul.f32 %v4043_v52, %v6011_v34  ;;  %v2442_v9 = vpack.c.bf16 %v2387_v42, %v2385_v25  ;;  %v6145_v25 = vld [vmem:[#allocation16] ss:$0 sm:$0xff] }
 0x3c6   : > { %v2326_v32 = vadd.f32 %v6022_v11, %v2283_v45  ;;  %v2285_v13 = vmul.f32 %v4044_v40, %v6014_v16  ;;  %v2443_v5 = vpack.c.bf16 %v2388_v17, %v2386_v38 }
 0x3c7   : > { %v2357_v24 = vmax.f32 %v2325_v46, 0.0  ;;  %v2327_v48 = vadd.f32 %v6018_v20, %v2284_v61 }
 0x3c8   : > { %v2358_v56 = vmax.f32 %v2326_v32, 0.0  ;;  %v2328_v43 = vadd.f32 %v6022_v11, %v2285_v13  ;;  %v2238_v22 = vpop.f32.mrb[60].mxu0  ;;  %2622 = vmatprep.mubr.bf16.mxu1 %v2443_v5 }
 0x3c9   : > { %v2359_v10 = vmax.f32 %v2327_v48, 0.0  ;;  %v4045_v28 = vadd.f32 %v2238_v22, %v6005_v35  ;;  %v2240_v58 = vpop.f32.mrb[61].mxu0  ;;  %2623 = vmatmul.mubr.bf16.gmra.mrb[52].mxu1 %v2442_v9  ;;  %v2389_v6 = vadd.f32 %v4041_v39, %v2357_v24 }
 0x3ca   : > { %v2360_v50 = vmax.f32 %v2328_v43, 0.0  ;;  %v4046_v27 = vadd.f32 %v2240_v58, %v6008_v23  ;;  %v2242_v41 = vpop.f32.mrb[62].mxu0  ;;  %v2390_v26 = vadd.f32 %v4042_v47, %v2358_v56 }
 0x3cb   : > { %v2391_v12 = vadd.f32 %v4043_v52, %v2359_v10  ;;  %v2286_v44 = vmul.f32 %v4045_v28, %v6011_v34  ;;  %v4047_v8 = vadd.f32 %v2242_v41, %v6005_v35  ;;  %v2244_v18 = vpop.f32.mrb[63].mxu0 }
 0x3cc   : > { %v2392_v29 = vadd.f32 %v4044_v40, %v2360_v50  ;;  %v2287_v63 = vmul.f32 %v4046_v27, %v6014_v16  ;;  %v4048_v37 = vadd.f32 %v2244_v18, %v6008_v23 }
 0x3cd   : > { %v2329_v14 = vadd.f32 %v6018_v20, %v2286_v44  ;;  %v2288_v60 = vmul.f32 %v4047_v8, %v6011_v34  ;;  %v2444_v59 = vpack.c.bf16 %v2391_v12, %v2389_v6 }
 0x3ce   : > { %v2330_v55 = vadd.f32 %v6022_v11, %v2287_v63  ;;  %v2289_v15 = vmul.f32 %v4048_v37, %v6014_v16  ;;  %v2445_v0 = vpack.c.bf16 %v2392_v29, %v2390_v26  ;;  %v4380_v16 = vld [vmem:[%s6482_s13 + $0x10] sm:$0xff]  }
 0x3cf   : > { %v2361_v57 = vmax.f32 %v2329_v14, 0.0  ;;  %v2331_v35 = vadd.f32 %v6018_v20, %v2288_v60  ;;  %3941 = vmatprep.subr.bf16.mxu1 %v4380_v16  ;;  %v4381_v20 = vld [vmem:[%s6482_s13 + $0x18] sm:$0xff]  }
 0x3d0   : > { %v2362_v51 = vmax.f32 %v2330_v55, 0.0  ;;  %v2332_v30 = vadd.f32 %v6022_v11, %v2289_v15  ;;  %2630 = vmatprep.mubr.bf16.mxu1 %v2445_v0  ;;  %3942 = vmatpush3.bf16.msra.mxu1 %v4380_v16  ;;  %v4382_v11 = vld [vmem:[%s6482_s13 + $0x20] sm:$0xff]  }
 0x3d1   : > { %v2363_v31 = vmax.f32 %v2331_v35, 0.0  ;;  %2631 = vmatmul.mubr.bf16.gmra.mrb[56].mxu1 %v2444_v59  ;;  %v2393_v54 = vadd.f32 %v4045_v28, %v2361_v57  ;;  %3943 = vmatprep.subr.bf16.mxu1 %v4381_v20 }
 0x3d2   : > { %v2364_v23 = vmax.f32 %v2332_v30, 0.0  ;;  %v2394_v33 = vadd.f32 %v4046_v27, %v2362_v51 }
 0x3d3   : > { %v2395_v2 = vadd.f32 %v4047_v8, %v2363_v31 }
 0x3d4   : > { %v2396_v34 = vadd.f32 %v4048_v37, %v2364_v23  ;;  %3944 = vmatpush3.bf16.msra.mxu1 %v4381_v20 }
 0x3d5   : > { %v2446_v4 = vpack.c.bf16 %v2395_v2, %v2393_v54  ;;  %3945 = vmatprep.subr.bf16.mxu1 %v4382_v11 }
 0x3d6   : > { %v2447_v7 = vpack.c.bf16 %v2396_v34, %v2394_v33 }
 0x3d8   : > { %2638 = vmatprep.mubr.bf16.mxu1 %v2447_v7  ;;  %3946 = vmatpush3.bf16.msra.mxu1 %v4382_v11 }
 0x3d9   : > { %2639 = vmatmul.mubr.bf16.gmra.mrb[60].mxu1 %v2446_v4  ;;  %3947 = vmatprep.subr.bf16.mxu1 %v4383_v1 }
 0x3dc   : > { %3948 = vmatpush3.bf16.msra.mxu1 %v4383_v1 }
 0x3dd   : > { %3949 = vmatprep.subr.bf16.mxu1 %v4384_v49 }
 0x3e0   : > { %3950 = vmatpush3.bf16.msra.mxu1 %v4384_v49 }
 0x3e1   : > { %3951 = vmatprep.subr.bf16.mxu1 %v4385_v62 }
 0x3e4   : > { %3952 = vmatpush3.bf16.msra.mxu1 %v4385_v62 }
 0x474   : > { %v3851_v39 = vpop.f32.mrb[32].mxu1 }
 0x475   : > { %v3852_v3 = vpop.f32.mrb[33].mxu1 }
 0x476   : > { %v3853_v47 = vadd.f32 %v3852_v3, %v3851_v39  ;;  %v3854_v36 = vpop.f32.mrb[34].mxu1 }
 0x477   : > { %v3855_v42 = vpop.f32.mrb[35].mxu1 }
 0x478   : > { %v2585_v53 = vadd.f32 %v3853_v47, %v6143_v21  ;;  %v3856_v52 = vadd.f32 %v3855_v42, %v3854_v36 }
 0x47a   : > { %v2653_v38 = vmul.f32 %v6145_v25, %v2585_v53  ;;  %v2588_v17 = vadd.f32 %v3856_v52, %v6143_v21 }
 0x47c   : > { %v2675_v45 = vadd.f32 %v6148_v19, %v2653_v38  ;;  %v2654_v40 = vmul.f32 %v6145_v25, %v2588_v17  ;;  %v3857_v46 = vpop.f32.mrb[36].mxu1 }
 0x47d   : > { %v3858_v61 = vpop.f32.mrb[37].mxu1 }
 0x47e   : > { %v2691_v9 = vmax.f32 %v2675_v45, 0.0  ;;  %v2676_v32 = vadd.f32 %v6148_v19, %v2654_v40  ;;  %v3859_v13 = vadd.f32 %v3858_v61, %v3857_v46  ;;  %v3860_v5 = vpop.f32.mrb[38].mxu1 }
 0x47f   : > { %v3861_v24 = vpop.f32.mrb[39].mxu1 }
 0x480   : > { %v2692_v48 = vmax.f32 %v2676_v32, 0.0  ;;  %v2593_v56 = vadd.f32 %v3859_v13, %v6143_v21  ;;  %v3862_v43 = vadd.f32 %v3861_v24, %v3860_v5  ;;  %v2707_v22 = vadd.f32 %v2691_v9, %v2585_v53 }
 0x482   : > { %v2708_v10 = vadd.f32 %v2692_v48, %v2588_v17  ;;  %v2655_v28 = vmul.f32 %v6145_v25, %v2593_v56  ;;  %v2596_v58 = vadd.f32 %v3862_v43, %v6143_v21 }
 0x484   : > { %v2677_v50 = vadd.f32 %v6148_v19, %v2655_v28  ;;  %v2656_v27 = vmul.f32 %v6145_v25, %v2596_v58  ;;  %v3863_v41 = vpop.f32.mrb[40].mxu1  ;;  %v2742_v6 = vpack.c.bf16 %v2708_v10, %v2707_v22 }
 0x485   : > { %v3864_v12 = vpop.f32.mrb[41].mxu1 }
 0x486   : > { %v2693_v44 = vmax.f32 %v2677_v50, 0.0  ;;  %v2678_v8 = vadd.f32 %v6148_v19, %v2656_v27  ;;  %v3865_v18 = vadd.f32 %v3864_v12, %v3863_v41  ;;  %v3866_v26 = vpop.f32.mrb[42].mxu1  ;;  %3953 = vmatprep.mubr.bf16.mxu1 %v2742_v6 }
 0x487   : > { %v3867_v29 = vpop.f32.mrb[43].mxu1 }
 0x488   : > { %v2694_v63 = vmax.f32 %v2678_v8, 0.0  ;;  %v2601_v37 = vadd.f32 %v3865_v18, %v6143_v21  ;;  %v3868_v14 = vadd.f32 %v3867_v29, %v3866_v26  ;;  %v2709_v60 = vadd.f32 %v2693_v44, %v2593_v56 }
 0x48a   : > { %v2710_v59 = vadd.f32 %v2694_v63, %v2596_v58  ;;  %v2657_v55 = vmul.f32 %v6145_v25, %v2601_v37  ;;  %v2604_v15 = vadd.f32 %v3868_v14, %v6143_v21 }
 0x48c   : > { %v2743_v0 = vpack.c.bf16 %v2710_v59, %v2709_v60  ;;  %v2679_v57 = vadd.f32 %v6148_v19, %v2657_v55  ;;  %v2658_v35 = vmul.f32 %v6145_v25, %v2604_v15  ;;  %v3869_v51 = vpop.f32.mrb[44].mxu1 }
 0x48d   : > { %v3870_v30 = vpop.f32.mrb[45].mxu1 }
 0x48e   : > { %v2695_v31 = vmax.f32 %v2679_v57, 0.0  ;;  %v2680_v23 = vadd.f32 %v6148_v19, %v2658_v35  ;;  %v3871_v54 = vadd.f32 %v3870_v30, %v3869_v51  ;;  %v3872_v2 = vpop.f32.mrb[46].mxu1  ;;  %3954 = vmatmul.mubr.bf16.vlgmr.msra.gmra.mrb[64].mxu1 %v2743_v0 }
 0x48f   : > { %v3873_v33 = vpop.f32.mrb[47].mxu1 }
 0x490   : > { %v2696_v34 = vmax.f32 %v2680_v23, 0.0  ;;  %v2609_v4 = vadd.f32 %v3871_v54, %v6143_v21  ;;  %v3874_v7 = vadd.f32 %v3873_v33, %v3872_v2  ;;  %v2711_v16 = vadd.f32 %v2695_v31, %v2601_v37 }
 0x492   : > { %v2712_v20 = vadd.f32 %v2696_v34, %v2604_v15  ;;  %v2659_v11 = vmul.f32 %v6145_v25, %v2609_v4  ;;  %v2612_v1 = vadd.f32 %v3874_v7, %v6143_v21 }
 0x494   : > { %v2681_v49 = vadd.f32 %v6148_v19, %v2659_v11  ;;  %v2660_v62 = vmul.f32 %v6145_v25, %v2612_v1  ;;  %v3875_v39 = vpop.f32.mrb[48].mxu1  ;;  %v2744_v3 = vpack.c.bf16 %v2712_v20, %v2711_v16 }
 0x495   : > { %v3876_v47 = vpop.f32.mrb[49].mxu1 }
 0x496   : > { %v2697_v36 = vmax.f32 %v2681_v49, 0.0  ;;  %v2682_v42 = vadd.f32 %v6148_v19, %v2660_v62  ;;  %v3877_v53 = vadd.f32 %v3876_v47, %v3875_v39  ;;  %v3878_v52 = vpop.f32.mrb[50].mxu1  ;;  %3957 = vmatprep.mubr.bf16.mxu1 %v2744_v3 }
 0x497   : > { %v3879_v38 = vpop.f32.mrb[51].mxu1 }
 0x498   : > { %v2698_v17 = vmax.f32 %v2682_v42, 0.0  ;;  %v2617_v45 = vadd.f32 %v3877_v53, %v6143_v21  ;;  %v3880_v40 = vadd.f32 %v3879_v38, %v3878_v52  ;;  %v2713_v46 = vadd.f32 %v2697_v36, %v2609_v4 }
 0x49a   : > { %v2714_v61 = vadd.f32 %v2698_v17, %v2612_v1  ;;  %v2661_v9 = vmul.f32 %v6145_v25, %v2617_v45  ;;  %v2620_v32 = vadd.f32 %v3880_v40, %v6143_v21 }
 0x49c   : > { %v2683_v13 = vadd.f32 %v6148_v19, %v2661_v9  ;;  %v2662_v5 = vmul.f32 %v6145_v25, %v2620_v32  ;;  %v3881_v24 = vpop.f32.mrb[52].mxu1  ;;  %v2745_v48 = vpack.c.bf16 %v2714_v61, %v2713_v46 }
 0x49d   : > { %v3882_v56 = vpop.f32.mrb[53].mxu1 }
 0x49e   : > { %v2699_v43 = vmax.f32 %v2683_v13, 0.0  ;;  %v2684_v22 = vadd.f32 %v6148_v19, %v2662_v5  ;;  %v3883_v10 = vadd.f32 %v3882_v56, %v3881_v24  ;;  %v3884_v28 = vpop.f32.mrb[54].mxu1  ;;  %3958 = vmatmul.mubr.bf16.gmra.mrb[68].mxu1 %v2745_v48  ;;  %v4390_v13 = vld [vmem:[%s6492_s23] sm:$0xff]  }
 0x49f   : > { %v3885_v58 = vpop.f32.mrb[55].mxu1  ;;  %3993 = vmatprep.subr.bf16.mxu0 %v4390_v13  ;;  %v6215_v5 = vld [vmem:[%s6483_s14] ss:$0 sm:$0xff] }
 0x4a0   : > { %v2700_v50 = vmax.f32 %v2684_v22, 0.0  ;;  %v2625_v27 = vadd.f32 %v3883_v10, %v6143_v21  ;;  %v3886_v41 = vadd.f32 %v3885_v58, %v3884_v28  ;;  %v2715_v6 = vadd.f32 %v2699_v43, %v2617_v45  ;;  %3994 = vmatpush3.bf16.msra.mxu0 %v4390_v13  ;;  %v6220_v24 = vld [vmem:[%s6484_s15] ss:$0 sm:$0xff] }
 0x4a1   : > { %v6226_v22 = vld [vmem:[%s6485_s16] ss:$0 sm:$0xff] }
 0x4a2   : > { %v2716_v12 = vadd.f32 %v2700_v50, %v2620_v32  ;;  %v2663_v44 = vmul.f32 %v6145_v25, %v2625_v27  ;;  %v2628_v8 = vadd.f32 %v3886_v41, %v6143_v21  ;;  %v4386_v32 = vld [vmem:[%s6486_s17] sm:$0xff]  }
 0x4a3   : > { %3969 = vmatprep.subr.bf16.mxu1 %v4386_v32 }
 0x4a4   : > { %v2685_v18 = vadd.f32 %v6148_v19, %v2663_v44  ;;  %v2664_v26 = vmul.f32 %v6145_v25, %v2628_v8  ;;  %v3887_v29 = vpop.f32.mrb[56].mxu1  ;;  %v2746_v63 = vpack.c.bf16 %v2716_v12, %v2715_v6  ;;  %3970 = vmatpush3.bf16.msra.mxu1 %v4386_v32 }
 0x4a5   : > { %v3888_v37 = vpop.f32.mrb[57].mxu1 }
 0x4a6   : > { %v2701_v14 = vmax.f32 %v2685_v18, 0.0  ;;  %v2686_v60 = vadd.f32 %v6148_v19, %v2664_v26  ;;  %v3889_v59 = vadd.f32 %v3888_v37, %v3887_v29  ;;  %v3890_v55 = vpop.f32.mrb[58].mxu1  ;;  %3961 = vmatprep.mubr.bf16.mxu1 %v2746_v63 }
 0x4a7   : > { %v3891_v15 = vpop.f32.mrb[59].mxu1 }
 0x4a8   : > { %v2702_v0 = vmax.f32 %v2686_v60, 0.0  ;;  %v2633_v57 = vadd.f32 %v3889_v59, %v6143_v21  ;;  %v3892_v35 = vadd.f32 %v3891_v15, %v3890_v55  ;;  %v2717_v51 = vadd.f32 %v2701_v14, %v2625_v27 }
 0x4aa   : > { %v2718_v30 = vadd.f32 %v2702_v0, %v2628_v8  ;;  %v2665_v31 = vmul.f32 %v6145_v25, %v2633_v57  ;;  %v2636_v23 = vadd.f32 %v3892_v35, %v6143_v21 }
 0x4ac   : > { %v2687_v54 = vadd.f32 %v6148_v19, %v2665_v31  ;;  %v2666_v2 = vmul.f32 %v6145_v25, %v2636_v23  ;;  %v3893_v33 = vpop.f32.mrb[60].mxu1  ;;  %v2747_v34 = vpack.c.bf16 %v2718_v30, %v2717_v51 }
 0x4ad   : > { %v3894_v4 = vpop.f32.mrb[61].mxu1 }
 0x4ae   : > { %v2703_v7 = vmax.f32 %v2687_v54, 0.0  ;;  %v2688_v16 = vadd.f32 %v6148_v19, %v2666_v2  ;;  %v3895_v20 = vadd.f32 %v3894_v4, %v3893_v33  ;;  %v3896_v11 = vpop.f32.mrb[62].mxu1  ;;  %3962 = vmatmul.mubr.bf16.gmra.mrb[72].mxu1 %v2747_v34 }
 0x4af   : > { %v3897_v1 = vpop.f32.mrb[63].mxu1 }
 0x4b0   : > { %v2704_v49 = vmax.f32 %v2688_v16, 0.0  ;;  %v2641_v62 = vadd.f32 %v3895_v20, %v6143_v21  ;;  %v3898_v39 = vadd.f32 %v3897_v1, %v3896_v11  ;;  %v2719_v3 = vadd.f32 %v2703_v7, %v2633_v57 }
 0x4b2   : > { %v2720_v47 = vadd.f32 %v2704_v49, %v2636_v23  ;;  %v2667_v36 = vmul.f32 %v6145_v25, %v2641_v62  ;;  %v2644_v42 = vadd.f32 %v3898_v39, %v6143_v21  ;;  %v4387_v21 = vld [vmem:[%s6486_s17 + $0x8] sm:$0xff]  }
 0x4b3   : > { %3971 = vmatprep.subr.bf16.mxu1 %v4387_v21 }
 0x4b4   : > { %v2689_v53 = vadd.f32 %v6148_v19, %v2667_v36  ;;  %v2668_v52 = vmul.f32 %v6145_v25, %v2644_v42  ;;  %v2748_v38 = vpack.c.bf16 %v2720_v47, %v2719_v3  ;;  %3972 = vmatpush3.bf16.msra.mxu1 %v4387_v21  ;;  %v4388_v25 = vld [vmem:[%s6486_s17 + $0x10] sm:$0xff]  }
 0x4b5   : > { %3973 = vmatprep.subr.bf16.mxu1 %v4388_v25 }
 0x4b6   : > { %v2705_v17 = vmax.f32 %v2689_v53, 0.0  ;;  %v2690_v45 = vadd.f32 %v6148_v19, %v2668_v52  ;;  %3965 = vmatprep.mubr.bf16.mxu1 %v2748_v38  ;;  %v4389_v19 = vld [vmem:[%s6486_s17 + $0x18] sm:$0xff]  }
 0x4b8   : > { %v2706_v40 = vmax.f32 %v2690_v45, 0.0  ;;  %v2721_v46 = vadd.f32 %v2705_v17, %v2641_v62  ;;  %3974 = vmatpush3.bf16.msra.mxu1 %v4388_v25 }
 0x4b9   : > { %3975 = vmatprep.subr.bf16.mxu1 %v4389_v19 }
 0x4ba   : > { %v2722_v61 = vadd.f32 %v2706_v40, %v2644_v42 }
 0x4bc   : > { %v2749_v9 = vpack.c.bf16 %v2722_v61, %v2721_v46  ;;  %3976 = vmatpush3.bf16.msra.mxu1 %v4389_v19 }
 0x4bd   : > { %4013 = vmatprep.subr.bf16.mxu1 %v4390_v13 }
 0x4be   : > { %3966 = vmatmul.mubr.bf16.gmra.mrb[76].mxu1 %v2749_v9 }
 0x561   : > { %v3955_v48 = vpop.f32.mrb[64].mxu1 }
 0x562   : > { %v2847_v56 = vadd.f32 %v3955_v48, %v6215_v5  ;;  %v2838_v43 = vpop.f32.mrb[65].mxu1 }
 0x563   : > { %v2839_v10 = vadd.f32 %v6215_v5, %v2838_v43  ;;  %v3956_v28 = vpop.f32.mrb[66].mxu1 }
 0x564   : > { %v2909_v58 = vmul.f32 %v6220_v24, %v2847_v56  ;;  %v2850_v50 = vadd.f32 %v3956_v28, %v6215_v5  ;;  %v2841_v27 = vpop.f32.mrb[67].mxu1 }
 0x565   : > { %v2907_v41 = vmul.f32 %v6220_v24, %v2839_v10  ;;  %v2842_v6 = vadd.f32 %v6215_v5, %v2841_v27 }
 0x566   : > { %v2931_v12 = vadd.f32 %v6226_v22, %v2909_v58  ;;  %v2910_v44 = vmul.f32 %v6220_v24, %v2850_v50 }
 0x567   : > { %v2929_v8 = vadd.f32 %v6226_v22, %v2907_v41  ;;  %v2908_v18 = vmul.f32 %v6220_v24, %v2842_v6 }
 0x568   : > { %v2947_v26 = vmax.f32 %v2931_v12, 0.0  ;;  %v2932_v29 = vadd.f32 %v6226_v22, %v2910_v44 }
 0x569   : > { %v2945_v63 = vmax.f32 %v2929_v8, 0.0  ;;  %v2930_v37 = vadd.f32 %v6226_v22, %v2908_v18 }
 0x56a   : > { %v2948_v14 = vmax.f32 %v2932_v29, 0.0  ;;  %v2963_v59 = vadd.f32 %v2947_v26, %v2847_v56 }
 0x56b   : > { %v2946_v60 = vmax.f32 %v2930_v37, 0.0  ;;  %v2961_v15 = vadd.f32 %v2945_v63, %v2839_v10 }
 0x56c   : > { %v2964_v55 = vadd.f32 %v2948_v14, %v2850_v50 }
 0x56d   : > { %v2962_v0 = vadd.f32 %v2946_v60, %v2842_v6 }
 0x56e   : > { %v2989_v57 = vpack.c.bf16 %v2964_v55, %v2963_v59 }
 0x56f   : > { %v2988_v35 = vpack.c.bf16 %v2962_v0, %v2961_v15 }
 0x571   : > { %v3959_v51 = vpop.f32.mrb[68].mxu1  ;;  %3977 = vmatprep.mubr.msk.bf16.mxu1 %vm3026_vm1, %v2988_v35 }
 0x572   : > { %v2863_v30 = vadd.f32 %v3959_v51, %v6215_v5  ;;  %v2854_v31 = vpop.f32.mrb[69].mxu1  ;;  %3978 = vmatmul.mubr.msk.bf16.vlgmr.msra.gmra.mrb[80].mxu1 %vm3026_vm1, %v2989_v57 }
 0x573   : > { %v2855_v23 = vadd.f32 %v6215_v5, %v2854_v31  ;;  %v3960_v54 = vpop.f32.mrb[70].mxu1  ;;  %4015 = vmatpush3.bf16.msra.mxu1 %v4390_v13 }
 0x574   : > { %v2913_v2 = vmul.f32 %v6220_v24, %v2863_v30  ;;  %v2866_v33 = vadd.f32 %v3960_v54, %v6215_v5  ;;  %v2857_v34 = vpop.f32.mrb[71].mxu1 }
 0x575   : > { %v2911_v4 = vmul.f32 %v6220_v24, %v2855_v23  ;;  %v2858_v7 = vadd.f32 %v6215_v5, %v2857_v34 }
 0x576   : > { %v2935_v16 = vadd.f32 %v6226_v22, %v2913_v2  ;;  %v2914_v20 = vmul.f32 %v6220_v24, %v2866_v33 }
 0x577   : > { %v2933_v11 = vadd.f32 %v6226_v22, %v2911_v4  ;;  %v2912_v1 = vmul.f32 %v6220_v24, %v2858_v7 }
 0x578   : > { %v2951_v49 = vmax.f32 %v2935_v16, 0.0  ;;  %v2936_v62 = vadd.f32 %v6226_v22, %v2914_v20 }
 0x579   : > { %v2949_v39 = vmax.f32 %v2933_v11, 0.0  ;;  %v2934_v3 = vadd.f32 %v6226_v22, %v2912_v1 }
 0x57a   : > { %v2952_v47 = vmax.f32 %v2936_v62, 0.0  ;;  %v2967_v42 = vadd.f32 %v2951_v49, %v2863_v30 }
 0x57b   : > { %v2950_v36 = vmax.f32 %v2934_v3, 0.0  ;;  %v2965_v52 = vadd.f32 %v2949_v39, %v2855_v23  ;;  %v6288_v39 = vld [vmem:[#allocation20] ss:$0 sm:$0xff] }
 0x57c   : > { %v2968_v53 = vadd.f32 %v2952_v47, %v2866_v33 }
 0x57d   : > { %v2966_v38 = vadd.f32 %v2950_v36, %v2858_v7 }
 0x57e   : > { %v2991_v17 = vpack.c.bf16 %v2968_v53, %v2967_v42  ;;  %v6294_v42 = vld [vmem:[%s6587_s27] ss:$0 sm:$0xff]  ;;  %s3469_s27 = sshll.u32 %s6399_s1, 4  ;;  %s6421_s27 = int_to_ptr.vmem [resolvable:$true] %s3469_s27 }
 0x57f   : > { %v2990_v45 = vpack.c.bf16 %v2966_v38, %v2965_v52  ;;  %p4735_p12 = scmp.lt.s32.totalorder %s6421_s27, %s4733_s21 }
 0x581   : > { %v3963_v40 = vpop.f32.mrb[72].mxu1  ;;  %3981 = vmatprep.mubr.msk.bf16.mxu1 %vm3026_vm1, %v2990_v45 }
 0x582   : > { %v2879_v46 = vadd.f32 %v3963_v40, %v6215_v5  ;;  %v2870_v61 = vpop.f32.mrb[73].mxu1  ;;  %3982 = vmatmul.mubr.msk.bf16.gmra.mrb[84].mxu1 %vm3026_vm1, %v2991_v17 }
 0x583   : > { %v2871_v9 = vadd.f32 %v6215_v5, %v2870_v61  ;;  %v3964_v32 = vpop.f32.mrb[74].mxu1 }
 0x584   : > { %v2917_v21 = vmul.f32 %v6220_v24, %v2879_v46  ;;  %v2882_v25 = vadd.f32 %v3964_v32, %v6215_v5  ;;  %v2873_v19 = vpop.f32.mrb[75].mxu1 }
 0x585   : > { %v2915_v13 = vmul.f32 %v6220_v24, %v2871_v9  ;;  %v2874_v48 = vadd.f32 %v6215_v5, %v2873_v19 }
 0x586   : > { %v2939_v56 = vadd.f32 %v6226_v22, %v2917_v21  ;;  %v2918_v43 = vmul.f32 %v6220_v24, %v2882_v25 }
 0x587   : > { %v2937_v10 = vadd.f32 %v6226_v22, %v2915_v13  ;;  %v2916_v28 = vmul.f32 %v6220_v24, %v2874_v48  ;;  %v6309_v13 = vld [vmem:[%s6588_s5] ss:$0 sm:$0xff] }
 0x588   : > { %v2955_v58 = vmax.f32 %v2939_v56, 0.0  ;;  %v2940_v50 = vadd.f32 %v6226_v22, %v2918_v43 }
 0x589   : > { %v2953_v27 = vmax.f32 %v2937_v10, 0.0  ;;  %v2938_v41 = vadd.f32 %v6226_v22, %v2916_v28  ;;  %v6315_v28 = vld [vmem:[%s6589_s6] ss:$0 sm:$0xff]  ;;  %s4728_s6 = scalar_lea.vmem %s6421_s27, 2048 }
 0x58a   : > { %v2956_v6 = vmax.f32 %v2940_v50, 0.0  ;;  %v2971_v44 = vadd.f32 %v2955_v58, %v2879_v46  ;;  %p4729_p1 = scmp.ne.s32.totalorder %s6421_s27, %s4728_s6  ;;  %p4736_p10 = scmp.lt.s32.totalorder %s4734_s2, %s4728_s6 }
 0x58b   : > { %v2954_v12 = vmax.f32 %v2938_v41, 0.0  ;;  %v2969_v18 = vadd.f32 %v2953_v27, %v2871_v9 }
 0x58c   : > { %v2972_v8 = vadd.f32 %v2956_v6, %v2882_v25  ;;  %p4730_p5 = pnand %p4729_p1, %p6594_p6  ;;  %p4737_p2 = por %p4736_p10, %p4735_p12 }
 0x58d   : > { %v2970_v26 = vadd.f32 %v2954_v12, %v2874_v48 }
 0x58e   : > { %v2993_v29 = vpack.c.bf16 %v2972_v8, %v2971_v44  ;;  %p4731_p9 = pneg %p4730_p5 }
 0x58f   : > { %v2992_v63 = vpack.c.bf16 %v2970_v26, %v2969_v18 }
 0x590   : > { %p4738_p3 = pnand %p4737_p2, %p4731_p9 }
 0x591   : > { %v3967_v37 = vpop.f32.mrb[76].mxu1  ;;  %3985 = vmatprep.mubr.msk.bf16.mxu1 %vm3026_vm1, %v2992_v63 }
 0x592   : > { %v2895_v14 = vadd.f32 %v3967_v37, %v6215_v5  ;;  %v2886_v60 = vpop.f32.mrb[77].mxu1  ;;  %3986 = vmatmul.mubr.msk.bf16.gmra.mrb[88].mxu1 %vm3026_vm1, %v2993_v29 }
 0x593   : > { %v2887_v59 = vadd.f32 %v6215_v5, %v2886_v60  ;;  %v3968_v55 = vpop.f32.mrb[78].mxu1 }
 0x594   : > { %v2921_v15 = vmul.f32 %v6220_v24, %v2895_v14  ;;  %v2898_v0 = vadd.f32 %v3968_v55, %v6215_v5  ;;  %v2889_v57 = vpop.f32.mrb[79].mxu1 }
 0x595   : > { %v2919_v35 = vmul.f32 %v6220_v24, %v2887_v59  ;;  %v2890_v51 = vadd.f32 %v6215_v5, %v2889_v57 }
 0x596   : > { %v2943_v30 = vadd.f32 %v6226_v22, %v2921_v15  ;;  %v2922_v31 = vmul.f32 %v6220_v24, %v2898_v0 }
 0x597   : > { %v2941_v23 = vadd.f32 %v6226_v22, %v2919_v35  ;;  %v2920_v54 = vmul.f32 %v6220_v24, %v2890_v51  ;;  %v4391_v24 = vld [vmem:[%s6492_s23 + $0x8] sm:$0xff]  }
 0x598   : > { %v2959_v2 = vmax.f32 %v2943_v30, 0.0  ;;  %v2944_v33 = vadd.f32 %v6226_v22, %v2922_v31  ;;  %3995 = vmatprep.subr.bf16.mxu0 %v4391_v24  ;;  %4014 = vmatprep.subr.bf16.mxu1 %v4391_v24 }
 0x599   : > { %v2957_v34 = vmax.f32 %v2941_v23, 0.0  ;;  %v2942_v4 = vadd.f32 %v6226_v22, %v2920_v54  ;;  %3996 = vmatpush3.bf16.msra.mxu0 %v4391_v24  ;;  %4016 = vmatpush3.bf16.msra.mxu1 %v4391_v24  ;;  %v6286_v22 = vld [vmem:[#allocation19] ss:$0 sm:$0xff] }
 0x59a   : > { %v2960_v7 = vmax.f32 %v2944_v33, 0.0  ;;  %v2975_v20 = vadd.f32 %v2959_v2, %v2895_v14 }
 0x59b   : > { %v2958_v16 = vmax.f32 %v2942_v4, 0.0  ;;  %v2973_v1 = vadd.f32 %v2957_v34, %v2887_v59 }
 0x59c   : > { %v2976_v11 = vadd.f32 %v2960_v7, %v2898_v0 }
 0x59d   : > { %v2974_v5 = vadd.f32 %v2958_v16, %v2890_v51 }
 0x59e   : > { %v2995_v49 = vpack.c.bf16 %v2976_v11, %v2975_v20 }
 0x59f   : > { %v2994_v62 = vpack.c.bf16 %v2974_v5, %v2973_v1 }
 0x5a1   : > { %3989 = vmatprep.mubr.msk.bf16.mxu1 %vm3026_vm1, %v2994_v62 }
 0x5a2   : > { %3990 = vmatmul.mubr.msk.bf16.gmra.mrb[92].mxu1 %vm3026_vm1, %v2995_v49 }
 0x645   : > { %v3979_v3 = vpop.f32.mrb[80].mxu1 }
 0x646   : > { %v3094_v47 = vadd.f32 %v3979_v3, %v6286_v22  ;;  %v3085_v36 = vpop.f32.mrb[81].mxu1 }
 0x647   : > { %v3086_v53 = vadd.f32 %v6286_v22, %v3085_v36  ;;  %v3980_v52 = vpop.f32.mrb[82].mxu1 }
 0x648   : > { %v3156_v38 = vmul.f32 %v6288_v39, %v3094_v47  ;;  %v3097_v17 = vadd.f32 %v3980_v52, %v6286_v22  ;;  %v3088_v45 = vpop.f32.mrb[83].mxu1 }
 0x649   : > { %v3154_v40 = vmul.f32 %v6288_v39, %v3086_v53  ;;  %v3089_v46 = vadd.f32 %v6286_v22, %v3088_v45 }
 0x64a   : > { %v3178_v61 = vadd.f32 %v6294_v42, %v3156_v38  ;;  %v3157_v9 = vmul.f32 %v6288_v39, %v3097_v17 }
 0x64b   : > { %v3176_v32 = vadd.f32 %v6294_v42, %v3154_v40  ;;  %v3155_v21 = vmul.f32 %v6288_v39, %v3089_v46 }
 0x64c   : > { %v3194_v25 = vmax.f32 %v3178_v61, 0.0  ;;  %v3179_v19 = vadd.f32 %v6294_v42, %v3157_v9 }
 0x64d   : > { %v3192_v48 = vmax.f32 %v3176_v32, 0.0  ;;  %v3177_v56 = vadd.f32 %v6294_v42, %v3155_v21 }
 0x64e   : > { %v3210_v43 = vadd.f32 %v3194_v25, %v3094_v47  ;;  %v3195_v10 = vmax.f32 %v3179_v19, 0.0 }
 0x64f   : > { %v3208_v58 = vadd.f32 %v3192_v48, %v3086_v53  ;;  %v3193_v50 = vmax.f32 %v3177_v56, 0.0 }
 0x650   : > { %v3233_v27 = vmul.f32 %v6309_v13, %v3210_v43  ;;  %v3211_v41 = vadd.f32 %v3195_v10, %v3097_v17 }
 0x651   : > { %v3231_v6 = vmul.f32 %v6309_v13, %v3208_v58  ;;  %v3209_v12 = vadd.f32 %v3193_v50, %v3089_v46 }
 0x652   : > { %v3256_v44 = vadd.f32 %v6315_v28, %v3233_v27  ;;  %v3234_v8 = vmul.f32 %v6309_v13, %v3211_v41 }
 0x653   : > { %v3254_v18 = vadd.f32 %v6315_v28, %v3231_v6  ;;  %v3232_v26 = vmul.f32 %v6309_v13, %v3209_v12 }
 0x654   : > { %v3257_v29 = vadd.f32 %v6315_v28, %v3234_v8  ;;  %v3272_v14 = vmax.f32 %v3256_v44, 0.0 }
 0x655   : > { %v3255_v63 = vadd.f32 %v6315_v28, %v3232_v26  ;;  %v3983_v37 = vpop.f32.mrb[84].mxu1  ;;  %v3270_v15 = vmax.f32 %v3254_v18, 0.0 }
 0x656   : > { %v3273_v60 = vmax.f32 %v3257_v29, 0.0  ;;  %v3110_v59 = vadd.f32 %v3983_v37, %v6286_v22  ;;  %v3101_v55 = vpop.f32.mrb[85].mxu1 }
 0x657   : > { %v3271_v0 = vmax.f32 %v3255_v63, 0.0  ;;  %v3102_v57 = vadd.f32 %v6286_v22, %v3101_v55  ;;  %v3984_v35 = vpop.f32.mrb[86].mxu1 }
 0x658   : > { %v3287_v51 = vpack.c.bf16 %v3273_v60, %v3272_v14  ;;  %v3160_v30 = vmul.f32 %v6288_v39, %v3110_v59  ;;  %v3113_v31 = vadd.f32 %v3984_v35, %v6286_v22  ;;  %v3104_v23 = vpop.f32.mrb[87].mxu1 }
 0x659   : > { %v3158_v54 = vmul.f32 %v6288_v39, %v3102_v57  ;;  %v3105_v2 = vadd.f32 %v6286_v22, %v3104_v23  ;;  %v3286_v33 = vpack.c.bf16 %v3271_v0, %v3270_v15 }
 0x65a   : > { %v3182_v34 = vadd.f32 %v6294_v42, %v3160_v30  ;;  %v3161_v4 = vmul.f32 %v6288_v39, %v3113_v31 }
 0x65b   : > { %v3180_v7 = vadd.f32 %v6294_v42, %v3158_v54  ;;  %v3159_v16 = vmul.f32 %v6288_v39, %v3105_v2  ;;  %3997 = vmatprep.mubr.msk.bf16.mxu0 %vm3317_vm2, %v3286_v33 }
 0x65c   : > { %v3198_v20 = vmax.f32 %v3182_v34, 0.0  ;;  %v3183_v11 = vadd.f32 %v6294_v42, %v3161_v4  ;;  %3998 = vmatmul.mubr.msk.bf16.vlgmr.msra.gmra.mrb[64].mxu0 %vm3317_vm2, %v3287_v51 }
 0x65d   : > { %v3196_v1 = vmax.f32 %v3180_v7, 0.0  ;;  %v3181_v5 = vadd.f32 %v6294_v42, %v3159_v16 }
 0x65e   : > { %v3214_v49 = vadd.f32 %v3198_v20, %v3110_v59  ;;  %v3199_v62 = vmax.f32 %v3183_v11, 0.0 }
 0x65f   : > { %v3212_v24 = vadd.f32 %v3196_v1, %v3102_v57  ;;  %v3197_v3 = vmax.f32 %v3181_v5, 0.0 }
 0x660   : > { %v3237_v47 = vmul.f32 %v6309_v13, %v3214_v49  ;;  %v3215_v36 = vadd.f32 %v3199_v62, %v3113_v31 }
 0x661   : > { %v3235_v53 = vmul.f32 %v6309_v13, %v3212_v24  ;;  %v3213_v52 = vadd.f32 %v3197_v3, %v3105_v2 }
 0x662   : > { %v3260_v38 = vadd.f32 %v6315_v28, %v3237_v47  ;;  %v3238_v17 = vmul.f32 %v6309_v13, %v3215_v36 }
 0x663   : > { %v3258_v45 = vadd.f32 %v6315_v28, %v3235_v53  ;;  %v3236_v40 = vmul.f32 %v6309_v13, %v3213_v52 }
 0x664   : > { %v3261_v46 = vadd.f32 %v6315_v28, %v3238_v17  ;;  %v3276_v32 = vmax.f32 %v3260_v38, 0.0 }
 0x665   : > { %v3259_v61 = vadd.f32 %v6315_v28, %v3236_v40  ;;  %v3987_v9 = vpop.f32.mrb[88].mxu1  ;;  %v3274_v48 = vmax.f32 %v3258_v45, 0.0 }
 0x666   : > { %v3277_v21 = vmax.f32 %v3261_v46, 0.0  ;;  %v3126_v25 = vadd.f32 %v3987_v9, %v6286_v22  ;;  %v3117_v19 = vpop.f32.mrb[89].mxu1 }
 0x667   : > { %v3275_v56 = vmax.f32 %v3259_v61, 0.0  ;;  %v3118_v43 = vadd.f32 %v6286_v22, %v3117_v19  ;;  %v3988_v10 = vpop.f32.mrb[90].mxu1 }
 0x668   : > { %v3164_v58 = vmul.f32 %v6288_v39, %v3126_v25  ;;  %v3129_v50 = vadd.f32 %v3988_v10, %v6286_v22  ;;  %v3120_v27 = vpop.f32.mrb[91].mxu1  ;;  %v3289_v41 = vpack.c.bf16 %v3277_v21, %v3276_v32 }
 0x669   : > { %v3162_v6 = vmul.f32 %v6288_v39, %v3118_v43  ;;  %v3121_v12 = vadd.f32 %v6286_v22, %v3120_v27  ;;  %v3288_v44 = vpack.c.bf16 %v3275_v56, %v3274_v48 }
 0x66a   : > { %v3186_v8 = vadd.f32 %v6294_v42, %v3164_v58  ;;  %v3165_v18 = vmul.f32 %v6288_v39, %v3129_v50 }
 0x66b   : > { %v3184_v26 = vadd.f32 %v6294_v42, %v3162_v6  ;;  %v3163_v29 = vmul.f32 %v6288_v39, %v3121_v12  ;;  %4001 = vmatprep.mubr.msk.bf16.mxu0 %vm3317_vm2, %v3288_v44 }
 0x66c   : > { %v3202_v63 = vmax.f32 %v3186_v8, 0.0  ;;  %v3187_v37 = vadd.f32 %v6294_v42, %v3165_v18  ;;  %4002 = vmatmul.mubr.msk.bf16.gmra.mrb[68].mxu0 %vm3317_vm2, %v3289_v41 }
 0x66d   : > { %v3200_v14 = vmax.f32 %v3184_v26, 0.0  ;;  %v3185_v60 = vadd.f32 %v6294_v42, %v3163_v29 }
 0x66e   : > { %v3218_v59 = vadd.f32 %v3202_v63, %v3126_v25  ;;  %v3203_v55 = vmax.f32 %v3187_v37, 0.0 }
 0x66f   : > { %v3216_v15 = vadd.f32 %v3200_v14, %v3118_v43  ;;  %v3201_v0 = vmax.f32 %v3185_v60, 0.0 }
 0x670   : > { %v3241_v57 = vmul.f32 %v6309_v13, %v3218_v59  ;;  %v3219_v35 = vadd.f32 %v3203_v55, %v3129_v50 }
 0x671   : > { %v3239_v51 = vmul.f32 %v6309_v13, %v3216_v15  ;;  %v3217_v30 = vadd.f32 %v3201_v0, %v3121_v12 }
 0x672   : > { %v3264_v31 = vadd.f32 %v6315_v28, %v3241_v57  ;;  %v3242_v23 = vmul.f32 %v6309_v13, %v3219_v35 }
 0x673   : > { %v3262_v54 = vadd.f32 %v6315_v28, %v3239_v51  ;;  %v3240_v2 = vmul.f32 %v6309_v13, %v3217_v30 }
 0x674   : > { %v3265_v33 = vadd.f32 %v6315_v28, %v3242_v23  ;;  %v3280_v7 = vmax.f32 %v3264_v31, 0.0 }
 0x675   : > { %v3263_v34 = vadd.f32 %v6315_v28, %v3240_v2  ;;  %v3991_v4 = vpop.f32.mrb[92].mxu1  ;;  %v3278_v1 = vmax.f32 %v3262_v54, 0.0 }
 0x676   : > { %v3281_v16 = vmax.f32 %v3265_v33, 0.0  ;;  %v3142_v20 = vadd.f32 %v3991_v4, %v6286_v22  ;;  %v3133_v11 = vpop.f32.mrb[93].mxu1 }
 0x677   : > { %v3279_v5 = vmax.f32 %v3263_v34, 0.0  ;;  %v3134_v49 = vadd.f32 %v6286_v22, %v3133_v11  ;;  %v3992_v62 = vpop.f32.mrb[94].mxu1 }
 0x678   : > { %v3291_v24 = vpack.c.bf16 %v3281_v16, %v3280_v7  ;;  %v3168_v3 = vmul.f32 %v6288_v39, %v3142_v20  ;;  %v3145_v47 = vadd.f32 %v3992_v62, %v6286_v22  ;;  %v3136_v36 = vpop.f32.mrb[95].mxu1 }
 0x679   : > { %v3166_v53 = vmul.f32 %v6288_v39, %v3134_v49  ;;  %v3137_v52 = vadd.f32 %v6286_v22, %v3136_v36  ;;  %v3290_v38 = vpack.c.bf16 %v3279_v5, %v3278_v1 }
 0x67a   : > { %v3190_v17 = vadd.f32 %v6294_v42, %v3168_v3  ;;  %v3169_v45 = vmul.f32 %v6288_v39, %v3145_v47 }
 0x67b   : > { %v3188_v40 = vadd.f32 %v6294_v42, %v3166_v53  ;;  %v3167_v46 = vmul.f32 %v6288_v39, %v3137_v52  ;;  %4005 = vmatprep.mubr.msk.bf16.mxu1 %vm3317_vm2, %v3290_v38 }
 0x67c   : > { %v3206_v61 = vmax.f32 %v3190_v17, 0.0  ;;  %v3191_v9 = vadd.f32 %v6294_v42, %v3169_v45  ;;  %4006 = vmatmul.mubr.msk.bf16.vlgmr.msra.gmra.mrb[96].mxu1 %vm3317_vm2, %v3291_v24 }
 0x67d   : > { %v3204_v32 = vmax.f32 %v3188_v40, 0.0  ;;  %v3189_v21 = vadd.f32 %v6294_v42, %v3167_v46 }
 0x67e   : > { %v3222_v22 = vadd.f32 %v3206_v61, %v3142_v20  ;;  %v3207_v25 = vmax.f32 %v3191_v9, 0.0 }
 0x67f   : > { %v3220_v19 = vadd.f32 %v3204_v32, %v3134_v49  ;;  %v3205_v48 = vmax.f32 %v3189_v21, 0.0 }
 0x680   : > { %v3245_v56 = vmul.f32 %v6309_v13, %v3222_v22  ;;  %v3223_v43 = vadd.f32 %v3207_v25, %v3145_v47 }
 0x681   : > { %v3243_v10 = vmul.f32 %v6309_v13, %v3220_v19  ;;  %v3221_v39 = vadd.f32 %v3205_v48, %v3137_v52 }
 0x682   : > { %v3268_v58 = vadd.f32 %v6315_v28, %v3245_v56  ;;  %v3246_v50 = vmul.f32 %v6309_v13, %v3223_v43 }
 0x683   : > { %v3266_v27 = vadd.f32 %v6315_v28, %v3243_v10  ;;  %v3244_v42 = vmul.f32 %v6309_v13, %v3221_v39  ;;  %v3818_v13 = vld [vmem:[%s6591_s30] ss:$0 sm:$0xff] }
 0x684   : > { %v3269_v41 = vadd.f32 %v6315_v28, %v3246_v50  ;;  %v3284_v12 = vmax.f32 %v3268_v58, 0.0 }
 0x685   : > { %v3267_v6 = vadd.f32 %v6315_v28, %v3244_v42  ;;  %v3282_v8 = vmax.f32 %v3266_v27, 0.0 }
 0x686   : > { %v3285_v44 = vmax.f32 %v3269_v41, 0.0 }
 0x687   : > { %v3283_v18 = vmax.f32 %v3267_v6, 0.0 }
 0x688   : > { %v3293_v26 = vpack.c.bf16 %v3285_v44, %v3284_v12 }
 0x689   : > { %v3292_v29 = vpack.c.bf16 %v3283_v18, %v3282_v8 }
 0x68b   : > { %4009 = vmatprep.mubr.msk.bf16.mxu1 %vm3317_vm2, %v3292_v29 }
 0x68c   : > { %4010 = vmatmul.mubr.msk.bf16.gmra.mrb[100].mxu1 %vm3317_vm2, %v3293_v26 }
 0x72f   : > { %v3999_v63 = vpop.f32.mrb[64].mxu0 }
 0x730   : > { %v3385_v37 = vadd.f32 %v3999_v63, %v3818_v13  ;;  %v3376_v28 = vpop.f32.mrb[65].mxu0 }
 0x731   : > { %v3377_v14 = vadd.f32 %v3818_v13, %v3376_v28  ;;  %v4000_v60 = vpop.f32.mrb[66].mxu0 }
 0x732   : > { %3441 = vst [vmem:[%s6399_s1 + $0x10] sm:$0xff] %v3385_v37  ;;  %v3388_v59 = vadd.f32 %v4000_v60, %v3818_v13  ;;  %v3379_v55 = vpop.f32.mrb[67].mxu0 }
 0x733   : > { %3439 = vst [vmem:[%s6399_s1] sm:$0xff] %v3377_v14  ;;  %v3380_v15 = vadd.f32 %v3818_v13, %v3379_v55 }
 0x734   : > { %3442 = vst [vmem:[%s6399_s1 + $0x18] sm:$0xff] %v3388_v59 }
 0x735   : > { %3440 = vst [vmem:[%s6399_s1 + $0x8] sm:$0xff] %v3380_v15 }
 0x73f   : > { %v4003_v0 = vpop.f32.mrb[68].mxu0 }
 0x740   : > { %v3401_v57 = vadd.f32 %v4003_v0, %v3818_v13  ;;  %v3392_v35 = vpop.f32.mrb[69].mxu0 }
 0x741   : > { %v3393_v51 = vadd.f32 %v3818_v13, %v3392_v35  ;;  %v4004_v30 = vpop.f32.mrb[70].mxu0 }
 0x742   : > { %3445 = vst [vmem:[%s6399_s1 + $0x30] sm:$0xff] %v3401_v57  ;;  %v3404_v31 = vadd.f32 %v4004_v30, %v3818_v13  ;;  %v3395_v23 = vpop.f32.mrb[71].mxu0 }
 0x743   : > { %3443 = vst [vmem:[%s6399_s1 + $0x20] sm:$0xff] %v3393_v51  ;;  %v3396_v54 = vadd.f32 %v3818_v13, %v3395_v23 }
 0x744   : > { %3446 = vst [vmem:[%s6399_s1 + $0x38] sm:$0xff] %v3404_v31 }
 0x745   : > { %3444 = vst [vmem:[%s6399_s1 + $0x28] sm:$0xff] %v3396_v54 }
 0x74f   : > { %v4007_v2 = vpop.f32.mrb[96].mxu1 }
 0x750   : > { %v3417_v33 = vadd.f32 %v4007_v2, %v3818_v13  ;;  %v3408_v34 = vpop.f32.mrb[97].mxu1 }
 0x751   : > { %v3409_v4 = vadd.f32 %v3818_v13, %v3408_v34  ;;  %v4008_v7 = vpop.f32.mrb[98].mxu1 }
 0x752   : > { %3449 = vst [vmem:[%s6399_s1 + $0x50] sm:$0xff] %v3417_v33  ;;  %v3420_v16 = vadd.f32 %v4008_v7, %v3818_v13  ;;  %v3411_v20 = vpop.f32.mrb[99].mxu1 }
 0x753   : > { %3447 = vst [vmem:[%s6399_s1 + $0x40] sm:$0xff] %v3409_v4  ;;  %v3412_v11 = vadd.f32 %v3818_v13, %v3411_v20 }
 0x754   : > { %3450 = vst [vmem:[%s6399_s1 + $0x58] sm:$0xff] %v3420_v16 }
 0x755   : > { %3448 = vst [vmem:[%s6399_s1 + $0x48] sm:$0xff] %v3412_v11 }
 0x75f   : > { %v4011_v1 = vpop.f32.mrb[100].mxu1 }
 0x760   : > { %v3433_v5 = vadd.f32 %v4011_v1, %v3818_v13  ;;  %v3424_v49 = vpop.f32.mrb[101].mxu1 }
 0x761   : > { %v3425_v62 = vadd.f32 %v3818_v13, %v3424_v49  ;;  %v4012_v24 = vpop.f32.mrb[102].mxu1 }
 0x762   : > { %3453 = vst [vmem:[%s6399_s1 + $0x70] sm:$0xff] %v3433_v5  ;;  %v3436_v3 = vadd.f32 %v4012_v24, %v3818_v13  ;;  %v3427_v47 = vpop.f32.mrb[103].mxu1 }
 0x763   : > { %3451 = vst [vmem:[%s6399_s1 + $0x60] sm:$0xff] %v3425_v62  ;;  %v3428_v36 = vadd.f32 %v3818_v13, %v3427_v47 }
 0x764   : > { %3454 = vst [vmem:[%s6399_s1 + $0x78] sm:$0xff] %v3436_v3 }
 0x765   : > { %3452 = vst [vmem:[%s6399_s1 + $0x68] sm:$0xff] %v3428_v36 }
 0x766   : > { %4741 = shalt.err (!%p4738_p3)
}
 0x767   : > { %s4742_s3 = scalar_lea.hbm %s6419_s8, 2048  ;;  %s4746_s1 = scalar_lea.hbm %s6593_s9, 4096 }
 0x768   : > { %p4743_p4 = scmp.ne.s32.totalorder %s6419_s8, %s4742_s3  ;;  %p4747_p11 = scmp.lt.u32.totalorder %s6419_s8, %s6593_s9 }
 0x769   : > { %p4748_p13 = scmp.lt.u32.totalorder %s4746_s1, %s4742_s3  ;;  %p4750_p1 = scmp.lt.u32.totalorder %s4742_s3, %s6419_s8 }
 0x76a   : > { %p4744_p7 = pnand %p4743_p4, %p6594_p6 }
 0x76b   : > { %p4749_p0 = por %p4748_p13, %p4747_p11 }
 0x76c   : > { %p4745_p8 = pneg %p4744_p7 }
 0x76d   : > { %p4751_p5 = por %p4750_p1, %p4749_p0 }
 0x76f   : > { %p4752_p9 = pnand %p4751_p5, %p4745_p8 }
 0x771   : > { %4755 = shalt.err (!%p4752_p9)
}
 0x772   : > { %s4838_s5 = smov 128   ;;  %s4839_s6 = smov 8  }
 0x773   : > { %4129 = dma.vmem_to_hbm [thread:$0]  (%p6594_p6), %s6421_s27, 2048, %s6419_s8, %s6428_s7, %s4838_s5, %s4838_s5, %s4839_s6  }
 0x774 PF: > { %s6595_s22 = sld [smem:[#allocation34_spill]]  ;;  %s6596_s21 = sld [smem:[#allocation31_spill]] }
 0x775   : > { %s6597_s2 = sld [smem:[#allocation38_spill]] }
 0x77a   : > { %p4196_p12 = scmp.ge.s32.totalorder %s6595_s22, 2  ;;  %s3484_s24 = sand.u32 1, %s6596_s21  }
 0x77b   : > { %p6598_p10 = scmp.ne.s32.totalorder %s6597_s2, 0  ;;  %s3485_s3 = scalar_lea.sflag [#allocation4], %s3484_s24 }
 0x77d   : > { %p4169_p2 = pnand %p4196_p12, %p6598_p10 }
 0x77f   : > { %4801 = dma.done.wait (!%p4169_p2), %s3485_s3, 2048  }
 0x780   : > { %4803 = vsyncadd (!%p4169_p2), %s3485_s3, 4294965248  ;;  %s6599_s30 = sld [smem:[#allocation35_spill]]  ;;  %s6600_s29 = sld [smem:[#allocation32_spill]] }
 0x781   : > { %s6601_s2 = sld [smem:[#allocation33_spill]]  ;;  %s6602_s6 = sld [smem:[#allocation36_spill]] }
 0x786   : > { %p42_p3 = scmp.ge.s32.totalorder %s6599_s30, 4  }
 0x788   :  { %44 = sbr.rel (!%p42_p3) target bundleno = 27 (0x1b), region = 204 }
 0x78f   :  { %3490 = vsyncpa [#allocation3], 1 }
 0x790   :  { %3492 = vsyncpa [#allocation3 + $0x1], 1 }
 0x791   :  { %3493 = vsyncpa [#allocation6], 1 }
 0x792   :  { %3494 = vsyncpa [#allocation9], 1 }
 0x793   :  { %3495 = vsyncpa [#allocation12], 1 }
 0x794   :  { %3496 = vsyncpa [#allocation15], 1 }
 0x795   :  { %3497 = vsyncpa [#allocation18], 1 }
 0x796   :  { %3498 = vsyncpa [#allocation21], 1 }
 0x797   :  { %3499 = vsyncpa [#allocation4], 1 }
 0x798   :  { %3501 = vsyncpa [#allocation4 + $0x1], 1 }

</bundles_post_ra>
